<compile_context>
chip_gen: v5e
topology: v5e:2x2
jax: 0.10.0
libtpu: 0.0.40
codegen_flags: <defaults>
</compile_context>

<pallas_src>
import functools

import jax
import jax.numpy as jnp
from jax.experimental import pallas as pl
from jax.experimental.pallas import tpu as pltpu

D_IN, D_H1, D_H2, D_OUT = 2048, 512, 128, 2


def _mlp_kernel(x_ref, w1_ref, b1_ref, w2_ref, b2_ref, w3_ref, b3_ref, o_ref):
    # x streams from HBM as f32 (half the traffic of a separate wrapper cast);
    # cast to bf16 on the VPU right before feeding the MXU.
    x = x_ref[...].astype(jnp.bfloat16)

    # fc1: bf16 matmul on the MXU, f32 accumulation, f32 bias + ReLU.
    h1 = jnp.dot(x, w1_ref[...], preferred_element_type=jnp.float32)
    h1 = jnp.maximum(h1 + b1_ref[...], 0.0)
    # dropout -> identity (eval mode)
    h1 = h1.astype(jnp.bfloat16)

    # fc2 + bias + ReLU
    h2 = jnp.dot(h1, w2_ref[...], preferred_element_type=jnp.float32)
    h2 = jnp.maximum(h2 + b2_ref[...], 0.0)
    # dropout -> identity (eval mode)
    h2 = h2.astype(jnp.bfloat16)

    # fc3 (no activation); last-dim=2 output lane waste is negligible.
    h3 = jnp.dot(h2, w3_ref[...], preferred_element_type=jnp.float32)
    o_ref[...] = (h3 + b3_ref[...]).astype(o_ref.dtype)


def _pick_batch_tile(B, requested, max_tile=512):
    """Tile the batch so there are >=2 grid steps (v7x megacore) when B > 8,
    the sublane dim stays a multiple of 8, and the tile caps at max_tile."""
    if requested is not None:
        return requested
    half = -(-B // 2)          # cdiv(B, 2)
    tile = -(-half // 8) * 8   # round up to a multiple of 8
    return max(8, min(max_tile, tile))


@functools.partial(jax.jit, static_argnames=("batch_tile",))
def deep_nn_forward(x, params, batch_tile=None):
    """x: (B, 2048) float32  ->  (B, 2) float32."""
    w1, b1, w2, b2, w3, b3 = params
    B = x.shape[0]
    tile = _pick_batch_tile(B, batch_tile)
    n_tiles = pl.cdiv(B, tile)

    # Weights go to bf16 (tiny one-time casts); x stays f32 and is cast in-kernel.
    w1b = w1.astype(jnp.bfloat16)
    w2b = w2.astype(jnp.bfloat16)
    w3b = w3.astype(jnp.bfloat16)

    # Weights/biases are small (~2.2 MiB bf16), grid-invariant (constant
    # index_map) and single-buffered; only activation rows are tiled.
    def resident(shape):
        return pl.BlockSpec(
            shape, lambda i: (0,) * len(shape), pipeline_mode=pl.Buffered(1)
        )

    flops = 2 * B * (D_IN * D_H1 + D_H1 * D_H2 + D_H2 * D_OUT)
    bytes_accessed = (
        B * D_IN * 4                                       # x (f32)
        + (D_IN * D_H1 + D_H1 * D_H2 + D_H2 * D_OUT) * 2   # weights (bf16)
        + (D_H1 + D_H2 + D_OUT) * 4                        # biases (f32)
        + B * D_OUT * 4                                     # out (f32)
    )

    out = pl.pallas_call(
        _mlp_kernel,
        out_shape=jax.ShapeDtypeStruct((B, D_OUT), jnp.float32),
        grid_spec=pltpu.PrefetchScalarGridSpec(
            num_scalar_prefetch=0,
            grid=(n_tiles,),
            in_specs=[
                pl.BlockSpec((tile, D_IN), lambda i: (i, 0)),  # x tile (f32)
                resident((D_IN, D_H1)),   # w1 (bf16)
                resident((1, D_H1)),      # b1 (f32)
                resident((D_H1, D_H2)),   # w2 (bf16)
                resident((1, D_H2)),      # b2 (f32)
                resident((D_H2, D_OUT)),  # w3 (bf16)
                resident((1, D_OUT)),     # b3 (f32)
            ],
            out_specs=pl.BlockSpec((tile, D_OUT), lambda i: (i, 0)),
        ),
        compiler_params=pltpu.CompilerParams(
            # Batch axis is embarrassingly parallel -> megacore sharding on v7x.
            dimension_semantics=("parallel",),
            # Keep the 512-row tile viable on v5e's 16 MiB scoped default;
            # safe (< physical) on every generation.
            vmem_limit_bytes=48 * 1024 * 1024,
        ),
        cost_estimate=pl.CostEstimate(
            flops=flops, transcendentals=0, bytes_accessed=bytes_accessed
        ),
    )(x, w1b, b1, w2b, b2, w3b, b3)

    return out


def init_params(key):
    """Deterministic parameter init (uniform, roughly matching nn.Linear scale)."""
    ks = jax.random.split(key, 6)

    def linear(kw, kb, fan_in, fan_out):
        bound = 1.0 / jnp.sqrt(fan_in)
        w = jax.random.uniform(kw, (fan_in, fan_out), jnp.float32, -bound, bound)
        b = jax.random.uniform(kb, (1, fan_out), jnp.float32, -bound, bound)
        return w, b

    w1, b1 = linear(ks[0], ks[1], D_IN, D_H1)
    w2, b2 = linear(ks[2], ks[3], D_H1, D_H2)
    w3, b3 = linear(ks[4], ks[5], D_H2, D_OUT)
    return (w1, b1, w2, b2, w3, b3)


if __name__ == "__main__":
    key = jax.random.PRNGKey(0)
    k_x, k_p = jax.random.split(key)

    # Small batch, deliberately NOT a multiple of the chosen tile, so the run
    # exercises both the ragged-last-block path and a 2-step (grid=2) pipeline.
    B = 12
    x = jax.random.normal(k_x, (B, D_IN), dtype=jnp.float32)
    params = init_params(k_p)

    out = deep_nn_forward(x, params)
    out = jax.block_until_ready(out)

    # Pure-JAX reference following the same bf16-compute / f32-accumulate path.
    w1, b1, w2, b2, w3, b3 = params
    xb = x.astype(jnp.bfloat16)
    w1b, w2b, w3b = (w.astype(jnp.bfloat16) for w in (w1, w2, w3))
    ref = jnp.maximum(
        jnp.dot(xb, w1b, preferred_element_type=jnp.float32) + b1, 0.0)
    ref = jnp.maximum(
        jnp.dot(ref.astype(jnp.bfloat16), w2b,
                preferred_element_type=jnp.float32) + b2, 0.0)
    ref = jnp.dot(ref.astype(jnp.bfloat16), w3b,
                  preferred_element_type=jnp.float32) + b3

    assert out.shape == (B, D_OUT)
    # bf16 matmul with K=2048: allow ~1e-2-scale differences.
    assert jnp.allclose(out, ref, atol=5e-2, rtol=5e-2), (
        float(jnp.max(jnp.abs(out - ref))))

    print("KERNEL_OK")
</pallas_src>

<mosaic_0001>
module attributes {stable_mosaic.version = 11 : i64} {
  func.func @_mlp_kernel(%arg0: i32, %arg1: memref<8x2048xf32, #tpu.memory_space<vmem>>, %arg2: memref<2048x512xbf16, #tpu.memory_space<vmem>>, %arg3: memref<1x512xf32, #tpu.memory_space<vmem>>, %arg4: memref<512x128xbf16, #tpu.memory_space<vmem>>, %arg5: memref<1x128xf32, #tpu.memory_space<vmem>>, %arg6: memref<128x2xbf16, #tpu.memory_space<vmem>>, %arg7: memref<1x2xf32, #tpu.memory_space<vmem>>, %arg8: memref<8x2xf32, #tpu.memory_space<vmem>>) attributes {dimension_semantics = [#tpu.dimension_semantics<parallel>], iteration_bounds = array<i64: 2>, scalar_prefetch = 0 : i64, scratch_operands = 0 : i64, tpu.core_type = #tpu.core_type<tc>, window_params = [{transform_indices = @transform_0, window_bounds = array<i64: 8, 2048>}, {pipeline_mode = #tpu.pipeline_mode<synchronous>, transform_indices = @transform_1, window_bounds = array<i64: 2048, 512>}, {pipeline_mode = #tpu.pipeline_mode<synchronous>, transform_indices = @transform_2, window_bounds = array<i64: 1, 512>}, {pipeline_mode = #tpu.pipeline_mode<synchronous>, transform_indices = @transform_3, window_bounds = array<i64: 512, 128>}, {pipeline_mode = #tpu.pipeline_mode<synchronous>, transform_indices = @transform_4, window_bounds = array<i64: 1, 128>}, {pipeline_mode = #tpu.pipeline_mode<synchronous>, transform_indices = @transform_5, window_bounds = array<i64: 128, 2>}, {pipeline_mode = #tpu.pipeline_mode<synchronous>, transform_indices = @transform_6, window_bounds = array<i64: 1, 2>}, {transform_indices = @transform_7, window_bounds = array<i64: 8, 2>}]} {
    %c0 = arith.constant 0 : index
    %c0_0 = arith.constant 0 : index
    %0 = vector.load %arg1[%c0, %c0_0] : memref<8x2048xf32, #tpu.memory_space<vmem>>, vector<8x2048xf32>
    %1 = arith.truncf %0 : vector<8x2048xf32> to vector<8x2048xbf16>
    %c0_1 = arith.constant 0 : index
    %c0_2 = arith.constant 0 : index
    %2 = vector.load %arg2[%c0_1, %c0_2] : memref<2048x512xbf16, #tpu.memory_space<vmem>>, vector<2048x512xbf16>
    %cst = arith.constant dense<0.000000e+00> : vector<8x512xf32>
    %3 = tpu.matmul %1, %2, %cst {dimension_numbers = #tpu.dot_dimension_numbers<[1], [0], [0], [1], [0, 0, 1, 1], [], []>} : vector<8x2048xbf16>, vector<2048x512xbf16>, vector<8x512xf32> -> vector<8x512xf32>
    %c0_3 = arith.constant 0 : index
    %c0_4 = arith.constant 0 : index
    %4 = vector.load %arg3[%c0_3, %c0_4] : memref<1x512xf32, #tpu.memory_space<vmem>>, vector<1x512xf32>
    %5 = vector.broadcast %4 : vector<1x512xf32> to vector<8x512xf32>
    %6 = arith.addf %3, %5 : vector<8x512xf32>
    %cst_5 = arith.constant 0.000000e+00 : f32
    %7 = vector.broadcast %cst_5 : f32 to vector<8x512xf32>
    %8 = arith.maximumf %6, %7 : vector<8x512xf32>
    %9 = arith.truncf %8 : vector<8x512xf32> to vector<8x512xbf16>
    %c0_6 = arith.constant 0 : index
    %c0_7 = arith.constant 0 : index
    %10 = vector.load %arg4[%c0_6, %c0_7] : memref<512x128xbf16, #tpu.memory_space<vmem>>, vector<512x128xbf16>
    %cst_8 = arith.constant dense<0.000000e+00> : vector<8x128xf32>
    %11 = tpu.matmul %9, %10, %cst_8 {dimension_numbers = #tpu.dot_dimension_numbers<[1], [0], [0], [1], [0, 0, 1, 1], [], []>} : vector<8x512xbf16>, vector<512x128xbf16>, vector<8x128xf32> -> vector<8x128xf32>
    %c0_9 = arith.constant 0 : index
    %c0_10 = arith.constant 0 : index
    %12 = vector.load %arg5[%c0_9, %c0_10] : memref<1x128xf32, #tpu.memory_space<vmem>>, vector<1x128xf32>
    %13 = vector.broadcast %12 : vector<1x128xf32> to vector<8x128xf32>
    %14 = arith.addf %11, %13 : vector<8x128xf32>
    %cst_11 = arith.constant 0.000000e+00 : f32
    %15 = vector.broadcast %cst_11 : f32 to vector<8x128xf32>
    %16 = arith.maximumf %14, %15 : vector<8x128xf32>
    %17 = arith.truncf %16 : vector<8x128xf32> to vector<8x128xbf16>
    %c0_12 = arith.constant 0 : index
    %c0_13 = arith.constant 0 : index
    %18 = vector.load %arg6[%c0_12, %c0_13] : memref<128x2xbf16, #tpu.memory_space<vmem>>, vector<128x2xbf16>
    %cst_14 = arith.constant dense<0.000000e+00> : vector<8x2xf32>
    %19 = tpu.matmul %17, %18, %cst_14 {dimension_numbers = #tpu.dot_dimension_numbers<[1], [0], [0], [1], [0, 0, 1, 1], [], []>} : vector<8x128xbf16>, vector<128x2xbf16>, vector<8x2xf32> -> vector<8x2xf32>
    %c0_15 = arith.constant 0 : index
    %c0_16 = arith.constant 0 : index
    %20 = vector.load %arg7[%c0_15, %c0_16] : memref<1x2xf32, #tpu.memory_space<vmem>>, vector<1x2xf32>
    %21 = vector.broadcast %20 : vector<1x2xf32> to vector<8x2xf32>
    %22 = arith.addf %19, %21 : vector<8x2xf32>
    %c0_17 = arith.constant 0 : index
    %c0_18 = arith.constant 0 : index
    %23 = vector.load %arg8[%c0_17, %c0_18] : memref<8x2xf32, #tpu.memory_space<vmem>>, vector<8x2xf32>
    tpu.vector_store %arg8[%c0_17, %c0_18], %22 {strides = array<i32>} : memref<8x2xf32, #tpu.memory_space<vmem>>, vector<8x2xf32>,
    return
  }
  func.func @transform_0(%arg0: i32) -> (i32, i32) {
    %c0_i32 = arith.constant 0 : i32
    %c0_i32_0 = arith.constant 0 : i32
    return %arg0, %c0_i32 : i32, i32
  }
  func.func @transform_1(%arg0: i32) -> (i32, i32) {
    %c0_i32 = arith.constant 0 : i32
    %c0_i32_0 = arith.constant 0 : i32
    %c0_i32_1 = arith.constant 0 : i32
    return %c0_i32, %c0_i32_0 : i32, i32
  }
  func.func @transform_2(%arg0: i32) -> (i32, i32) {
    %c0_i32 = arith.constant 0 : i32
    %c0_i32_0 = arith.constant 0 : i32
    %c0_i32_1 = arith.constant 0 : i32
    return %c0_i32, %c0_i32_0 : i32, i32
  }
  func.func @transform_3(%arg0: i32) -> (i32, i32) {
    %c0_i32 = arith.constant 0 : i32
    %c0_i32_0 = arith.constant 0 : i32
    %c0_i32_1 = arith.constant 0 : i32
    return %c0_i32, %c0_i32_0 : i32, i32
  }
  func.func @transform_4(%arg0: i32) -> (i32, i32) {
    %c0_i32 = arith.constant 0 : i32
    %c0_i32_0 = arith.constant 0 : i32
    %c0_i32_1 = arith.constant 0 : i32
    return %c0_i32, %c0_i32_0 : i32, i32
  }
  func.func @transform_5(%arg0: i32) -> (i32, i32) {
    %c0_i32 = arith.constant 0 : i32
    %c0_i32_0 = arith.constant 0 : i32
    %c0_i32_1 = arith.constant 0 : i32
    return %c0_i32, %c0_i32_0 : i32, i32
  }
  func.func @transform_6(%arg0: i32) -> (i32, i32) {
    %c0_i32 = arith.constant 0 : i32
    %c0_i32_0 = arith.constant 0 : i32
    %c0_i32_1 = arith.constant 0 : i32
    return %c0_i32, %c0_i32_0 : i32, i32
  }
  func.func @transform_7(%arg0: i32) -> (i32, i32) {
    %c0_i32 = arith.constant 0 : i32
    %c0_i32_0 = arith.constant 0 : i32
    return %arg0, %c0_i32 : i32, i32
  }
}

</mosaic_0001>

<bundles_post_ra>
// kernel: deep_nn_forward.1
= control target key start
LH: loop header
LB: loop body
LE: loop exit
PB: predicated region body
PF: predicated region fallthrough
CT: control target
= control target key end

     0   :  { %s7512_s24 = smov 0   ;;  %s10910_s0 = inlined_call_operand.vmem [shape: f32[12,2048], index: 0, kind: input, shape index: {}]   ;;  %s10911_s1 = inlined_call_operand.vmem [shape: bf16[2048,512], index: 1, kind: input, shape index: {}]   ;;  %s10912_s2 = inlined_call_operand.vmem [shape: f32[1,512], index: 2, kind: input, shape index: {}]   ;;  %s10913_s3 = inlined_call_operand.vmem [shape: bf16[512,128], index: 3, kind: input, shape index: {}]   ;;  %s10914_s4 = inlined_call_operand.vmem [shape: f32[1,128], index: 4, kind: input, shape index: {}]   ;;  %s10915_s5 = inlined_call_operand.vmem [shape: bf16[128,2], index: 5, kind: input, shape index: {}]   ;;  %s10916_s6 = inlined_call_operand.vmem [shape: f32[1,2], index: 6, kind: input, shape index: {}]   ;;  %s10917_s7 = inlined_call_operand.vmem [shape: f32[12,2], index: 7, kind: output, shape index: {}]  }
   0x1 LB: > { %s4681_s25 = sadd.s32 4294967295, %s7470_s24   ;;  %p4685_p0 = scmp.ge.s32.totalorder %s7470_s24, 1  ;;  %s7470_s24 = sphi %s7512_s24, %s17_s24  }
   0x2   : > { %p237_p1 = scmp.lt.s32.totalorder %s7470_s24, 3 }
   0x4   : > { %p238_p2 = pnand %p4685_p0, %p237_p1 }
   0x5   : > { %p268_p3 = scmp.lt.s32.totalorder (!%p238_p2), %s4681_s25, 1 }
   0x6   : > { %241 = sbr.rel (%p238_p2) target bundleno = 942 (0x3ae), region = 48 }
   0xb   : > { %v4803_v0 = vld [vmem:[%s10911_s1 + $0xe0] sm:$0xf]  ;;  %v6930_v1 = vld [vmem:[%s10911_s1 + $0xec] sm:$0xf0]  ;;  %s10919_s25 = smov (!%p268_p3, %s4681_s25), 1  ;;  %vm4626_vm0 = vcmask 15360  }
   0xc   : > { %v4931_v2 = vld [vmem:[%s10911_s1 + $0x1e0] sm:$0xf]  ;;  %v4804_v3 = vor.u32 %v6930_v1, %v4803_v0  ;;  %v6962_v4 = vld [vmem:[%s10911_s1 + $0x1ec] sm:$0xf0]  ;;  %s6899_s12 = sshll.u32 %s10919_s25, 7  ;;  %s4688_s16 = sshll.u32 %s10919_s25, 3 }
   0xd   : > { %v5059_v5 = vld [vmem:[%s10911_s1 + $0x2e0] sm:$0xf]  ;;  %v6994_v6 = vld [vmem:[%s10911_s1 + $0x2ec] sm:$0xf0]  ;;  %v4932_v7 = vor.u32 %v6962_v4, %v4931_v2  ;;  %s7836_s21 = scalar_lea.vmem %s10910_s0, %s6899_s12  ;;  %s276_s22 = scalar_lea.vmem %s10917_s7, %s4688_s16 }
   0xe   : > { %v5060_v8 = vor.u32 %v6994_v6, %v5059_v5  ;;  %v5187_v9 = vld [vmem:[%s10911_s1 + $0x3e0] sm:$0xf]  ;;  %v7026_v10 = vld [vmem:[%s10911_s1 + $0x3ec] sm:$0xf0]  ;;  %3391 = vmatpush.bf16.msra.mxu0 %v4804_v3 }
   0xf   : > { %v4787_v11 = vld [vmem:[%s10911_s1 + $0xc0] sm:$0xf]  ;;  %v5188_v12 = vor.u32 %v7026_v10, %v5187_v9  ;;  %v6926_v13 = vld [vmem:[%s10911_s1 + $0xcc] sm:$0xf0]  ;;  %3404 = vmatpush.bf16.msra.mxu1 %v4932_v7 }
  0x10   : > { %v4915_v14 = vld [vmem:[%s10911_s1 + $0x1c0] sm:$0xf]  ;;  %v6958_v15 = vld [vmem:[%s10911_s1 + $0x1cc] sm:$0xf0]  ;;  %3417 = vmatpush.bf16.msra.mxu2 %v5060_v8  ;;  %v4788_v16 = vor.u32 %v6926_v13, %v4787_v11 }
  0x11   : > { %v4916_v17 = vor.u32 %v6958_v15, %v4915_v14  ;;  %v5043_v18 = vld [vmem:[%s10911_s1 + $0x2c0] sm:$0xf]  ;;  %v6990_v19 = vld [vmem:[%s10911_s1 + $0x2cc] sm:$0xf0]  ;;  %3430 = vmatpush.bf16.msra.mxu3 %v5188_v12 }
  0x12   : > { %v5171_v20 = vld [vmem:[%s10911_s1 + $0x3c0] sm:$0xf]  ;;  %v5044_v21 = vor.u32 %v6990_v19, %v5043_v18  ;;  %v7022_v22 = vld [vmem:[%s10911_s1 + $0x3cc] sm:$0xf0]  ;;  %3392 = vmatpush.bf16.msra.mxu0 %v4788_v16 }
  0x13   : > { %v4771_v23 = vld [vmem:[%s10911_s1 + $0xa0] sm:$0xf]  ;;  %v6922_v24 = vld [vmem:[%s10911_s1 + $0xac] sm:$0xf0]  ;;  %v5172_v25 = vor.u32 %v7022_v22, %v5171_v20  ;;  %3405 = vmatpush.bf16.msra.mxu1 %v4916_v17 }
  0x14   : > { %v4899_v26 = vld [vmem:[%s10911_s1 + $0x1a0] sm:$0xf]  ;;  %v6954_v27 = vld [vmem:[%s10911_s1 + $0x1ac] sm:$0xf0]  ;;  %v4772_v29 = vor.u32 %v6922_v24, %v4771_v23  ;;  %3418 = vmatpush.bf16.msra.mxu2 %v5044_v21 }
  0x15   : > { %v5027_v28 = vld [vmem:[%s10911_s1 + $0x2a0] sm:$0xf]  ;;  %v6986_v30 = vld [vmem:[%s10911_s1 + $0x2ac] sm:$0xf0]  ;;  %v4900_v33 = vor.u32 %v6954_v27, %v4899_v26  ;;  %3431 = vmatpush.bf16.msra.mxu3 %v5172_v25 }
  0x16   : > { %v5155_v31 = vld [vmem:[%s10911_s1 + $0x3a0] sm:$0xf]  ;;  %v7018_v32 = vld [vmem:[%s10911_s1 + $0x3ac] sm:$0xf0]  ;;  %v5028_v34 = vor.u32 %v6986_v30, %v5027_v28  ;;  %3393 = vmatpush.bf16.msra.mxu0 %v4772_v29 }
  0x17   : > { %v4755_v35 = vld [vmem:[%s10911_s1 + $0x80] sm:$0xf]  ;;  %v6918_v36 = vld [vmem:[%s10911_s1 + $0x8c] sm:$0xf0]  ;;  %v5156_v38 = vor.u32 %v7018_v32, %v5155_v31  ;;  %3406 = vmatpush.bf16.msra.mxu1 %v4900_v33 }
  0x18   : > { %v4883_v37 = vld [vmem:[%s10911_s1 + $0x180] sm:$0xf]  ;;  %v6950_v39 = vld [vmem:[%s10911_s1 + $0x18c] sm:$0xf0]  ;;  %v4756_v44 = vor.u32 %v6918_v36, %v4755_v35  ;;  %3419 = vmatpush.bf16.msra.mxu2 %v5028_v34 }
  0x19   : > { %v5011_v40 = vld [vmem:[%s10911_s1 + $0x280] sm:$0xf]  ;;  %v6982_v41 = vld [vmem:[%s10911_s1 + $0x28c] sm:$0xf0]  ;;  %v4884_v45 = vor.u32 %v6950_v39, %v4883_v37  ;;  %3432 = vmatpush.bf16.msra.mxu3 %v5156_v38 }
  0x1a   : > { %v5139_v42 = vld [vmem:[%s10911_s1 + $0x380] sm:$0xf]  ;;  %v7014_v43 = vld [vmem:[%s10911_s1 + $0x38c] sm:$0xf0]  ;;  %v5012_v46 = vor.u32 %v6982_v41, %v5011_v40  ;;  %3394 = vmatpush.bf16.msra.mxu0 %v4756_v44 }
  0x1b   : > { %v4739_v47 = vld [vmem:[%s10911_s1 + $0x60] sm:$0xf]  ;;  %v6914_v48 = vld [vmem:[%s10911_s1 + $0x6c] sm:$0xf0]  ;;  %v5140_v50 = vor.u32 %v7014_v43, %v5139_v42  ;;  %3407 = vmatpush.bf16.msra.mxu1 %v4884_v45 }
  0x1c   : > { %v4867_v49 = vld [vmem:[%s10911_s1 + $0x160] sm:$0xf]  ;;  %v6946_v51 = vld [vmem:[%s10911_s1 + $0x16c] sm:$0xf0]  ;;  %v4740_v56 = vor.u32 %v6914_v48, %v4739_v47  ;;  %3420 = vmatpush.bf16.msra.mxu2 %v5012_v46 }
  0x1d   : > { %v4995_v52 = vld [vmem:[%s10911_s1 + $0x260] sm:$0xf]  ;;  %v6978_v53 = vld [vmem:[%s10911_s1 + $0x26c] sm:$0xf0]  ;;  %v4868_v57 = vor.u32 %v6946_v51, %v4867_v49  ;;  %3433 = vmatpush.bf16.msra.mxu3 %v5140_v50 }
  0x1e   : > { %v5123_v54 = vld [vmem:[%s10911_s1 + $0x360] sm:$0xf]  ;;  %v7010_v55 = vld [vmem:[%s10911_s1 + $0x36c] sm:$0xf0]  ;;  %v4996_v58 = vor.u32 %v6978_v53, %v4995_v52  ;;  %3395 = vmatpush.bf16.msra.mxu0 %v4740_v56 }
  0x1f   : > { %v4723_v59 = vld [vmem:[%s10911_s1 + $0x40] sm:$0xf]  ;;  %v6910_v60 = vld [vmem:[%s10911_s1 + $0x4c] sm:$0xf0]  ;;  %v5124_v62 = vor.u32 %v7010_v55, %v5123_v54  ;;  %3408 = vmatpush.bf16.msra.mxu1 %v4868_v57 }
  0x20   : > { %v4851_v61 = vld [vmem:[%s10911_s1 + $0x140] sm:$0xf]  ;;  %v6942_v63 = vld [vmem:[%s10911_s1 + $0x14c] sm:$0xf0]  ;;  %v4724_v4 = vor.u32 %v6910_v60, %v4723_v59  ;;  %3421 = vmatpush.bf16.msra.mxu2 %v4996_v58 }
  0x21   : > { %v4979_v0 = vld [vmem:[%s10911_s1 + $0x240] sm:$0xf]  ;;  %v6974_v1 = vld [vmem:[%s10911_s1 + $0x24c] sm:$0xf0]  ;;  %v4852_v5 = vor.u32 %v6942_v63, %v4851_v61  ;;  %3434 = vmatpush.bf16.msra.mxu3 %v5124_v62 }
  0x22   : > { %v5107_v2 = vld [vmem:[%s10911_s1 + $0x340] sm:$0xf]  ;;  %v7006_v3 = vld [vmem:[%s10911_s1 + $0x34c] sm:$0xf0]  ;;  %v4980_v6 = vor.u32 %v6974_v1, %v4979_v0  ;;  %3396 = vmatpush.bf16.msra.mxu0 %v4724_v4 }
  0x23   : > { %v4707_v7 = vld [vmem:[%s10911_s1 + $0x20] sm:$0xf]  ;;  %v6906_v8 = vld [vmem:[%s10911_s1 + $0x2c] sm:$0xf0]  ;;  %v5108_v10 = vor.u32 %v7006_v3, %v5107_v2  ;;  %3409 = vmatpush.bf16.msra.mxu1 %v4852_v5 }
  0x24   : > { %v4835_v9 = vld [vmem:[%s10911_s1 + $0x120] sm:$0xf]  ;;  %v6938_v11 = vld [vmem:[%s10911_s1 + $0x12c] sm:$0xf0]  ;;  %v4708_v16 = vor.u32 %v6906_v8, %v4707_v7  ;;  %3422 = vmatpush.bf16.msra.mxu2 %v4980_v6 }
  0x25   : > { %v4963_v12 = vld [vmem:[%s10911_s1 + $0x220] sm:$0xf]  ;;  %v6970_v13 = vld [vmem:[%s10911_s1 + $0x22c] sm:$0xf0]  ;;  %v4836_v19 = vor.u32 %v6938_v11, %v4835_v9  ;;  %3435 = vmatpush.bf16.msra.mxu3 %v5108_v10 }
  0x26   : > { %v5091_v14 = vld [vmem:[%s10911_s1 + $0x320] sm:$0xf]  ;;  %v7002_v15 = vld [vmem:[%s10911_s1 + $0x32c] sm:$0xf0]  ;;  %v4964_v20 = vor.u32 %v6970_v13, %v4963_v12  ;;  %3397 = vmatpush.bf16.msra.mxu0 %v4708_v16 }
  0x27   : > { %v4691_v17 = vld [vmem:[%s10911_s1] sm:$0xf]  ;;  %v6902_v18 = vld [vmem:[%s10911_s1 + $0xc] sm:$0xf0]  ;;  %v5092_v24 = vor.u32 %v7002_v15, %v5091_v14  ;;  %3410 = vmatpush.bf16.msra.mxu1 %v4836_v19 }
  0x28   : > { %v4819_v21 = vld [vmem:[%s10911_s1 + $0x100] sm:$0xf]  ;;  %v6934_v22 = vld [vmem:[%s10911_s1 + $0x10c] sm:$0xf0]  ;;  %v4692_v31 = vor.u32 %v6902_v18, %v4691_v17  ;;  %3423 = vmatpush.bf16.msra.mxu2 %v4964_v20 }
  0x29   : > { %v4947_v23 = vld [vmem:[%s10911_s1 + $0x200] sm:$0xf]  ;;  %v6966_v25 = vld [vmem:[%s10911_s1 + $0x20c] sm:$0xf0]  ;;  %v4820_v35 = vor.u32 %v6934_v22, %v4819_v21  ;;  %3436 = vmatpush.bf16.msra.mxu3 %v5092_v24  ;;  %v280_v24 = vld [vmem:[%s7836_s21 + $0x18] sm:$0xff] }
  0x2a   : > { %v5075_v26 = vld [vmem:[%s10911_s1 + $0x300] sm:$0xf]  ;;  %v6998_v27 = vld [vmem:[%s10911_s1 + $0x30c] sm:$0xf0]  ;;  %v4948_v36 = vor.u32 %v6966_v25, %v4947_v23  ;;  %3398 = vmatpush.bf16.msra.mxu0 %v4692_v31 }
  0x2b   : > { %v5315_v28 = vld [vmem:[%s10911_s1 + $0x4e0] sm:$0xf]  ;;  %v7058_v29 = vld [vmem:[%s10911_s1 + $0x4ec] sm:$0xf0]  ;;  %v5076_v39 = vor.u32 %v6998_v27, %v5075_v26  ;;  %3411 = vmatpush.bf16.msra.mxu1 %v4820_v35 }
  0x2c   : > { %v5443_v30 = vld [vmem:[%s10911_s1 + $0x5e0] sm:$0xf]  ;;  %v7090_v32 = vld [vmem:[%s10911_s1 + $0x5ec] sm:$0xf0]  ;;  %v5316_v40 = vor.u32 %v7058_v29, %v5315_v28  ;;  %3424 = vmatpush.bf16.msra.mxu2 %v4948_v36  ;;  %v7851_v29 = vpack.c.bf16 %v280_v24, %v280_v24 }
  0x2d   : > { %v5571_v33 = vld [vmem:[%s10911_s1 + $0x6e0] sm:$0xf]  ;;  %v7122_v34 = vld [vmem:[%s10911_s1 + $0x6ec] sm:$0xf0]  ;;  %v5444_v41 = vor.u32 %v7090_v32, %v5443_v30  ;;  %3437 = vmatpush.bf16.msra.mxu3 %v5076_v39  ;;  %v278_v30 = vld [vmem:[%s7836_s21 + $0x8] sm:$0xff] }
  0x2e   : > { %v5699_v37 = vld [vmem:[%s10911_s1 + $0x7e0] sm:$0xf]  ;;  %v7154_v38 = vld [vmem:[%s10911_s1 + $0x7ec] sm:$0xf0]  ;;  %v5572_v42 = vor.u32 %v7122_v34, %v5571_v33  ;;  %3443 = vmatpush.bf16.msrb.mxu0 %v5316_v40  ;;  %v7854_v32 = vpack.c.bf16 %v278_v30, %v278_v30 }
  0x2f   : > { %v5299_v43 = vld [vmem:[%s10911_s1 + $0x4c0] sm:$0xf]  ;;  %v7054_v44 = vld [vmem:[%s10911_s1 + $0x4cc] sm:$0xf0]  ;;  %v5700_v46 = vor.u32 %v7154_v38, %v5699_v37  ;;  %3456 = vmatpush.bf16.msrb.mxu1 %v5444_v41 }
  0x30   : > { %v5427_v45 = vld [vmem:[%s10911_s1 + $0x5c0] sm:$0xf]  ;;  %v7086_v47 = vld [vmem:[%s10911_s1 + $0x5cc] sm:$0xf0]  ;;  %v5300_v52 = vor.u32 %v7054_v44, %v5299_v43  ;;  %3469 = vmatpush.bf16.msrb.mxu2 %v5572_v42  ;;  %3438 = vmatmul.bf16.vlgmr.msra.gmra.mxu3 %v7851_v29 }
  0x31   : > { %v5555_v48 = vld [vmem:[%s10911_s1 + $0x6c0] sm:$0xf]  ;;  %v7118_v49 = vld [vmem:[%s10911_s1 + $0x6cc] sm:$0xf0]  ;;  %v5428_v53 = vor.u32 %v7086_v47, %v5427_v45  ;;  %3482 = vmatpush.bf16.msrb.mxu3 %v5700_v46  ;;  %3412 = vmatmul.bf16.vlgmr.msra.gmra.mxu1 %v7854_v32 }
  0x32   : > { %v5683_v50 = vld [vmem:[%s10911_s1 + $0x7c0] sm:$0xf]  ;;  %v7150_v51 = vld [vmem:[%s10911_s1 + $0x7cc] sm:$0xf0]  ;;  %v5556_v54 = vor.u32 %v7118_v49, %v5555_v48  ;;  %3444 = vmatpush.bf16.msrb.mxu0 %v5300_v52 }
  0x33   : > { %v5283_v55 = vld [vmem:[%s10911_s1 + $0x4a0] sm:$0xf]  ;;  %v7050_v56 = vld [vmem:[%s10911_s1 + $0x4ac] sm:$0xf0]  ;;  %v5684_v58 = vor.u32 %v7150_v51, %v5683_v50  ;;  %3457 = vmatpush.bf16.msrb.mxu1 %v5428_v53 }
  0x34   : > { %v5411_v57 = vld [vmem:[%s10911_s1 + $0x5a0] sm:$0xf]  ;;  %v7082_v59 = vld [vmem:[%s10911_s1 + $0x5ac] sm:$0xf0]  ;;  %v5284_v0 = vor.u32 %v7050_v56, %v5283_v55  ;;  %3470 = vmatpush.bf16.msrb.mxu2 %v5556_v54 }
  0x35   : > { %v5539_v60 = vld [vmem:[%s10911_s1 + $0x6a0] sm:$0xf]  ;;  %v7114_v61 = vld [vmem:[%s10911_s1 + $0x6ac] sm:$0xf0]  ;;  %v5412_v2 = vor.u32 %v7082_v59, %v5411_v57  ;;  %3483 = vmatpush.bf16.msrb.mxu3 %v5684_v58 }
  0x36   : > { %v5667_v62 = vld [vmem:[%s10911_s1 + $0x7a0] sm:$0xf]  ;;  %v7146_v63 = vld [vmem:[%s10911_s1 + $0x7ac] sm:$0xf0]  ;;  %v5540_v3 = vor.u32 %v7114_v61, %v5539_v60  ;;  %3445 = vmatpush.bf16.msrb.mxu0 %v5284_v0 }
  0x37   : > { %v5267_v1 = vld [vmem:[%s10911_s1 + $0x480] sm:$0xf]  ;;  %v7046_v4 = vld [vmem:[%s10911_s1 + $0x48c] sm:$0xf0]  ;;  %v5668_v7 = vor.u32 %v7146_v63, %v5667_v62  ;;  %3458 = vmatpush.bf16.msrb.mxu1 %v5412_v2 }
  0x38   : > { %v5395_v5 = vld [vmem:[%s10911_s1 + $0x580] sm:$0xf]  ;;  %v7078_v6 = vld [vmem:[%s10911_s1 + $0x58c] sm:$0xf0]  ;;  %v5268_v13 = vor.u32 %v7046_v4, %v5267_v1  ;;  %3471 = vmatpush.bf16.msrb.mxu2 %v5540_v3 }
  0x39   : > { %v5523_v8 = vld [vmem:[%s10911_s1 + $0x680] sm:$0xf]  ;;  %v7110_v9 = vld [vmem:[%s10911_s1 + $0x68c] sm:$0xf0]  ;;  %v5396_v16 = vor.u32 %v7078_v6, %v5395_v5  ;;  %3484 = vmatpush.bf16.msrb.mxu3 %v5668_v7 }
  0x3a   : > { %v5651_v10 = vld [vmem:[%s10911_s1 + $0x780] sm:$0xf]  ;;  %v7142_v11 = vld [vmem:[%s10911_s1 + $0x78c] sm:$0xf0]  ;;  %v5524_v17 = vor.u32 %v7110_v9, %v5523_v8  ;;  %3446 = vmatpush.bf16.msrb.mxu0 %v5268_v13 }
  0x3b   : > { %v5251_v12 = vld [vmem:[%s10911_s1 + $0x460] sm:$0xf]  ;;  %v7042_v14 = vld [vmem:[%s10911_s1 + $0x46c] sm:$0xf0]  ;;  %v5652_v21 = vor.u32 %v7142_v11, %v5651_v10  ;;  %3459 = vmatpush.bf16.msrb.mxu1 %v5396_v16 }
  0x3c   : > { %v5379_v15 = vld [vmem:[%s10911_s1 + $0x560] sm:$0xf]  ;;  %v7074_v18 = vld [vmem:[%s10911_s1 + $0x56c] sm:$0xf0]  ;;  %v5252_v31 = vor.u32 %v7042_v14, %v5251_v12  ;;  %3472 = vmatpush.bf16.msrb.mxu2 %v5524_v17 }
  0x3d   : > { %v5507_v19 = vld [vmem:[%s10911_s1 + $0x660] sm:$0xf]  ;;  %v7106_v20 = vld [vmem:[%s10911_s1 + $0x66c] sm:$0xf0]  ;;  %v5380_v33 = vor.u32 %v7074_v18, %v5379_v15  ;;  %3485 = vmatpush.bf16.msrb.mxu3 %v5652_v21 }
  0x3e   : > { %v279_v22 = vld [vmem:[%s7836_s21 + $0x10] sm:$0xff]  ;;  %v277_v23 = vld [vmem:[%s7836_s21] sm:$0xff]  ;;  %v5508_v34 = vor.u32 %v7106_v20, %v5507_v19  ;;  %3447 = vmatpush.bf16.msrb.mxu0 %v5252_v31  ;;  %v284_v20 = vld [vmem:[%s7836_s21 + $0x38] sm:$0xff] }
  0x3f   : > { %v5635_v25 = vld [vmem:[%s10911_s1 + $0x760] sm:$0xf]  ;;  %v7138_v26 = vld [vmem:[%s10911_s1 + $0x76c] sm:$0xf0]  ;;  %v7847_v27 = vpack.c.bf16 %v279_v22, %v279_v22  ;;  %v7849_v28 = vpack.c.bf16 %v277_v23, %v277_v23  ;;  %3460 = vmatpush.bf16.msrb.mxu1 %v5380_v33 }
  0x40   : > { %v5235_v35 = vld [vmem:[%s10911_s1 + $0x440] sm:$0xf]  ;;  %v7038_v36 = vld [vmem:[%s10911_s1 + $0x44c] sm:$0xf0]  ;;  %v5636_v38 = vor.u32 %v7138_v26, %v5635_v25  ;;  %3473 = vmatpush.bf16.msrb.mxu2 %v5508_v34  ;;  %v282_v25 = vld [vmem:[%s7836_s21 + $0x28] sm:$0xff] }
  0x41   : > { %v5363_v37 = vld [vmem:[%s10911_s1 + $0x540] sm:$0xf]  ;;  %v7070_v39 = vld [vmem:[%s10911_s1 + $0x54c] sm:$0xf0]  ;;  %3425 = vmatmul.bf16.vlgmr.msra.gmra.mxu2 %v7847_v27  ;;  %3399 = vmatmul.bf16.vlgmr.msra.gmra.mxu0 %v7849_v28  ;;  %v5236_v44 = vor.u32 %v7038_v36, %v5235_v35 }
  0x42   : > { %v5491_v40 = vld [vmem:[%s10911_s1 + $0x640] sm:$0xf]  ;;  %v7102_v41 = vld [vmem:[%s10911_s1 + $0x64c] sm:$0xf0]  ;;  %v5364_v45 = vor.u32 %v7070_v39, %v5363_v37  ;;  %3486 = vmatpush.bf16.msrb.mxu3 %v5636_v38  ;;  %v7988_v38 = vpack.c.bf16 %v284_v20, %v284_v20 }
  0x43   : > { %v5619_v42 = vld [vmem:[%s10911_s1 + $0x740] sm:$0xf]  ;;  %v7134_v43 = vld [vmem:[%s10911_s1 + $0x74c] sm:$0xf0]  ;;  %v5492_v46 = vor.u32 %v7102_v41, %v5491_v40  ;;  %3448 = vmatpush.bf16.msrb.mxu0 %v5236_v44  ;;  %v7990_v40 = vpack.c.bf16 %v282_v25, %v282_v25 }
  0x44   : > { %v5219_v47 = vld [vmem:[%s10911_s1 + $0x420] sm:$0xf]  ;;  %v7034_v48 = vld [vmem:[%s10911_s1 + $0x42c] sm:$0xf0]  ;;  %v5620_v50 = vor.u32 %v7134_v43, %v5619_v42  ;;  %3461 = vmatpush.bf16.msrb.mxu1 %v5364_v45 }
  0x45   : > { %v5347_v49 = vld [vmem:[%s10911_s1 + $0x520] sm:$0xf]  ;;  %v7066_v51 = vld [vmem:[%s10911_s1 + $0x52c] sm:$0xf0]  ;;  %v5220_v56 = vor.u32 %v7034_v48, %v5219_v47  ;;  %3474 = vmatpush.bf16.msrb.mxu2 %v5492_v46 }
  0x46   : > { %v5475_v52 = vld [vmem:[%s10911_s1 + $0x620] sm:$0xf]  ;;  %v7098_v53 = vld [vmem:[%s10911_s1 + $0x62c] sm:$0xf0]  ;;  %v5348_v59 = vor.u32 %v7066_v51, %v5347_v49  ;;  %3487 = vmatpush.bf16.msrb.mxu3 %v5620_v50 }
  0x47   : > { %v5603_v54 = vld [vmem:[%s10911_s1 + $0x720] sm:$0xf]  ;;  %v7130_v55 = vld [vmem:[%s10911_s1 + $0x72c] sm:$0xf0]  ;;  %v5476_v60 = vor.u32 %v7098_v53, %v5475_v52  ;;  %3449 = vmatpush.bf16.msrb.mxu0 %v5220_v56 }
  0x48   : > { %v5203_v57 = vld [vmem:[%s10911_s1 + $0x400] sm:$0xf]  ;;  %v7030_v58 = vld [vmem:[%s10911_s1 + $0x40c] sm:$0xf0]  ;;  %v5604_v0 = vor.u32 %v7130_v55, %v5603_v54  ;;  %3462 = vmatpush.bf16.msrb.mxu1 %v5348_v59 }
  0x49   : > { %v5331_v61 = vld [vmem:[%s10911_s1 + $0x500] sm:$0xf]  ;;  %v7062_v62 = vld [vmem:[%s10911_s1 + $0x50c] sm:$0xf0]  ;;  %v5204_v7 = vor.u32 %v7030_v58, %v5203_v57  ;;  %3475 = vmatpush.bf16.msrb.mxu2 %v5476_v60 }
  0x4a   : > { %v5459_v63 = vld [vmem:[%s10911_s1 + $0x600] sm:$0xf]  ;;  %v7094_v1 = vld [vmem:[%s10911_s1 + $0x60c] sm:$0xf0]  ;;  %v5332_v11 = vor.u32 %v7062_v62, %v5331_v61  ;;  %3488 = vmatpush.bf16.msrb.mxu3 %v5604_v0 }
  0x4b   : > { %v5587_v2 = vld [vmem:[%s10911_s1 + $0x700] sm:$0xf]  ;;  %v7126_v3 = vld [vmem:[%s10911_s1 + $0x70c] sm:$0xf0]  ;;  %v5460_v12 = vor.u32 %v7094_v1, %v5459_v63  ;;  %3450 = vmatpush.bf16.msrb.mxu0 %v5204_v7 }
  0x4c   : > { %v5827_v4 = vld [vmem:[%s10911_s1 + $0x8e0] sm:$0xf]  ;;  %v7186_v5 = vld [vmem:[%s10911_s1 + $0x8ec] sm:$0xf0]  ;;  %v5588_v16 = vor.u32 %v7126_v3, %v5587_v2  ;;  %3463 = vmatpush.bf16.msrb.mxu1 %v5332_v11 }
  0x4d   : > { %v5955_v6 = vld [vmem:[%s10911_s1 + $0x9e0] sm:$0xf]  ;;  %v7218_v8 = vld [vmem:[%s10911_s1 + $0x9ec] sm:$0xf0]  ;;  %v5828_v17 = vor.u32 %v7186_v5, %v5827_v4  ;;  %3476 = vmatpush.bf16.msrb.mxu2 %v5460_v12 }
  0x4e   : > { %v6083_v9 = vld [vmem:[%s10911_s1 + $0xae0] sm:$0xf]  ;;  %v7250_v10 = vld [vmem:[%s10911_s1 + $0xaec] sm:$0xf0]  ;;  %v5956_v21 = vor.u32 %v7218_v8, %v5955_v6  ;;  %3489 = vmatpush.bf16.msrb.mxu3 %v5588_v16 }
  0x4f   : > { %v6211_v13 = vld [vmem:[%s10911_s1 + $0xbe0] sm:$0xf]  ;;  %v7282_v14 = vld [vmem:[%s10911_s1 + $0xbec] sm:$0xf0]  ;;  %v6084_v22 = vor.u32 %v7250_v10, %v6083_v9  ;;  %3495 = vmatpush.bf16.msra.mxu0 %v5828_v17  ;;  %3464 = vmatmul.bf16.vlgmr.msrb.gmra.mxu1 %v7990_v40 }
  0x50   : > { %v283_v15 = vld [vmem:[%s7836_s21 + $0x30] sm:$0xff]  ;;  %v5811_v18 = vld [vmem:[%s10911_s1 + $0x8c0] sm:$0xf]  ;;  %v6212_v26 = vor.u32 %v7282_v14, %v6211_v13  ;;  %3508 = vmatpush.bf16.msra.mxu1 %v5956_v21 }
  0x51   : > { %v281_v19 = vld [vmem:[%s7836_s21 + $0x20] sm:$0xff]  ;;  %v7182_v23 = vld [vmem:[%s10911_s1 + $0x8cc] sm:$0xf0]  ;;  %v7978_v34 = vpack.c.bf16 %v283_v15, %v283_v15  ;;  %3521 = vmatpush.bf16.msra.mxu2 %v6084_v22  ;;  %3490 = vmatmul.bf16.vlgmr.msrb.gmra.mxu3 %v7988_v38 }
  0x52   : > { %v5939_v24 = vld [vmem:[%s10911_s1 + $0x9c0] sm:$0xf]  ;;  %v7214_v30 = vld [vmem:[%s10911_s1 + $0x9cc] sm:$0xf0]  ;;  %v7986_v37 = vpack.c.bf16 %v281_v19, %v281_v19  ;;  %v5812_v39 = vor.u32 %v7182_v23, %v5811_v18  ;;  %3534 = vmatpush.bf16.msra.mxu3 %v6212_v26 }
  0x53   : > { %v6067_v31 = vld [vmem:[%s10911_s1 + $0xac0] sm:$0xf]  ;;  %v7246_v33 = vld [vmem:[%s10911_s1 + $0xacc] sm:$0xf0]  ;;  %v5940_v41 = vor.u32 %v7214_v30, %v5939_v24  ;;  %3477 = vmatmul.bf16.vlgmr.msrb.gmra.mxu2 %v7978_v34 }
  0x54   : > { %v6195_v35 = vld [vmem:[%s10911_s1 + $0xbc0] sm:$0xf]  ;;  %v7278_v36 = vld [vmem:[%s10911_s1 + $0xbcc] sm:$0xf0]  ;;  %v6068_v42 = vor.u32 %v7246_v33, %v6067_v31  ;;  %3451 = vmatmul.bf16.vlgmr.msrb.gmra.mxu0 %v7986_v37 }
  0x55   : > { %v5795_v43 = vld [vmem:[%s10911_s1 + $0x8a0] sm:$0xf]  ;;  %v7178_v44 = vld [vmem:[%s10911_s1 + $0x8ac] sm:$0xf0]  ;;  %v6196_v46 = vor.u32 %v7278_v36, %v6195_v35  ;;  %3496 = vmatpush.bf16.msra.mxu0 %v5812_v39  ;;  %3509 = vmatpush.bf16.msra.mxu1 %v5940_v41 }
  0x56   : > { %v5923_v45 = vld [vmem:[%s10911_s1 + $0x9a0] sm:$0xf]  ;;  %v7210_v47 = vld [vmem:[%s10911_s1 + $0x9ac] sm:$0xf0]  ;;  %v5796_v52 = vor.u32 %v7178_v44, %v5795_v43  ;;  %3522 = vmatpush.bf16.msra.mxu2 %v6068_v42 }
  0x57   : > { %v6051_v48 = vld [vmem:[%s10911_s1 + $0xaa0] sm:$0xf]  ;;  %v7242_v49 = vld [vmem:[%s10911_s1 + $0xaac] sm:$0xf0]  ;;  %v5924_v53 = vor.u32 %v7210_v47, %v5923_v45  ;;  %3535 = vmatpush.bf16.msra.mxu3 %v6196_v46 }
  0x58   : > { %v6179_v50 = vld [vmem:[%s10911_s1 + $0xba0] sm:$0xf]  ;;  %v7274_v51 = vld [vmem:[%s10911_s1 + $0xbac] sm:$0xf0]  ;;  %v6052_v54 = vor.u32 %v7242_v49, %v6051_v48 }
  0x59   : > { %v5779_v55 = vld [vmem:[%s10911_s1 + $0x880] sm:$0xf]  ;;  %v7174_v56 = vld [vmem:[%s10911_s1 + $0x88c] sm:$0xf0]  ;;  %v6180_v58 = vor.u32 %v7274_v51, %v6179_v50  ;;  %3497 = vmatpush.bf16.msra.mxu0 %v5796_v52  ;;  %3510 = vmatpush.bf16.msra.mxu1 %v5924_v53 }
  0x5a   : > { %v5907_v57 = vld [vmem:[%s10911_s1 + $0x980] sm:$0xf]  ;;  %v7206_v59 = vld [vmem:[%s10911_s1 + $0x98c] sm:$0xf0]  ;;  %v5780_v0 = vor.u32 %v7174_v56, %v5779_v55  ;;  %3523 = vmatpush.bf16.msra.mxu2 %v6052_v54 }
  0x5b   : > { %v6035_v60 = vld [vmem:[%s10911_s1 + $0xa80] sm:$0xf]  ;;  %v7238_v61 = vld [vmem:[%s10911_s1 + $0xa8c] sm:$0xf0]  ;;  %v5908_v1 = vor.u32 %v7206_v59, %v5907_v57  ;;  %3536 = vmatpush.bf16.msra.mxu3 %v6180_v58 }
  0x5c   : > { %v6163_v62 = vld [vmem:[%s10911_s1 + $0xb80] sm:$0xf]  ;;  %v7270_v63 = vld [vmem:[%s10911_s1 + $0xb8c] sm:$0xf0]  ;;  %v6036_v2 = vor.u32 %v7238_v61, %v6035_v60 }
  0x5d   : > { %v5763_v3 = vld [vmem:[%s10911_s1 + $0x860] sm:$0xf]  ;;  %v7170_v4 = vld [vmem:[%s10911_s1 + $0x86c] sm:$0xf0]  ;;  %v6164_v6 = vor.u32 %v7270_v63, %v6163_v62  ;;  %3498 = vmatpush.bf16.msra.mxu0 %v5780_v0  ;;  %3511 = vmatpush.bf16.msra.mxu1 %v5908_v1 }
  0x5e   : > { %v5891_v5 = vld [vmem:[%s10911_s1 + $0x960] sm:$0xf]  ;;  %v7202_v7 = vld [vmem:[%s10911_s1 + $0x96c] sm:$0xf0]  ;;  %v5764_v12 = vor.u32 %v7170_v4, %v5763_v3  ;;  %3524 = vmatpush.bf16.msra.mxu2 %v6036_v2 }
  0x5f   : > { %v6019_v8 = vld [vmem:[%s10911_s1 + $0xa60] sm:$0xf]  ;;  %v7234_v9 = vld [vmem:[%s10911_s1 + $0xa6c] sm:$0xf0]  ;;  %v5892_v13 = vor.u32 %v7202_v7, %v5891_v5  ;;  %3537 = vmatpush.bf16.msra.mxu3 %v6164_v6  ;;  %v286_v7 = vld [vmem:[%s7836_s21 + $0x48] sm:$0xff] }
  0x60   : > { %v6147_v10 = vld [vmem:[%s10911_s1 + $0xb60] sm:$0xf]  ;;  %v7266_v11 = vld [vmem:[%s10911_s1 + $0xb6c] sm:$0xf0]  ;;  %v6020_v14 = vor.u32 %v7234_v9, %v6019_v8  ;;  %v288_v8 = vld [vmem:[%s7836_s21 + $0x58] sm:$0xff] }
  0x61   : > { %v5747_v15 = vld [vmem:[%s10911_s1 + $0x840] sm:$0xf]  ;;  %v7166_v16 = vld [vmem:[%s10911_s1 + $0x84c] sm:$0xf0]  ;;  %v6148_v18 = vor.u32 %v7266_v11, %v6147_v10  ;;  %3499 = vmatpush.bf16.msra.mxu0 %v5764_v12  ;;  %3512 = vmatpush.bf16.msra.mxu1 %v5892_v13 }
  0x62   : > { %v5875_v17 = vld [vmem:[%s10911_s1 + $0x940] sm:$0xf]  ;;  %v7198_v19 = vld [vmem:[%s10911_s1 + $0x94c] sm:$0xf0]  ;;  %v5748_v24 = vor.u32 %v7166_v16, %v5747_v15  ;;  %3525 = vmatpush.bf16.msra.mxu2 %v6020_v14 }
  0x63   : > { %v6003_v20 = vld [vmem:[%s10911_s1 + $0xa40] sm:$0xf]  ;;  %v7230_v21 = vld [vmem:[%s10911_s1 + $0xa4c] sm:$0xf0]  ;;  %v5876_v25 = vor.u32 %v7198_v19, %v5875_v17  ;;  %3538 = vmatpush.bf16.msra.mxu3 %v6148_v18 }
  0x64   : > { %v6131_v22 = vld [vmem:[%s10911_s1 + $0xb40] sm:$0xf]  ;;  %v7262_v23 = vld [vmem:[%s10911_s1 + $0xb4c] sm:$0xf0]  ;;  %v6004_v26 = vor.u32 %v7230_v21, %v6003_v20  ;;  %v8190_v20 = vpack.c.bf16 %v286_v7, %v286_v7 }
  0x65   : > { %v5731_v30 = vld [vmem:[%s10911_s1 + $0x820] sm:$0xf]  ;;  %v7162_v31 = vld [vmem:[%s10911_s1 + $0x82c] sm:$0xf0]  ;;  %v6132_v35 = vor.u32 %v7262_v23, %v6131_v22  ;;  %3500 = vmatpush.bf16.msra.mxu0 %v5748_v24  ;;  %3513 = vmatpush.bf16.msra.mxu1 %v5876_v25  ;;  %v8198_v23 = vpack.c.bf16 %v288_v8, %v288_v8 }
  0x66   : > { %v5859_v33 = vld [vmem:[%s10911_s1 + $0x920] sm:$0xf]  ;;  %v7194_v36 = vld [vmem:[%s10911_s1 + $0x92c] sm:$0xf0]  ;;  %v5732_v44 = vor.u32 %v7162_v31, %v5731_v30  ;;  %3526 = vmatpush.bf16.msra.mxu2 %v6004_v26 }
  0x67   : > { %v5987_v39 = vld [vmem:[%s10911_s1 + $0xa20] sm:$0xf]  ;;  %v7226_v41 = vld [vmem:[%s10911_s1 + $0xa2c] sm:$0xf0]  ;;  %v5860_v47 = vor.u32 %v7194_v36, %v5859_v33  ;;  %3539 = vmatpush.bf16.msra.mxu3 %v6132_v35 }
  0x68   : > { %v6115_v42 = vld [vmem:[%s10911_s1 + $0xb20] sm:$0xf]  ;;  %v7258_v43 = vld [vmem:[%s10911_s1 + $0xb2c] sm:$0xf0]  ;;  %v5988_v48 = vor.u32 %v7226_v41, %v5987_v39 }
  0x69   : > { %v5715_v45 = vld [vmem:[%s10911_s1 + $0x800] sm:$0xf]  ;;  %v7158_v46 = vld [vmem:[%s10911_s1 + $0x80c] sm:$0xf0]  ;;  %v6116_v52 = vor.u32 %v7258_v43, %v6115_v42  ;;  %3501 = vmatpush.bf16.msra.mxu0 %v5732_v44  ;;  %3514 = vmatpush.bf16.msra.mxu1 %v5860_v47 }
  0x6a   : > { %v5843_v49 = vld [vmem:[%s10911_s1 + $0x900] sm:$0xf]  ;;  %v7190_v50 = vld [vmem:[%s10911_s1 + $0x90c] sm:$0xf0]  ;;  %v5716_v59 = vor.u32 %v7158_v46, %v5715_v45  ;;  %3527 = vmatpush.bf16.msra.mxu2 %v5988_v48 }
  0x6b   : > { %v5971_v51 = vld [vmem:[%s10911_s1 + $0xa00] sm:$0xf]  ;;  %v7222_v53 = vld [vmem:[%s10911_s1 + $0xa0c] sm:$0xf0]  ;;  %v5844_v63 = vor.u32 %v7190_v50, %v5843_v49  ;;  %3540 = vmatpush.bf16.msra.mxu3 %v6116_v52 }
  0x6c   : > { %v6099_v54 = vld [vmem:[%s10911_s1 + $0xb00] sm:$0xf]  ;;  %v7254_v55 = vld [vmem:[%s10911_s1 + $0xb0c] sm:$0xf0]  ;;  %v5972_v0 = vor.u32 %v7222_v53, %v5971_v51 }
  0x6d   : > { %v6339_v56 = vld [vmem:[%s10911_s1 + $0xce0] sm:$0xf]  ;;  %v7314_v57 = vld [vmem:[%s10911_s1 + $0xcec] sm:$0xf0]  ;;  %v6100_v4 = vor.u32 %v7254_v55, %v6099_v54  ;;  %3502 = vmatpush.bf16.msra.mxu0 %v5716_v59  ;;  %3515 = vmatpush.bf16.msra.mxu1 %v5844_v63 }
  0x6e   : > { %v6467_v58 = vld [vmem:[%s10911_s1 + $0xde0] sm:$0xf]  ;;  %v7346_v60 = vld [vmem:[%s10911_s1 + $0xdec] sm:$0xf0]  ;;  %v6340_v5 = vor.u32 %v7314_v57, %v6339_v56  ;;  %3528 = vmatpush.bf16.msra.mxu2 %v5972_v0 }
  0x6f   : > { %v6595_v61 = vld [vmem:[%s10911_s1 + $0xee0] sm:$0xf]  ;;  %v7378_v62 = vld [vmem:[%s10911_s1 + $0xeec] sm:$0xf0]  ;;  %v6468_v9 = vor.u32 %v7346_v60, %v6467_v58  ;;  %3541 = vmatpush.bf16.msra.mxu3 %v6100_v4 }
  0x70   : > { %v6723_v1 = vld [vmem:[%s10911_s1 + $0xfe0] sm:$0xf]  ;;  %v7410_v2 = vld [vmem:[%s10911_s1 + $0xfec] sm:$0xf0]  ;;  %v6596_v10 = vor.u32 %v7378_v62, %v6595_v61  ;;  %3516 = vmatmul.bf16.vlgmr.msra.gmra.mxu1 %v8190_v20 }
  0x71   : > { %v285_v3 = vld [vmem:[%s7836_s21 + $0x40] sm:$0xff]  ;;  %v287_v6 = vld [vmem:[%s7836_s21 + $0x50] sm:$0xff]  ;;  %v6724_v14 = vor.u32 %v7410_v2, %v6723_v1  ;;  %3547 = vmatpush.bf16.msrb.mxu0 %v6340_v5  ;;  %3560 = vmatpush.bf16.msrb.mxu1 %v6468_v9 }
  0x72   : > { %v6323_v11 = vld [vmem:[%s10911_s1 + $0xcc0] sm:$0xf]  ;;  %v7310_v12 = vld [vmem:[%s10911_s1 + $0xccc] sm:$0xf0]  ;;  %v8177_v15 = vpack.c.bf16 %v285_v3, %v285_v3  ;;  %v8188_v19 = vpack.c.bf16 %v287_v6, %v287_v6  ;;  %3573 = vmatpush.bf16.msrb.mxu2 %v6596_v10  ;;  %3542 = vmatmul.bf16.vlgmr.msra.gmra.mxu3 %v8198_v23 }
  0x73   : > { %v6451_v13 = vld [vmem:[%s10911_s1 + $0xdc0] sm:$0xf]  ;;  %v7342_v16 = vld [vmem:[%s10911_s1 + $0xdcc] sm:$0xf0]  ;;  %v6324_v24 = vor.u32 %v7310_v12, %v6323_v11  ;;  %3586 = vmatpush.bf16.msrb.mxu3 %v6724_v14 }
  0x74   : > { %v6579_v17 = vld [vmem:[%s10911_s1 + $0xec0] sm:$0xf]  ;;  %v7374_v18 = vld [vmem:[%s10911_s1 + $0xecc] sm:$0xf0]  ;;  %v6452_v25 = vor.u32 %v7342_v16, %v6451_v13  ;;  %3503 = vmatmul.bf16.vlgmr.msra.gmra.mxu0 %v8177_v15  ;;  %3529 = vmatmul.bf16.vlgmr.msra.gmra.mxu2 %v8188_v19 }
  0x75   : > { %v6707_v21 = vld [vmem:[%s10911_s1 + $0xfc0] sm:$0xf]  ;;  %v7406_v22 = vld [vmem:[%s10911_s1 + $0xfcc] sm:$0xf0]  ;;  %v6580_v26 = vor.u32 %v7374_v18, %v6579_v17  ;;  %3548 = vmatpush.bf16.msrb.mxu0 %v6324_v24 }
  0x76   : > { %v6307_v30 = vld [vmem:[%s10911_s1 + $0xca0] sm:$0xf]  ;;  %v7306_v31 = vld [vmem:[%s10911_s1 + $0xcac] sm:$0xf0]  ;;  %v6708_v35 = vor.u32 %v7406_v22, %v6707_v21  ;;  %3561 = vmatpush.bf16.msrb.mxu1 %v6452_v25 }
  0x77   : > { %v6435_v33 = vld [vmem:[%s10911_s1 + $0xda0] sm:$0xf]  ;;  %v7338_v36 = vld [vmem:[%s10911_s1 + $0xdac] sm:$0xf0]  ;;  %v6308_v44 = vor.u32 %v7306_v31, %v6307_v30  ;;  %3574 = vmatpush.bf16.msrb.mxu2 %v6580_v26 }
  0x78   : > { %v6563_v39 = vld [vmem:[%s10911_s1 + $0xea0] sm:$0xf]  ;;  %v7370_v41 = vld [vmem:[%s10911_s1 + $0xeac] sm:$0xf0]  ;;  %v6436_v45 = vor.u32 %v7338_v36, %v6435_v33  ;;  %3587 = vmatpush.bf16.msrb.mxu3 %v6708_v35 }
  0x79   : > { %v6691_v42 = vld [vmem:[%s10911_s1 + $0xfa0] sm:$0xf]  ;;  %v7402_v43 = vld [vmem:[%s10911_s1 + $0xfac] sm:$0xf0]  ;;  %v6564_v46 = vor.u32 %v7370_v41, %v6563_v39  ;;  %3549 = vmatpush.bf16.msrb.mxu0 %v6308_v44 }
  0x7a   : > { %v6291_v47 = vld [vmem:[%s10911_s1 + $0xc80] sm:$0xf]  ;;  %v7302_v48 = vld [vmem:[%s10911_s1 + $0xc8c] sm:$0xf0]  ;;  %v6692_v50 = vor.u32 %v7402_v43, %v6691_v42  ;;  %3562 = vmatpush.bf16.msrb.mxu1 %v6436_v45 }
  0x7b   : > { %v6419_v49 = vld [vmem:[%s10911_s1 + $0xd80] sm:$0xf]  ;;  %v7334_v51 = vld [vmem:[%s10911_s1 + $0xd8c] sm:$0xf0]  ;;  %v6292_v56 = vor.u32 %v7302_v48, %v6291_v47  ;;  %3575 = vmatpush.bf16.msrb.mxu2 %v6564_v46 }
  0x7c   : > { %v6547_v52 = vld [vmem:[%s10911_s1 + $0xe80] sm:$0xf]  ;;  %v7366_v53 = vld [vmem:[%s10911_s1 + $0xe8c] sm:$0xf0]  ;;  %v6420_v57 = vor.u32 %v7334_v51, %v6419_v49  ;;  %3588 = vmatpush.bf16.msrb.mxu3 %v6692_v50 }
  0x7d   : > { %v6675_v54 = vld [vmem:[%s10911_s1 + $0xf80] sm:$0xf]  ;;  %v7398_v55 = vld [vmem:[%s10911_s1 + $0xf8c] sm:$0xf0]  ;;  %v6548_v58 = vor.u32 %v7366_v53, %v6547_v52  ;;  %3550 = vmatpush.bf16.msrb.mxu0 %v6292_v56  ;;  %v6928_v52 = vld [vmem:[%s10911_s1 + $0xe4] sm:$0xf] }
  0x7e   : > { %v6275_v59 = vld [vmem:[%s10911_s1 + $0xc60] sm:$0xf]  ;;  %v7298_v60 = vld [vmem:[%s10911_s1 + $0xc6c] sm:$0xf0]  ;;  %v6676_v62 = vor.u32 %v7398_v55, %v6675_v54  ;;  %3563 = vmatpush.bf16.msrb.mxu1 %v6420_v57  ;;  %v4805_v53 = vld [vmem:[%s10911_s1 + $0xf0] sm:$0xf0] }
  0x7f   : > { %v6403_v61 = vld [vmem:[%s10911_s1 + $0xd60] sm:$0xf]  ;;  %v7330_v63 = vld [vmem:[%s10911_s1 + $0xd6c] sm:$0xf0]  ;;  %v6276_v4 = vor.u32 %v7298_v60, %v6275_v59  ;;  %3576 = vmatpush.bf16.msrb.mxu2 %v6548_v58  ;;  %v6960_v54 = vld [vmem:[%s10911_s1 + $0x1e4] sm:$0xf] }
  0x80   : > { %v6531_v0 = vld [vmem:[%s10911_s1 + $0xe60] sm:$0xf]  ;;  %v7362_v1 = vld [vmem:[%s10911_s1 + $0xe6c] sm:$0xf0]  ;;  %v6404_v5 = vor.u32 %v7330_v63, %v6403_v61  ;;  %3589 = vmatpush.bf16.msrb.mxu3 %v6676_v62  ;;  %v4933_v56 = vld [vmem:[%s10911_s1 + $0x1f0] sm:$0xf0] }
  0x81   : > { %v6659_v2 = vld [vmem:[%s10911_s1 + $0xf60] sm:$0xf]  ;;  %v7394_v3 = vld [vmem:[%s10911_s1 + $0xf6c] sm:$0xf0]  ;;  %v6532_v6 = vor.u32 %v7362_v1, %v6531_v0  ;;  %3551 = vmatpush.bf16.msrb.mxu0 %v6276_v4  ;;  %v6992_v57 = vld [vmem:[%s10911_s1 + $0x2e4] sm:$0xf]  ;;  %v4808_v1 = vor.u32 %v6928_v52, %v4805_v53 }
  0x82   : > { %v6259_v7 = vld [vmem:[%s10911_s1 + $0xc40] sm:$0xf]  ;;  %v7294_v8 = vld [vmem:[%s10911_s1 + $0xc4c] sm:$0xf0]  ;;  %v6660_v10 = vor.u32 %v7394_v3, %v6659_v2  ;;  %3564 = vmatpush.bf16.msrb.mxu1 %v6404_v5  ;;  %v5061_v58 = vld [vmem:[%s10911_s1 + $0x2f0] sm:$0xf0]  ;;  %v4936_v5 = vor.u32 %v6960_v54, %v4933_v56 }
  0x83   : > { %v6387_v9 = vld [vmem:[%s10911_s1 + $0xd40] sm:$0xf]  ;;  %v7326_v11 = vld [vmem:[%s10911_s1 + $0xd4c] sm:$0xf0]  ;;  %v6260_v17 = vor.u32 %v7294_v8, %v6259_v7  ;;  %3577 = vmatpush.bf16.msrb.mxu2 %v6532_v6  ;;  %v7024_v61 = vld [vmem:[%s10911_s1 + $0x3e4] sm:$0xf]  ;;  %v5064_v6 = vor.u32 %v6992_v57, %v5061_v58 }
  0x84   : > { %v6515_v12 = vld [vmem:[%s10911_s1 + $0xe40] sm:$0xf]  ;;  %v7358_v13 = vld [vmem:[%s10911_s1 + $0xe4c] sm:$0xf0]  ;;  %v6388_v18 = vor.u32 %v7326_v11, %v6387_v9  ;;  %3590 = vmatpush.bf16.msrb.mxu3 %v6660_v10  ;;  %v5189_v62 = vld [vmem:[%s10911_s1 + $0x3f0] sm:$0xf0] }
  0x85   : > { %v6643_v14 = vld [vmem:[%s10911_s1 + $0xf40] sm:$0xf]  ;;  %v7390_v16 = vld [vmem:[%s10911_s1 + $0xf4c] sm:$0xf0]  ;;  %v6516_v21 = vor.u32 %v7358_v13, %v6515_v12  ;;  %3552 = vmatpush.bf16.msrb.mxu0 %v6260_v17  ;;  %v290_v3 = vld [vmem:[%s7836_s21 + $0x68] sm:$0xff]  ;;  %v5192_v10 = vor.u32 %v7024_v61, %v5189_v62 }
  0x86   : > { %v6243_v22 = vld [vmem:[%s10911_s1 + $0xc20] sm:$0xf]  ;;  %v7290_v24 = vld [vmem:[%s10911_s1 + $0xc2c] sm:$0xf0]  ;;  %v6644_v26 = vor.u32 %v7390_v16, %v6643_v14  ;;  %3565 = vmatpush.bf16.msrb.mxu1 %v6388_v18  ;;  %v292_v4 = vld [vmem:[%s7836_s21 + $0x78] sm:$0xff]  ;;  %v8398_v17 = vpack.c.bf16 %v290_v3, %v290_v3 }
  0x87   : > { %v6371_v25 = vld [vmem:[%s10911_s1 + $0xd20] sm:$0xf]  ;;  %v7322_v30 = vld [vmem:[%s10911_s1 + $0xd2c] sm:$0xf0]  ;;  %v6244_v39 = vor.u32 %v7290_v24, %v6243_v22  ;;  %3578 = vmatpush.bf16.msrb.mxu2 %v6516_v21  ;;  %v6924_v7 = vld [vmem:[%s10911_s1 + $0xc4] sm:$0xf]  ;;  %v8406_v22 = vpack.c.bf16 %v292_v4, %v292_v4 }
  0x88   : > { %v6499_v31 = vld [vmem:[%s10911_s1 + $0xe20] sm:$0xf]  ;;  %v7354_v33 = vld [vmem:[%s10911_s1 + $0xe2c] sm:$0xf0]  ;;  %v6372_v43 = vor.u32 %v7322_v30, %v6371_v25  ;;  %3591 = vmatpush.bf16.msrb.mxu3 %v6644_v26  ;;  %v4789_v8 = vld [vmem:[%s10911_s1 + $0xd0] sm:$0xf0] }
  0x89   : > { %v6627_v35 = vld [vmem:[%s10911_s1 + $0xf20] sm:$0xf]  ;;  %v7386_v36 = vld [vmem:[%s10911_s1 + $0xf2c] sm:$0xf0]  ;;  %v6500_v44 = vor.u32 %v7354_v33, %v6499_v31  ;;  %3553 = vmatpush.bf16.msrb.mxu0 %v6244_v39  ;;  %v6956_v9 = vld [vmem:[%s10911_s1 + $0x1c4] sm:$0xf]  ;;  %v4792_v24 = vor.u32 %v6924_v7, %v4789_v8 }
  0x8a   : > { %v6227_v41 = vld [vmem:[%s10911_s1 + $0xc00] sm:$0xf]  ;;  %v7286_v42 = vld [vmem:[%s10911_s1 + $0xc0c] sm:$0xf0]  ;;  %v6628_v48 = vor.u32 %v7386_v36, %v6627_v35  ;;  %3566 = vmatpush.bf16.msrb.mxu1 %v6372_v43  ;;  %v4917_v12 = vld [vmem:[%s10911_s1 + $0x1d0] sm:$0xf0] }
  0x8b   : > { %v6355_v45 = vld [vmem:[%s10911_s1 + $0xd00] sm:$0xf]  ;;  %v7318_v46 = vld [vmem:[%s10911_s1 + $0xd0c] sm:$0xf0]  ;;  %v6228_v55 = vor.u32 %v7286_v42, %v6227_v41  ;;  %3579 = vmatpush.bf16.msrb.mxu2 %v6500_v44  ;;  %v6988_v13 = vld [vmem:[%s10911_s1 + $0x2c4] sm:$0xf]  ;;  %v4920_v25 = vor.u32 %v6956_v9, %v4917_v12 }
  0x8c   : > { %v6483_v47 = vld [vmem:[%s10911_s1 + $0xe00] sm:$0xf]  ;;  %v7350_v49 = vld [vmem:[%s10911_s1 + $0xe0c] sm:$0xf0]  ;;  %v6356_v59 = vor.u32 %v7318_v46, %v6355_v45  ;;  %3592 = vmatpush.bf16.msrb.mxu3 %v6628_v48  ;;  %v5045_v14 = vld [vmem:[%s10911_s1 + $0x2d0] sm:$0xf0] }
  0x8d   : > { %v6611_v50 = vld [vmem:[%s10911_s1 + $0xf00] sm:$0xf]  ;;  %v7382_v51 = vld [vmem:[%s10911_s1 + $0xf0c] sm:$0xf0]  ;;  %v6484_v60 = vor.u32 %v7350_v49, %v6483_v47  ;;  %3554 = vmatpush.bf16.msrb.mxu0 %v6228_v55  ;;  %v7020_v18 = vld [vmem:[%s10911_s1 + $0x3c4] sm:$0xf]  ;;  %v5048_v26 = vor.u32 %v6988_v13, %v5045_v14 }
  0x8e   : > { %v289_v63 = vld [vmem:[%s7836_s21 + $0x60] sm:$0xff]  ;;  %v6612_v0 = vor.u32 %v7382_v51, %v6611_v50  ;;  %v291_v2 = vld [vmem:[%s7836_s21 + $0x70] sm:$0xff]  ;;  %3567 = vmatpush.bf16.msrb.mxu1 %v6356_v59 }
  0x8f   : > { %v8385_v11 = vpack.c.bf16 %v289_v63, %v289_v63  ;;  %3580 = vmatpush.bf16.msrb.mxu2 %v6484_v60  ;;  %v8396_v16 = vpack.c.bf16 %v291_v2, %v291_v2  ;;  %v5173_v21 = vld [vmem:[%s10911_s1 + $0x3d0] sm:$0xf0]  ;;  %v6920_v30 = vld [vmem:[%s10911_s1 + $0xa4] sm:$0xf] }
  0x90   : > { %3593 = vmatpush.bf16.msrb.mxu3 %v6612_v0  ;;  %v4773_v31 = vld [vmem:[%s10911_s1 + $0xb0] sm:$0xf0]  ;;  %v6952_v33 = vld [vmem:[%s10911_s1 + $0x1a4] sm:$0xf]  ;;  %v5176_v35 = vor.u32 %v7020_v18, %v5173_v21 }
  0x91   : > { %3599 = vmatpush.bf16.msra.mxu0 %v4808_v1  ;;  %v4901_v36 = vld [vmem:[%s10911_s1 + $0x1b0] sm:$0xf0]  ;;  %v6984_v39 = vld [vmem:[%s10911_s1 + $0x2a4] sm:$0xf]  ;;  %3568 = vmatmul.bf16.vlgmr.msrb.gmra.mxu1 %v8398_v17  ;;  %v4776_v44 = vor.u32 %v6920_v30, %v4773_v31 }
  0x92   : > { %3612 = vmatpush.bf16.msra.mxu1 %v4936_v5  ;;  %3555 = vmatmul.bf16.vlgmr.msrb.gmra.mxu0 %v8385_v11  ;;  %v5029_v41 = vld [vmem:[%s10911_s1 + $0x2b0] sm:$0xf0]  ;;  %v7016_v42 = vld [vmem:[%s10911_s1 + $0x3a4] sm:$0xf]  ;;  %v4904_v45 = vor.u32 %v6952_v33, %v4901_v36 }
  0x93   : > { %3625 = vmatpush.bf16.msra.mxu2 %v5064_v6  ;;  %v5157_v43 = vld [vmem:[%s10911_s1 + $0x3b0] sm:$0xf0]  ;;  %3594 = vmatmul.bf16.vlgmr.msrb.gmra.mxu3 %v8406_v22  ;;  %v5032_v46 = vor.u32 %v6984_v39, %v5029_v41  ;;  %v6916_v47 = vld [vmem:[%s10911_s1 + $0x84] sm:$0xf] }
  0x94   : > { %3638 = vmatpush.bf16.msra.mxu3 %v5192_v10  ;;  %3581 = vmatmul.bf16.vlgmr.msrb.gmra.mxu2 %v8396_v16  ;;  %v4757_v48 = vld [vmem:[%s10911_s1 + $0x90] sm:$0xf0]  ;;  %v6948_v49 = vld [vmem:[%s10911_s1 + $0x184] sm:$0xf]  ;;  %v5160_v50 = vor.u32 %v7016_v42, %v5157_v43 }
  0x95   : > { %3600 = vmatpush.bf16.msra.mxu0 %v4792_v24  ;;  %v4885_v51 = vld [vmem:[%s10911_s1 + $0x190] sm:$0xf0]  ;;  %v6980_v52 = vld [vmem:[%s10911_s1 + $0x284] sm:$0xf]  ;;  %v4760_v56 = vor.u32 %v6916_v47, %v4757_v48 }
  0x96   : > { %3613 = vmatpush.bf16.msra.mxu1 %v4920_v25  ;;  %v5013_v53 = vld [vmem:[%s10911_s1 + $0x290] sm:$0xf0]  ;;  %v7012_v54 = vld [vmem:[%s10911_s1 + $0x384] sm:$0xf]  ;;  %v4888_v57 = vor.u32 %v6948_v49, %v4885_v51 }
  0x97   : > { %3626 = vmatpush.bf16.msra.mxu2 %v5048_v26  ;;  %v5141_v55 = vld [vmem:[%s10911_s1 + $0x390] sm:$0xf0]  ;;  %v5016_v58 = vor.u32 %v6980_v52, %v5013_v53  ;;  %v6912_v59 = vld [vmem:[%s10911_s1 + $0x64] sm:$0xf] }
  0x98   : > { %3639 = vmatpush.bf16.msra.mxu3 %v5176_v35  ;;  %v4741_v60 = vld [vmem:[%s10911_s1 + $0x70] sm:$0xf0]  ;;  %v6944_v61 = vld [vmem:[%s10911_s1 + $0x164] sm:$0xf]  ;;  %v5144_v62 = vor.u32 %v7012_v54, %v5141_v55 }
  0x99   : > { %3601 = vmatpush.bf16.msra.mxu0 %v4776_v44  ;;  %v4869_v63 = vld [vmem:[%s10911_s1 + $0x170] sm:$0xf0]  ;;  %v6976_v0 = vld [vmem:[%s10911_s1 + $0x264] sm:$0xf]  ;;  %v4744_v4 = vor.u32 %v6912_v59, %v4741_v60 }
  0x9a   : > { %3614 = vmatpush.bf16.msra.mxu1 %v4904_v45  ;;  %v4997_v1 = vld [vmem:[%s10911_s1 + $0x270] sm:$0xf0]  ;;  %v7008_v2 = vld [vmem:[%s10911_s1 + $0x364] sm:$0xf]  ;;  %v4872_v5 = vor.u32 %v6944_v61, %v4869_v63 }
  0x9b   : > { %3627 = vmatpush.bf16.msra.mxu2 %v5032_v46  ;;  %v5125_v3 = vld [vmem:[%s10911_s1 + $0x370] sm:$0xf0]  ;;  %v5000_v6 = vor.u32 %v6976_v0, %v4997_v1  ;;  %v6908_v7 = vld [vmem:[%s10911_s1 + $0x44] sm:$0xf] }
  0x9c   : > { %3640 = vmatpush.bf16.msra.mxu3 %v5160_v50  ;;  %v4725_v8 = vld [vmem:[%s10911_s1 + $0x50] sm:$0xf0]  ;;  %v6940_v9 = vld [vmem:[%s10911_s1 + $0x144] sm:$0xf]  ;;  %v5128_v10 = vor.u32 %v7008_v2, %v5125_v3 }
  0x9d   : > { %3602 = vmatpush.bf16.msra.mxu0 %v4760_v56  ;;  %v4853_v12 = vld [vmem:[%s10911_s1 + $0x150] sm:$0xf0]  ;;  %v6972_v13 = vld [vmem:[%s10911_s1 + $0x244] sm:$0xf]  ;;  %v4728_v24 = vor.u32 %v6908_v7, %v4725_v8 }
  0x9e   : > { %3615 = vmatpush.bf16.msra.mxu1 %v4888_v57  ;;  %v4981_v14 = vld [vmem:[%s10911_s1 + $0x250] sm:$0xf0]  ;;  %v7004_v18 = vld [vmem:[%s10911_s1 + $0x344] sm:$0xf]  ;;  %v4856_v25 = vor.u32 %v6940_v9, %v4853_v12 }
  0x9f   : > { %3628 = vmatpush.bf16.msra.mxu2 %v5016_v58  ;;  %v5109_v21 = vld [vmem:[%s10911_s1 + $0x350] sm:$0xf0]  ;;  %v4984_v26 = vor.u32 %v6972_v13, %v4981_v14  ;;  %v6904_v30 = vld [vmem:[%s10911_s1 + $0x24] sm:$0xf] }
  0xa0   : > { %3641 = vmatpush.bf16.msra.mxu3 %v5144_v62  ;;  %v4709_v31 = vld [vmem:[%s10911_s1 + $0x30] sm:$0xf0]  ;;  %v6936_v33 = vld [vmem:[%s10911_s1 + $0x124] sm:$0xf]  ;;  %v5112_v35 = vor.u32 %v7004_v18, %v5109_v21 }
  0xa1   : > { %3603 = vmatpush.bf16.msra.mxu0 %v4744_v4  ;;  %v4837_v36 = vld [vmem:[%s10911_s1 + $0x130] sm:$0xf0]  ;;  %v6968_v39 = vld [vmem:[%s10911_s1 + $0x224] sm:$0xf]  ;;  %v4712_v44 = vor.u32 %v6904_v30, %v4709_v31 }
  0xa2   : > { %3616 = vmatpush.bf16.msra.mxu1 %v4872_v5  ;;  %v4965_v41 = vld [vmem:[%s10911_s1 + $0x230] sm:$0xf0]  ;;  %v7000_v42 = vld [vmem:[%s10911_s1 + $0x324] sm:$0xf]  ;;  %v4840_v47 = vor.u32 %v6936_v33, %v4837_v36 }
  0xa3   : > { %3629 = vmatpush.bf16.msra.mxu2 %v5000_v6  ;;  %v5093_v43 = vld [vmem:[%s10911_s1 + $0x330] sm:$0xf0]  ;;  %v6900_v45 = vld [vmem:[%s10911_s1 + $0x4] sm:$0xf]  ;;  %v4968_v48 = vor.u32 %v6968_v39, %v4965_v41 }
  0xa4   : > { %3642 = vmatpush.bf16.msra.mxu3 %v5128_v10  ;;  %v4693_v46 = vld [vmem:[%s10911_s1 + $0x10] sm:$0xf0]  ;;  %v6932_v49 = vld [vmem:[%s10911_s1 + $0x104] sm:$0xf]  ;;  %v5096_v52 = vor.u32 %v7000_v42, %v5093_v43 }
  0xa5   : > { %3604 = vmatpush.bf16.msra.mxu0 %v4728_v24  ;;  %v4821_v50 = vld [vmem:[%s10911_s1 + $0x110] sm:$0xf0]  ;;  %v6964_v51 = vld [vmem:[%s10911_s1 + $0x204] sm:$0xf]  ;;  %v4696_v59 = vor.u32 %v6900_v45, %v4693_v46 }
  0xa6   : > { %3617 = vmatpush.bf16.msra.mxu1 %v4856_v25  ;;  %v4949_v53 = vld [vmem:[%s10911_s1 + $0x210] sm:$0xf0]  ;;  %v6996_v54 = vld [vmem:[%s10911_s1 + $0x304] sm:$0xf]  ;;  %v4824_v63 = vor.u32 %v6932_v49, %v4821_v50 }
  0xa7   : > { %3630 = vmatpush.bf16.msra.mxu2 %v4984_v26  ;;  %v5077_v55 = vld [vmem:[%s10911_s1 + $0x310] sm:$0xf0]  ;;  %v7056_v56 = vld [vmem:[%s10911_s1 + $0x4e4] sm:$0xf]  ;;  %v4952_v0 = vor.u32 %v6964_v51, %v4949_v53 }
  0xa8   : > { %3643 = vmatpush.bf16.msra.mxu3 %v5112_v35  ;;  %v5317_v57 = vld [vmem:[%s10911_s1 + $0x4f0] sm:$0xf0]  ;;  %v7088_v58 = vld [vmem:[%s10911_s1 + $0x5e4] sm:$0xf]  ;;  %v5080_v3 = vor.u32 %v6996_v54, %v5077_v55 }
  0xa9   : > { %3605 = vmatpush.bf16.msra.mxu0 %v4712_v44  ;;  %v5445_v60 = vld [vmem:[%s10911_s1 + $0x5f0] sm:$0xf0]  ;;  %v7120_v61 = vld [vmem:[%s10911_s1 + $0x6e4] sm:$0xf]  ;;  %v5320_v4 = vor.u32 %v7056_v56, %v5317_v57 }
  0xaa   : > { %v5573_v62 = vld [vmem:[%s10911_s1 + $0x6f0] sm:$0xf0]  ;;  %3618 = vmatpush.bf16.msra.mxu1 %v4840_v47  ;;  %v7152_v1 = vld [vmem:[%s10911_s1 + $0x7e4] sm:$0xf]  ;;  %v5448_v5 = vor.u32 %v7088_v58, %v5445_v60 }
  0xab   : > { %3631 = vmatpush.bf16.msra.mxu2 %v4968_v48  ;;  %v5701_v2 = vld [vmem:[%s10911_s1 + $0x7f0] sm:$0xf0]  ;;  %v5576_v6 = vor.u32 %v7120_v61, %v5573_v62  ;;  %v7052_v7 = vld [vmem:[%s10911_s1 + $0x4c4] sm:$0xf] }
  0xac   : > { %3644 = vmatpush.bf16.msra.mxu3 %v5096_v52  ;;  %v5301_v8 = vld [vmem:[%s10911_s1 + $0x4d0] sm:$0xf0]  ;;  %v7084_v9 = vld [vmem:[%s10911_s1 + $0x5c4] sm:$0xf]  ;;  %v5704_v10 = vor.u32 %v7152_v1, %v5701_v2 }
  0xad   : > { %3606 = vmatpush.bf16.msra.mxu0 %v4696_v59  ;;  %v5429_v12 = vld [vmem:[%s10911_s1 + $0x5d0] sm:$0xf0]  ;;  %v7116_v13 = vld [vmem:[%s10911_s1 + $0x6c4] sm:$0xf]  ;;  %v5304_v24 = vor.u32 %v7052_v7, %v5301_v8 }
  0xae   : > { %v5557_v14 = vld [vmem:[%s10911_s1 + $0x6d0] sm:$0xf0]  ;;  %3619 = vmatpush.bf16.msra.mxu1 %v4824_v63  ;;  %v7148_v18 = vld [vmem:[%s10911_s1 + $0x7c4] sm:$0xf]  ;;  %v5432_v25 = vor.u32 %v7084_v9, %v5429_v12 }
  0xaf   : > { %3632 = vmatpush.bf16.msra.mxu2 %v4952_v0  ;;  %v5685_v21 = vld [vmem:[%s10911_s1 + $0x7d0] sm:$0xf0]  ;;  %v5560_v26 = vor.u32 %v7116_v13, %v5557_v14  ;;  %v7048_v30 = vld [vmem:[%s10911_s1 + $0x4a4] sm:$0xf] }
  0xb0   : > { %3645 = vmatpush.bf16.msra.mxu3 %v5080_v3  ;;  %v5285_v31 = vld [vmem:[%s10911_s1 + $0x4b0] sm:$0xf0]  ;;  %v7080_v33 = vld [vmem:[%s10911_s1 + $0x5a4] sm:$0xf]  ;;  %v5688_v35 = vor.u32 %v7148_v18, %v5685_v21  ;;  %3607 = vmatmul.bf16.vlgmr.msra.gmra.mxu0 %v7849_v28  ;;  %v821_v18 = vld [vmem:[%s10912_s2] sm:$0xf] }
  0xb1   : > { %3651 = vmatpush.bf16.msrb.mxu0 %v5320_v4  ;;  %v5413_v36 = vld [vmem:[%s10911_s1 + $0x5b0] sm:$0xf0]  ;;  %v7112_v39 = vld [vmem:[%s10911_s1 + $0x6a4] sm:$0xf]  ;;  %v5288_v44 = vor.u32 %v7048_v30, %v5285_v31  ;;  %3620 = vmatmul.bf16.vlgmr.msra.gmra.mxu1 %v7854_v32 }
  0xb2   : > { %3664 = vmatpush.bf16.msrb.mxu1 %v5448_v5  ;;  %v5541_v41 = vld [vmem:[%s10911_s1 + $0x6b0] sm:$0xf0]  ;;  %3633 = vmatmul.bf16.vlgmr.msra.gmra.mxu2 %v7847_v27  ;;  %v7144_v42 = vld [vmem:[%s10911_s1 + $0x7a4] sm:$0xf]  ;;  %v5416_v45 = vor.u32 %v7080_v33, %v5413_v36  ;;  %v823_v36 = vperm.slane %v821_v18, 0 }
  0xb3   : > { %3677 = vmatpush.bf16.msrb.mxu2 %v5576_v6  ;;  %v5669_v43 = vld [vmem:[%s10911_s1 + $0x7b0] sm:$0xf0]  ;;  %3646 = vmatmul.bf16.vlgmr.msra.gmra.mxu3 %v7851_v29  ;;  %v5544_v46 = vor.u32 %v7112_v39, %v5541_v41  ;;  %v7044_v47 = vld [vmem:[%s10911_s1 + $0x484] sm:$0xf] }
  0xb4   : > { %3690 = vmatpush.bf16.msrb.mxu3 %v5704_v10  ;;  %v5269_v48 = vld [vmem:[%s10911_s1 + $0x490] sm:$0xf0]  ;;  %v7076_v49 = vld [vmem:[%s10911_s1 + $0x584] sm:$0xf]  ;;  %v5672_v50 = vor.u32 %v7144_v42, %v5669_v43 }
  0xb5   : > { %3652 = vmatpush.bf16.msrb.mxu0 %v5304_v24  ;;  %v5397_v51 = vld [vmem:[%s10911_s1 + $0x590] sm:$0xf0]  ;;  %v7108_v52 = vld [vmem:[%s10911_s1 + $0x684] sm:$0xf]  ;;  %v5272_v56 = vor.u32 %v7044_v47, %v5269_v48 }
  0xb6   : > { %3665 = vmatpush.bf16.msrb.mxu1 %v5432_v25  ;;  %v5525_v53 = vld [vmem:[%s10911_s1 + $0x690] sm:$0xf0]  ;;  %v7140_v54 = vld [vmem:[%s10911_s1 + $0x784] sm:$0xf]  ;;  %v5400_v57 = vor.u32 %v7076_v49, %v5397_v51 }
  0xb7   : > { %3678 = vmatpush.bf16.msrb.mxu2 %v5560_v26  ;;  %v5653_v55 = vld [vmem:[%s10911_s1 + $0x790] sm:$0xf0]  ;;  %v5528_v58 = vor.u32 %v7108_v52, %v5525_v53  ;;  %v7040_v59 = vld [vmem:[%s10911_s1 + $0x464] sm:$0xf] }
  0xb8   : > { %3691 = vmatpush.bf16.msrb.mxu3 %v5688_v35  ;;  %v5253_v60 = vld [vmem:[%s10911_s1 + $0x470] sm:$0xf0]  ;;  %v7072_v61 = vld [vmem:[%s10911_s1 + $0x564] sm:$0xf]  ;;  %v5656_v62 = vor.u32 %v7140_v54, %v5653_v55 }
  0xb9   : > { %3653 = vmatpush.bf16.msrb.mxu0 %v5288_v44  ;;  %v5381_v63 = vld [vmem:[%s10911_s1 + $0x570] sm:$0xf0]  ;;  %v7104_v0 = vld [vmem:[%s10911_s1 + $0x664] sm:$0xf]  ;;  %v5256_v4 = vor.u32 %v7040_v59, %v5253_v60 }
  0xba   : > { %3666 = vmatpush.bf16.msrb.mxu1 %v5416_v45  ;;  %v5509_v1 = vld [vmem:[%s10911_s1 + $0x670] sm:$0xf0]  ;;  %v7136_v2 = vld [vmem:[%s10911_s1 + $0x764] sm:$0xf]  ;;  %v5384_v6 = vor.u32 %v7072_v61, %v5381_v63 }
  0xbb   : > { %3679 = vmatpush.bf16.msrb.mxu2 %v5544_v46  ;;  %v5637_v3 = vld [vmem:[%s10911_s1 + $0x770] sm:$0xf0]  ;;  %v7036_v5 = vld [vmem:[%s10911_s1 + $0x444] sm:$0xf]  ;;  %v5512_v7 = vor.u32 %v7104_v0, %v5509_v1 }
  0xbc   : > { %3692 = vmatpush.bf16.msrb.mxu3 %v5672_v50  ;;  %v5237_v8 = vld [vmem:[%s10911_s1 + $0x450] sm:$0xf0]  ;;  %v7068_v9 = vld [vmem:[%s10911_s1 + $0x544] sm:$0xf]  ;;  %v5640_v12 = vor.u32 %v7136_v2, %v5637_v3 }
  0xbd   : > { %3654 = vmatpush.bf16.msrb.mxu0 %v5272_v56  ;;  %v5365_v10 = vld [vmem:[%s10911_s1 + $0x550] sm:$0xf0]  ;;  %v7100_v13 = vld [vmem:[%s10911_s1 + $0x644] sm:$0xf]  ;;  %v5240_v25 = vor.u32 %v7036_v5, %v5237_v8  ;;  %v3413_v56 = vpop.f32.mrf.mxu1 }
  0xbe   : > { %3667 = vmatpush.bf16.msrb.mxu1 %v5400_v57  ;;  %v5493_v14 = vld [vmem:[%s10911_s1 + $0x650] sm:$0xf0]  ;;  %v7132_v21 = vld [vmem:[%s10911_s1 + $0x744] sm:$0xf]  ;;  %v5368_v30 = vor.u32 %v7068_v9, %v5365_v10  ;;  %v3400_v49 = vpop.f32.mrf.mxu0 }
  0xbf   : > { %3680 = vmatpush.bf16.msrb.mxu2 %v5528_v58  ;;  %v5621_v24 = vld [vmem:[%s10911_s1 + $0x750] sm:$0xf0]  ;;  %v7032_v26 = vld [vmem:[%s10911_s1 + $0x424] sm:$0xf]  ;;  %v5496_v31 = vor.u32 %v7100_v13, %v5493_v14  ;;  %v3401_v55 = vadd.f32 %v3400_v49, %v823_v36  ;;  %v3439_v14 = vpop.f32.mrf.mxu3 }
  0xc0   : > { %3693 = vmatpush.bf16.msrb.mxu3 %v5656_v62  ;;  %v5221_v33 = vld [vmem:[%s10911_s1 + $0x430] sm:$0xf0]  ;;  %v7064_v35 = vld [vmem:[%s10911_s1 + $0x524] sm:$0xf]  ;;  %v5624_v39 = vor.u32 %v7132_v21, %v5621_v24 }
  0xc1   : > { %3655 = vmatpush.bf16.msrb.mxu0 %v5256_v4  ;;  %v5349_v41 = vld [vmem:[%s10911_s1 + $0x530] sm:$0xf0]  ;;  %v7096_v42 = vld [vmem:[%s10911_s1 + $0x624] sm:$0xf]  ;;  %v5224_v46 = vor.u32 %v7032_v26, %v5221_v33  ;;  %v3414_v0 = vadd.f32 %v3413_v56, %v3401_v55 }
  0xc2   : > { %3668 = vmatpush.bf16.msrb.mxu1 %v5384_v6  ;;  %v5477_v43 = vld [vmem:[%s10911_s1 + $0x630] sm:$0xf0]  ;;  %v7128_v44 = vld [vmem:[%s10911_s1 + $0x724] sm:$0xf]  ;;  %v5352_v50 = vor.u32 %v7064_v35, %v5349_v41 }
  0xc3   : > { %3681 = vmatpush.bf16.msrb.mxu2 %v5512_v7  ;;  %v5605_v45 = vld [vmem:[%s10911_s1 + $0x730] sm:$0xf0]  ;;  %v7028_v47 = vld [vmem:[%s10911_s1 + $0x404] sm:$0xf]  ;;  %v5480_v51 = vor.u32 %v7096_v42, %v5477_v43 }
  0xc4   : > { %3694 = vmatpush.bf16.msrb.mxu3 %v5640_v12  ;;  %v5205_v48 = vld [vmem:[%s10911_s1 + $0x410] sm:$0xf0]  ;;  %v7060_v52 = vld [vmem:[%s10911_s1 + $0x504] sm:$0xf]  ;;  %v5608_v57 = vor.u32 %v7128_v44, %v5605_v45  ;;  %v3426_v9 = vpop.f32.mrf.mxu2 }
  0xc5   : > { %3656 = vmatpush.bf16.msrb.mxu0 %v5240_v25  ;;  %v5333_v53 = vld [vmem:[%s10911_s1 + $0x510] sm:$0xf0]  ;;  %v7092_v54 = vld [vmem:[%s10911_s1 + $0x604] sm:$0xf]  ;;  %v5208_v1 = vor.u32 %v7028_v47, %v5205_v48  ;;  %v3427_v13 = vadd.f32 %v3426_v9, %v3414_v0  ;;  %v3415_v43 = vpop.f32.mrf.mxu1 }
  0xc6   : > { %3669 = vmatpush.bf16.msrb.mxu1 %v5368_v30  ;;  %v5461_v58 = vld [vmem:[%s10911_s1 + $0x610] sm:$0xf0]  ;;  %v7124_v59 = vld [vmem:[%s10911_s1 + $0x704] sm:$0xf]  ;;  %v5336_v5 = vor.u32 %v7060_v52, %v5333_v53 }
  0xc7   : > { %3682 = vmatpush.bf16.msrb.mxu2 %v5496_v31  ;;  %v5589_v60 = vld [vmem:[%s10911_s1 + $0x710] sm:$0xf0]  ;;  %v7184_v61 = vld [vmem:[%s10911_s1 + $0x8e4] sm:$0xf]  ;;  %v5464_v6 = vor.u32 %v7092_v54, %v5461_v58  ;;  %v3440_v36 = vadd.f32 %v3439_v14, %v3427_v13  ;;  %v3441_v58 = vpop.f32.mrf.mxu3 }
  0xc8   : > { %3695 = vmatpush.bf16.msrb.mxu3 %v5624_v39  ;;  %v5829_v62 = vld [vmem:[%s10911_s1 + $0x8f0] sm:$0xf0]  ;;  %v7216_v63 = vld [vmem:[%s10911_s1 + $0x9e4] sm:$0xf]  ;;  %v5592_v10 = vor.u32 %v7124_v59, %v5589_v60  ;;  %v3402_v39 = vpop.f32.mrf.mxu0 }
  0xc9   : > { %3657 = vmatpush.bf16.msrb.mxu0 %v5224_v46  ;;  %v5957_v2 = vld [vmem:[%s10911_s1 + $0x9f0] sm:$0xf0]  ;;  %v7248_v3 = vld [vmem:[%s10911_s1 + $0xae4] sm:$0xf]  ;;  %v5832_v12 = vor.u32 %v7184_v61, %v5829_v62 }
  0xca   : > { %v6085_v4 = vld [vmem:[%s10911_s1 + $0xaf0] sm:$0xf0]  ;;  %3670 = vmatpush.bf16.msrb.mxu1 %v5352_v50  ;;  %v7280_v7 = vld [vmem:[%s10911_s1 + $0xbe4] sm:$0xf]  ;;  %v5960_v18 = vor.u32 %v7216_v63, %v5957_v2 }
  0xcb   : > { %3683 = vmatpush.bf16.msrb.mxu2 %v5480_v51  ;;  %v6213_v8 = vld [vmem:[%s10911_s1 + $0xbf0] sm:$0xf0]  ;;  %v6088_v21 = vor.u32 %v7248_v3, %v6085_v4  ;;  %v7180_v24 = vld [vmem:[%s10911_s1 + $0x8c4] sm:$0xf] }
  0xcc   : > { %3696 = vmatpush.bf16.msrb.mxu3 %v5608_v57  ;;  %v5813_v25 = vld [vmem:[%s10911_s1 + $0x8d0] sm:$0xf0]  ;;  %v7212_v26 = vld [vmem:[%s10911_s1 + $0x9c4] sm:$0xf]  ;;  %v6216_v30 = vor.u32 %v7280_v7, %v6213_v8  ;;  %v3428_v56 = vpop.f32.mrf.mxu2 }
  0xcd   : > { %3658 = vmatpush.bf16.msrb.mxu0 %v5208_v1  ;;  %v5941_v31 = vld [vmem:[%s10911_s1 + $0x9d0] sm:$0xf0]  ;;  %v7244_v33 = vld [vmem:[%s10911_s1 + $0xac4] sm:$0xf]  ;;  %v5816_v44 = vor.u32 %v7180_v24, %v5813_v25 }
  0xce   : > { %v6069_v35 = vld [vmem:[%s10911_s1 + $0xad0] sm:$0xf0]  ;;  %3671 = vmatpush.bf16.msrb.mxu1 %v5336_v5  ;;  %v7276_v41 = vld [vmem:[%s10911_s1 + $0xbc4] sm:$0xf]  ;;  %v5944_v45 = vor.u32 %v7212_v26, %v5941_v31 }
  0xcf   : > { %3684 = vmatpush.bf16.msrb.mxu2 %v5464_v6  ;;  %v6197_v42 = vld [vmem:[%s10911_s1 + $0xbd0] sm:$0xf0]  ;;  %v6072_v46 = vor.u32 %v7244_v33, %v6069_v35  ;;  %v7176_v47 = vld [vmem:[%s10911_s1 + $0x8a4] sm:$0xf] }
  0xd0   : > { %3697 = vmatpush.bf16.msrb.mxu3 %v5592_v10  ;;  %v5797_v48 = vld [vmem:[%s10911_s1 + $0x8b0] sm:$0xf0]  ;;  %v7208_v49 = vld [vmem:[%s10911_s1 + $0x9a4] sm:$0xf]  ;;  %v6200_v50 = vor.u32 %v7276_v41, %v6197_v42  ;;  %3659 = vmatmul.bf16.vlgmr.msrb.gmra.mxu0 %v7986_v37 }
  0xd1   : > { %3703 = vmatpush.bf16.msra.mxu0 %v5832_v12  ;;  %v5925_v51 = vld [vmem:[%s10911_s1 + $0x9b0] sm:$0xf0]  ;;  %v7240_v52 = vld [vmem:[%s10911_s1 + $0xaa4] sm:$0xf]  ;;  %v5800_v57 = vor.u32 %v7176_v47, %v5797_v48  ;;  %3672 = vmatmul.bf16.vlgmr.msrb.gmra.mxu1 %v7990_v40  ;;  %v3452_v7 = vpop.f32.mrf.mxu0 }
  0xd2   : > { %3716 = vmatpush.bf16.msra.mxu1 %v5960_v18  ;;  %3685 = vmatmul.bf16.vlgmr.msrb.gmra.mxu2 %v7978_v34  ;;  %v6053_v53 = vld [vmem:[%s10911_s1 + $0xab0] sm:$0xf0]  ;;  %v7272_v54 = vld [vmem:[%s10911_s1 + $0xba4] sm:$0xf]  ;;  %v5928_v59 = vor.u32 %v7208_v49, %v5925_v51  ;;  %v3453_v14 = vadd.f32 %v3452_v7, %v3440_v36  ;;  %v3465_v18 = vpop.f32.mrf.mxu1 }
  0xd3   : > { %3729 = vmatpush.bf16.msra.mxu2 %v6088_v21  ;;  %v6181_v55 = vld [vmem:[%s10911_s1 + $0xbb0] sm:$0xf0]  ;;  %3698 = vmatmul.bf16.vlgmr.msrb.gmra.mxu3 %v7988_v38  ;;  %v6056_v60 = vor.u32 %v7240_v52, %v6053_v53  ;;  %v7172_v61 = vld [vmem:[%s10911_s1 + $0x884] sm:$0xf] }
  0xd4   : > { %3742 = vmatpush.bf16.msra.mxu3 %v6216_v30  ;;  %v5781_v62 = vld [vmem:[%s10911_s1 + $0x890] sm:$0xf0]  ;;  %v7204_v63 = vld [vmem:[%s10911_s1 + $0x984] sm:$0xf]  ;;  %v6184_v0 = vor.u32 %v7272_v54, %v6181_v55  ;;  %v3466_v33 = vadd.f32 %v3465_v18, %v3453_v14 }
  0xd5   : > { %3704 = vmatpush.bf16.msra.mxu0 %v5816_v44  ;;  %v5909_v1 = vld [vmem:[%s10911_s1 + $0x990] sm:$0xf0]  ;;  %v7236_v2 = vld [vmem:[%s10911_s1 + $0xa84] sm:$0xf]  ;;  %v5784_v6 = vor.u32 %v7172_v61, %v5781_v62 }
  0xd6   : > { %3717 = vmatpush.bf16.msra.mxu1 %v5944_v45  ;;  %v6037_v3 = vld [vmem:[%s10911_s1 + $0xa90] sm:$0xf0]  ;;  %v7268_v4 = vld [vmem:[%s10911_s1 + $0xb84] sm:$0xf]  ;;  %v5912_v8 = vor.u32 %v7204_v63, %v5909_v1  ;;  %v3478_v44 = vpop.f32.mrf.mxu2 }
  0xd7   : > { %3730 = vmatpush.bf16.msra.mxu2 %v6072_v46  ;;  %v6165_v5 = vld [vmem:[%s10911_s1 + $0xb90] sm:$0xf0]  ;;  %v6040_v9 = vor.u32 %v7236_v2, %v6037_v3  ;;  %v7168_v10 = vld [vmem:[%s10911_s1 + $0x864] sm:$0xf]  ;;  %v3479_v49 = vadd.f32 %v3478_v44, %v3466_v33 }
  0xd8   : > { %3743 = vmatpush.bf16.msra.mxu3 %v6200_v50  ;;  %v5765_v12 = vld [vmem:[%s10911_s1 + $0x870] sm:$0xf0]  ;;  %v7200_v13 = vld [vmem:[%s10911_s1 + $0x964] sm:$0xf]  ;;  %v6168_v21 = vor.u32 %v7268_v4, %v6165_v5  ;;  %v3491_v50 = vpop.f32.mrf.mxu3 }
  0xd9   : > { %3705 = vmatpush.bf16.msra.mxu0 %v5800_v57  ;;  %v5893_v24 = vld [vmem:[%s10911_s1 + $0x970] sm:$0xf0]  ;;  %v7232_v25 = vld [vmem:[%s10911_s1 + $0xa64] sm:$0xf]  ;;  %v5768_v35 = vor.u32 %v7168_v10, %v5765_v12  ;;  %v8903_v54 = vadd.f32 %v3491_v50, %v3479_v49  ;;  %v3454_v55 = vpop.f32.mrf.mxu0 }
  0xda   : > { %3718 = vmatpush.bf16.msra.mxu1 %v5928_v59  ;;  %v6021_v26 = vld [vmem:[%s10911_s1 + $0xa70] sm:$0xf0]  ;;  %v7264_v30 = vld [vmem:[%s10911_s1 + $0xb64] sm:$0xf]  ;;  %v5896_v36 = vor.u32 %v7200_v13, %v5893_v24  ;;  %v3467_v61 = vpop.f32.mrf.mxu1 }
  0xdb   : > { %3731 = vmatpush.bf16.msra.mxu2 %v6056_v60  ;;  %v6149_v31 = vld [vmem:[%s10911_s1 + $0xb70] sm:$0xf0]  ;;  %v6024_v39 = vor.u32 %v7232_v25, %v6021_v26  ;;  %v7164_v41 = vld [vmem:[%s10911_s1 + $0x844] sm:$0xf] }
  0xdc   : > { %3744 = vmatpush.bf16.msra.mxu3 %v6184_v0  ;;  %v5749_v42 = vld [vmem:[%s10911_s1 + $0x850] sm:$0xf0]  ;;  %v7196_v43 = vld [vmem:[%s10911_s1 + $0x944] sm:$0xf]  ;;  %v6152_v45 = vor.u32 %v7264_v30, %v6149_v31 }
  0xdd   : > { %3706 = vmatpush.bf16.msra.mxu0 %v5784_v6  ;;  %v5877_v46 = vld [vmem:[%s10911_s1 + $0x950] sm:$0xf0]  ;;  %v7228_v47 = vld [vmem:[%s10911_s1 + $0xa44] sm:$0xf]  ;;  %v5752_v53 = vor.u32 %v7164_v41, %v5749_v42 }
  0xde   : > { %3719 = vmatpush.bf16.msra.mxu1 %v5912_v8  ;;  %v6005_v48 = vld [vmem:[%s10911_s1 + $0xa50] sm:$0xf0]  ;;  %v7260_v51 = vld [vmem:[%s10911_s1 + $0xb44] sm:$0xf]  ;;  %v5880_v56 = vor.u32 %v7196_v43, %v5877_v46  ;;  %v3480_v13 = vpop.f32.mrf.mxu2 }
  0xdf   : > { %3732 = vmatpush.bf16.msra.mxu2 %v6040_v9  ;;  %v6133_v52 = vld [vmem:[%s10911_s1 + $0xb50] sm:$0xf0]  ;;  %v6008_v57 = vor.u32 %v7228_v47, %v6005_v48  ;;  %v7160_v58 = vld [vmem:[%s10911_s1 + $0x824] sm:$0xf] }
  0xe0   : > { %3745 = vmatpush.bf16.msra.mxu3 %v6168_v21  ;;  %v5733_v59 = vld [vmem:[%s10911_s1 + $0x830] sm:$0xf0]  ;;  %v7192_v60 = vld [vmem:[%s10911_s1 + $0x924] sm:$0xf]  ;;  %v6136_v62 = vor.u32 %v7260_v51, %v6133_v52  ;;  %v3493_v25 = vpop.f32.mrf.mxu3 }
  0xe1   : > { %3707 = vmatpush.bf16.msra.mxu0 %v5768_v35  ;;  %v5861_v63 = vld [vmem:[%s10911_s1 + $0x930] sm:$0xf0]  ;;  %v7224_v0 = vld [vmem:[%s10911_s1 + $0xa24] sm:$0xf]  ;;  %v5736_v4 = vor.u32 %v7160_v58, %v5733_v59 }
  0xe2   : > { %3720 = vmatpush.bf16.msra.mxu1 %v5896_v36  ;;  %v5989_v1 = vld [vmem:[%s10911_s1 + $0xa30] sm:$0xf0]  ;;  %v7256_v2 = vld [vmem:[%s10911_s1 + $0xb24] sm:$0xf]  ;;  %v5864_v7 = vor.u32 %v7192_v60, %v5861_v63 }
  0xe3   : > { %3733 = vmatpush.bf16.msra.mxu2 %v6024_v39  ;;  %v6117_v3 = vld [vmem:[%s10911_s1 + $0xb30] sm:$0xf0]  ;;  %v7156_v5 = vld [vmem:[%s10911_s1 + $0x804] sm:$0xf]  ;;  %v5992_v8 = vor.u32 %v7224_v0, %v5989_v1 }
  0xe4   : > { %3746 = vmatpush.bf16.msra.mxu3 %v6152_v45  ;;  %v5717_v6 = vld [vmem:[%s10911_s1 + $0x810] sm:$0xf0]  ;;  %v7188_v9 = vld [vmem:[%s10911_s1 + $0x904] sm:$0xf]  ;;  %v6120_v14 = vor.u32 %v7256_v2, %v6117_v3 }
  0xe5   : > { %3708 = vmatpush.bf16.msra.mxu0 %v5752_v53  ;;  %v5845_v10 = vld [vmem:[%s10911_s1 + $0x910] sm:$0xf0]  ;;  %v7220_v12 = vld [vmem:[%s10911_s1 + $0xa04] sm:$0xf]  ;;  %v5720_v33 = vor.u32 %v7156_v5, %v5717_v6 }
  0xe6   : > { %3721 = vmatpush.bf16.msra.mxu1 %v5880_v56  ;;  %v5973_v18 = vld [vmem:[%s10911_s1 + $0xa10] sm:$0xf0]  ;;  %v7252_v21 = vld [vmem:[%s10911_s1 + $0xb04] sm:$0xf]  ;;  %v5848_v41 = vor.u32 %v7188_v9, %v5845_v10 }
  0xe7   : > { %3734 = vmatpush.bf16.msra.mxu2 %v6008_v57  ;;  %v6101_v24 = vld [vmem:[%s10911_s1 + $0xb10] sm:$0xf0]  ;;  %v7312_v26 = vld [vmem:[%s10911_s1 + $0xce4] sm:$0xf]  ;;  %v5976_v42 = vor.u32 %v7220_v12, %v5973_v18 }
  0xe8   : > { %3747 = vmatpush.bf16.msra.mxu3 %v6136_v62  ;;  %v6341_v30 = vld [vmem:[%s10911_s1 + $0xcf0] sm:$0xf0]  ;;  %v7344_v31 = vld [vmem:[%s10911_s1 + $0xde4] sm:$0xf]  ;;  %v6104_v45 = vor.u32 %v7252_v21, %v6101_v24 }
  0xe9   : > { %3709 = vmatpush.bf16.msra.mxu0 %v5736_v4  ;;  %v6469_v35 = vld [vmem:[%s10911_s1 + $0xdf0] sm:$0xf0]  ;;  %v7376_v36 = vld [vmem:[%s10911_s1 + $0xee4] sm:$0xf]  ;;  %v6344_v46 = vor.u32 %v7312_v26, %v6341_v30 }
  0xea   : > { %v6597_v39 = vld [vmem:[%s10911_s1 + $0xef0] sm:$0xf0]  ;;  %3722 = vmatpush.bf16.msra.mxu1 %v5864_v7  ;;  %v7408_v43 = vld [vmem:[%s10911_s1 + $0xfe4] sm:$0xf]  ;;  %v6472_v47 = vor.u32 %v7344_v31, %v6469_v35 }
  0xeb   : > { %3735 = vmatpush.bf16.msra.mxu2 %v5992_v8  ;;  %v6725_v44 = vld [vmem:[%s10911_s1 + $0xff0] sm:$0xf0]  ;;  %v6600_v48 = vor.u32 %v7376_v36, %v6597_v39  ;;  %v7308_v49 = vld [vmem:[%s10911_s1 + $0xcc4] sm:$0xf] }
  0xec   : > { %3748 = vmatpush.bf16.msra.mxu3 %v6120_v14  ;;  %v6325_v50 = vld [vmem:[%s10911_s1 + $0xcd0] sm:$0xf0]  ;;  %v7340_v51 = vld [vmem:[%s10911_s1 + $0xdc4] sm:$0xf]  ;;  %v6728_v52 = vor.u32 %v7408_v43, %v6725_v44 }
  0xed   : > { %3710 = vmatpush.bf16.msra.mxu0 %v5720_v33  ;;  %v6453_v53 = vld [vmem:[%s10911_s1 + $0xdd0] sm:$0xf0]  ;;  %v7372_v55 = vld [vmem:[%s10911_s1 + $0xec4] sm:$0xf]  ;;  %v6328_v59 = vor.u32 %v7308_v49, %v6325_v50  ;;  %v3517_v35 = vpop.f32.mrf.mxu1 }
  0xee   : > { %v6581_v56 = vld [vmem:[%s10911_s1 + $0xed0] sm:$0xf0]  ;;  %3723 = vmatpush.bf16.msra.mxu1 %v5848_v41  ;;  %v7404_v57 = vld [vmem:[%s10911_s1 + $0xfc4] sm:$0xf]  ;;  %v6456_v60 = vor.u32 %v7340_v51, %v6453_v53 }
  0xef   : > { %3736 = vmatpush.bf16.msra.mxu2 %v5976_v42  ;;  %v6709_v58 = vld [vmem:[%s10911_s1 + $0xfd0] sm:$0xf0]  ;;  %v6584_v61 = vor.u32 %v7372_v55, %v6581_v56  ;;  %v7304_v62 = vld [vmem:[%s10911_s1 + $0xca4] sm:$0xf] }
  0xf0   : > { %3749 = vmatpush.bf16.msra.mxu3 %v6104_v45  ;;  %v6309_v63 = vld [vmem:[%s10911_s1 + $0xcb0] sm:$0xf0]  ;;  %v7336_v0 = vld [vmem:[%s10911_s1 + $0xda4] sm:$0xf]  ;;  %3711 = vmatmul.bf16.vlgmr.msra.gmra.mxu0 %v8177_v15  ;;  %v6712_v1 = vor.u32 %v7404_v57, %v6709_v58 }
  0xf1   : > { %3755 = vmatpush.bf16.msrb.mxu0 %v6344_v46  ;;  %v6437_v2 = vld [vmem:[%s10911_s1 + $0xdb0] sm:$0xf0]  ;;  %v7368_v3 = vld [vmem:[%s10911_s1 + $0xea4] sm:$0xf]  ;;  %3724 = vmatmul.bf16.vlgmr.msra.gmra.mxu1 %v8190_v20  ;;  %v6312_v7 = vor.u32 %v7304_v62, %v6309_v63  ;;  %v3504_v25 = vpop.f32.mrf.mxu0 }
  0xf2   : > { %3768 = vmatpush.bf16.msrb.mxu1 %v6472_v47  ;;  %v6565_v4 = vld [vmem:[%s10911_s1 + $0xeb0] sm:$0xf0]  ;;  %3737 = vmatmul.bf16.vlgmr.msra.gmra.mxu2 %v8188_v19  ;;  %v7400_v5 = vld [vmem:[%s10911_s1 + $0xfa4] sm:$0xf]  ;;  %v6440_v8 = vor.u32 %v7336_v0, %v6437_v2  ;;  %v3505_v31 = vadd.f32 %v3504_v25, %v8903_v54 }
  0xf3   : > { %3781 = vmatpush.bf16.msrb.mxu2 %v6600_v48  ;;  %v6693_v6 = vld [vmem:[%s10911_s1 + $0xfb0] sm:$0xf0]  ;;  %3750 = vmatmul.bf16.vlgmr.msra.gmra.mxu3 %v8198_v23  ;;  %v6568_v9 = vor.u32 %v7368_v3, %v6565_v4  ;;  %v7300_v10 = vld [vmem:[%s10911_s1 + $0xc84] sm:$0xf] }
  0xf4   : > { %3794 = vmatpush.bf16.msrb.mxu3 %v6728_v52  ;;  %v6293_v12 = vld [vmem:[%s10911_s1 + $0xc90] sm:$0xf0]  ;;  %v7332_v13 = vld [vmem:[%s10911_s1 + $0xd84] sm:$0xf]  ;;  %v6696_v14 = vor.u32 %v7400_v5, %v6693_v6  ;;  %v3518_v44 = vadd.f32 %v3517_v35, %v3505_v31 }
  0xf5   : > { %3756 = vmatpush.bf16.msrb.mxu0 %v6328_v59  ;;  %v6421_v18 = vld [vmem:[%s10911_s1 + $0xd90] sm:$0xf0]  ;;  %v7364_v21 = vld [vmem:[%s10911_s1 + $0xe84] sm:$0xf]  ;;  %v6296_v33 = vor.u32 %v7300_v10, %v6293_v12  ;;  %v3543_v63 = vpop.f32.mrf.mxu3  ;;  %v3519_v4 = vpop.f32.mrf.mxu1 }
  0xf6   : > { %3769 = vmatpush.bf16.msrb.mxu1 %v6456_v60  ;;  %v6549_v24 = vld [vmem:[%s10911_s1 + $0xe90] sm:$0xf0]  ;;  %v7396_v26 = vld [vmem:[%s10911_s1 + $0xf84] sm:$0xf]  ;;  %v6424_v36 = vor.u32 %v7332_v13, %v6421_v18  ;;  %v6991_v4 = vld [vmem:[%s10911_s1 + $0x2d4] sm:$0xf0] }
  0xf7   : > { %3782 = vmatpush.bf16.msrb.mxu2 %v6584_v61  ;;  %v6677_v30 = vld [vmem:[%s10911_s1 + $0xf90] sm:$0xf0]  ;;  %v6552_v39 = vor.u32 %v7364_v21, %v6549_v24  ;;  %v7296_v41 = vld [vmem:[%s10911_s1 + $0xc64] sm:$0xf]  ;;  %v3530_v58 = vpop.f32.mrf.mxu2 }
  0xf8   : > { %3795 = vmatpush.bf16.msrb.mxu3 %v6712_v1  ;;  %v6277_v42 = vld [vmem:[%s10911_s1 + $0xc70] sm:$0xf0]  ;;  %v7328_v43 = vld [vmem:[%s10911_s1 + $0xd64] sm:$0xf]  ;;  %v6680_v54 = vor.u32 %v7396_v26, %v6677_v30  ;;  %v3531_v62 = vadd.f32 %v3530_v58, %v3518_v44 }
  0xf9   : > { %3757 = vmatpush.bf16.msrb.mxu0 %v6312_v7  ;;  %v6405_v45 = vld [vmem:[%s10911_s1 + $0xd70] sm:$0xf0]  ;;  %v7360_v46 = vld [vmem:[%s10911_s1 + $0xe64] sm:$0xf]  ;;  %v6280_v50 = vor.u32 %v7296_v41, %v6277_v42  ;;  %v3506_v2 = vpop.f32.mrf.mxu0 }
  0xfa   : > { %3770 = vmatpush.bf16.msrb.mxu1 %v6440_v8  ;;  %v6533_v47 = vld [vmem:[%s10911_s1 + $0xe70] sm:$0xf0]  ;;  %v7392_v48 = vld [vmem:[%s10911_s1 + $0xf64] sm:$0xf]  ;;  %v6408_v51 = vor.u32 %v7328_v43, %v6405_v45  ;;  %v9102_v5 = vadd.f32 %v3543_v63, %v3531_v62  ;;  %v4811_v45 = vld [vmem:[%s10911_s1 + $0xe8] sm:$0xf] }
  0xfb   : > { %3783 = vmatpush.bf16.msrb.mxu2 %v6568_v9  ;;  %v6661_v49 = vld [vmem:[%s10911_s1 + $0xf70] sm:$0xf0]  ;;  %v6536_v52 = vor.u32 %v7360_v46, %v6533_v47  ;;  %v7292_v53 = vld [vmem:[%s10911_s1 + $0xc44] sm:$0xf]  ;;  %v6931_v46 = vld [vmem:[%s10911_s1 + $0xf4] sm:$0xf0] }
  0xfc   : > { %3796 = vmatpush.bf16.msrb.mxu3 %v6696_v14  ;;  %v6261_v55 = vld [vmem:[%s10911_s1 + $0xc50] sm:$0xf0]  ;;  %v7324_v56 = vld [vmem:[%s10911_s1 + $0xd44] sm:$0xf]  ;;  %v6664_v57 = vor.u32 %v7392_v48, %v6661_v49  ;;  %v4939_v47 = vld [vmem:[%s10911_s1 + $0x1e8] sm:$0xf] }
  0xfd   : > { %3758 = vmatpush.bf16.msrb.mxu0 %v6296_v33  ;;  %v6389_v59 = vld [vmem:[%s10911_s1 + $0xd50] sm:$0xf0]  ;;  %v7356_v60 = vld [vmem:[%s10911_s1 + $0xe44] sm:$0xf]  ;;  %v6264_v3 = vor.u32 %v7292_v53, %v6261_v55  ;;  %v3545_v48 = vpop.f32.mrf.mxu3  ;;  %v4795_v62 = vld [vmem:[%s10911_s1 + $0xc8] sm:$0xf] }
  0xfe   : > { %3771 = vmatpush.bf16.msrb.mxu1 %v6424_v36  ;;  %v6517_v61 = vld [vmem:[%s10911_s1 + $0xe50] sm:$0xf0]  ;;  %v7388_v0 = vld [vmem:[%s10911_s1 + $0xf44] sm:$0xf]  ;;  %v6392_v6 = vor.u32 %v7324_v56, %v6389_v59  ;;  %v5195_v56 = vld [vmem:[%s10911_s1 + $0x3e8] sm:$0xf]  ;;  %v4812_v59 = vor.u32 %v6931_v46, %v4811_v45 }
  0xff   : > { %3784 = vmatpush.bf16.msrb.mxu2 %v6552_v39  ;;  %v6645_v1 = vld [vmem:[%s10911_s1 + $0xf50] sm:$0xf0]  ;;  %v6520_v7 = vor.u32 %v7356_v60, %v6517_v61  ;;  %v7288_v8 = vld [vmem:[%s10911_s1 + $0xc24] sm:$0xf]  ;;  %v3532_v44 = vpop.f32.mrf.mxu2  ;;  %v6927_v63 = vld [vmem:[%s10911_s1 + $0xd4] sm:$0xf0] }
 0x100   : > { %3797 = vmatpush.bf16.msrb.mxu3 %v6680_v54  ;;  %v6245_v9 = vld [vmem:[%s10911_s1 + $0xc30] sm:$0xf0]  ;;  %v7320_v10 = vld [vmem:[%s10911_s1 + $0xd24] sm:$0xf]  ;;  %v6648_v12 = vor.u32 %v7388_v0, %v6645_v1  ;;  %v4923_v0 = vld [vmem:[%s10911_s1 + $0x1c8] sm:$0xf] }
 0x101   : > { %3759 = vmatpush.bf16.msrb.mxu0 %v6280_v50  ;;  %v6373_v13 = vld [vmem:[%s10911_s1 + $0xd30] sm:$0xf0]  ;;  %v7352_v14 = vld [vmem:[%s10911_s1 + $0xe24] sm:$0xf]  ;;  %v6248_v25 = vor.u32 %v7288_v8, %v6245_v9  ;;  %v6963_v50 = vld [vmem:[%s10911_s1 + $0x1f4] sm:$0xf0]  ;;  %v4796_v8 = vor.u32 %v6927_v63, %v4795_v62 }
 0x102   : > { %3772 = vmatpush.bf16.msrb.mxu1 %v6408_v51  ;;  %v6501_v18 = vld [vmem:[%s10911_s1 + $0xe30] sm:$0xf0]  ;;  %v7384_v21 = vld [vmem:[%s10911_s1 + $0xf24] sm:$0xf]  ;;  %v6376_v31 = vor.u32 %v7320_v10, %v6373_v13  ;;  %v5067_v51 = vld [vmem:[%s10911_s1 + $0x2e8] sm:$0xf]  ;;  %v4940_v60 = vor.u32 %v6963_v50, %v4939_v47 }
 0x103   : > { %3785 = vmatpush.bf16.msrb.mxu2 %v6536_v52  ;;  %v6629_v24 = vld [vmem:[%s10911_s1 + $0xf30] sm:$0xf0]  ;;  %v7284_v26 = vld [vmem:[%s10911_s1 + $0xc04] sm:$0xf]  ;;  %v6504_v33 = vor.u32 %v7352_v14, %v6501_v18  ;;  %v6995_v52 = vld [vmem:[%s10911_s1 + $0x2f4] sm:$0xf0] }
 0x104   : > { %3798 = vmatpush.bf16.msrb.mxu3 %v6664_v57  ;;  %v6229_v30 = vld [vmem:[%s10911_s1 + $0xc10] sm:$0xf0]  ;;  %v7316_v35 = vld [vmem:[%s10911_s1 + $0xd04] sm:$0xf]  ;;  %v6632_v41 = vor.u32 %v7384_v21, %v6629_v24  ;;  %v7027_v57 = vld [vmem:[%s10911_s1 + $0x3f4] sm:$0xf0]  ;;  %v5068_v61 = vor.u32 %v6995_v52, %v5067_v51 }
 0x105   : > { %3760 = vmatpush.bf16.msrb.mxu0 %v6264_v3  ;;  %v6357_v36 = vld [vmem:[%s10911_s1 + $0xd10] sm:$0xf0]  ;;  %v7348_v39 = vld [vmem:[%s10911_s1 + $0xe04] sm:$0xf]  ;;  %v6232_v49 = vor.u32 %v7284_v26, %v6229_v30  ;;  %v5196_v1 = vor.u32 %v7027_v57, %v5195_v56  ;;  %v6959_v2 = vld [vmem:[%s10911_s1 + $0x1d4] sm:$0xf0] }
 0x106   : > { %3773 = vmatpush.bf16.msrb.mxu1 %v6392_v6  ;;  %v6485_v42 = vld [vmem:[%s10911_s1 + $0xe10] sm:$0xf0]  ;;  %v7380_v43 = vld [vmem:[%s10911_s1 + $0xf04] sm:$0xf]  ;;  %v6360_v53 = vor.u32 %v7316_v35, %v6357_v36  ;;  %v5051_v3 = vld [vmem:[%s10911_s1 + $0x2c8] sm:$0xf]  ;;  %v4924_v9 = vor.u32 %v6959_v2, %v4923_v0 }
 0x107   : > { %3786 = vmatpush.bf16.msrb.mxu2 %v6520_v7  ;;  %v6613_v54 = vld [vmem:[%s10911_s1 + $0xf10] sm:$0xf0]  ;;  %v6488_v55 = vor.u32 %v7348_v39, %v6485_v42  ;;  %v5179_v6 = vld [vmem:[%s10911_s1 + $0x3c8] sm:$0xf]  ;;  %v7023_v7 = vld [vmem:[%s10911_s1 + $0x3d4] sm:$0xf0]  ;;  %v5052_v10 = vor.u32 %v6991_v4, %v5051_v3 }
 0x108   : > { %3799 = vmatpush.bf16.msrb.mxu3 %v6648_v12  ;;  %v6616_v58 = vor.u32 %v7380_v43, %v6613_v54  ;;  %v4779_v12 = vld [vmem:[%s10911_s1 + $0xa8] sm:$0xf]  ;;  %v6923_v13 = vld [vmem:[%s10911_s1 + $0xb4] sm:$0xf0]  ;;  %v5180_v18 = vor.u32 %v7023_v7, %v5179_v6 }
 0x109   : > { %3761 = vmatpush.bf16.msrb.mxu0 %v6248_v25  ;;  %v4907_v14 = vld [vmem:[%s10911_s1 + $0x1a8] sm:$0xf]  ;;  %v6955_v21 = vld [vmem:[%s10911_s1 + $0x1b4] sm:$0xf0] }
 0x10a   : > { %3774 = vmatpush.bf16.msrb.mxu1 %v6376_v31  ;;  %v5035_v24 = vld [vmem:[%s10911_s1 + $0x2a8] sm:$0xf]  ;;  %v6987_v25 = vld [vmem:[%s10911_s1 + $0x2b4] sm:$0xf0]  ;;  %v4780_v31 = vor.u32 %v6923_v13, %v4779_v12 }
 0x10b   : > { %3787 = vmatpush.bf16.msrb.mxu2 %v6504_v33  ;;  %v5163_v26 = vld [vmem:[%s10911_s1 + $0x3a8] sm:$0xf]  ;;  %v7019_v30 = vld [vmem:[%s10911_s1 + $0x3b4] sm:$0xf0]  ;;  %v4908_v33 = vor.u32 %v6955_v21, %v4907_v14  ;;  %v5036_v35 = vor.u32 %v6987_v25, %v5035_v24 }
 0x10c   : > { %3800 = vmatpush.bf16.msrb.mxu3 %v6632_v41  ;;  %v4763_v36 = vld [vmem:[%s10911_s1 + $0x88] sm:$0xf]  ;;  %v6919_v39 = vld [vmem:[%s10911_s1 + $0x94] sm:$0xf0]  ;;  %v5164_v42 = vor.u32 %v7019_v30, %v5163_v26 }
 0x10d   : > { %3762 = vmatpush.bf16.msrb.mxu0 %v6232_v49  ;;  %v4891_v41 = vld [vmem:[%s10911_s1 + $0x188] sm:$0xf]  ;;  %v6951_v43 = vld [vmem:[%s10911_s1 + $0x194] sm:$0xf0]  ;;  %v4764_v49 = vor.u32 %v6919_v39, %v4763_v36 }
 0x10e   : > { %3775 = vmatpush.bf16.msrb.mxu1 %v6360_v53  ;;  %v5019_v54 = vld [vmem:[%s10911_s1 + $0x288] sm:$0xf]  ;;  %v6983_v44 = vld [vmem:[%s10911_s1 + $0x294] sm:$0xf0]  ;;  %v3569_v50 = vpop.f32.mrf.mxu1  ;;  %v4892_v51 = vor.u32 %v6951_v43, %v4891_v41 }
 0x10f   : > { %3788 = vmatpush.bf16.msrb.mxu2 %v6488_v55  ;;  %v3556_v45 = vpop.f32.mrf.mxu0  ;;  %v5147_v46 = vld [vmem:[%s10911_s1 + $0x388] sm:$0xf]  ;;  %v7015_v47 = vld [vmem:[%s10911_s1 + $0x394] sm:$0xf0]  ;;  %v5020_v52 = vor.u32 %v6983_v44, %v5019_v54 }
 0x110   : > { %3801 = vmatpush.bf16.msrb.mxu3 %v6616_v58  ;;  %3763 = vmatmul.bf16.vlgmr.msrb.gmra.mxu0 %v8385_v11  ;;  %v3557_v48 = vadd.f32 %v3556_v45, %v9102_v5  ;;  %v4747_v53 = vld [vmem:[%s10911_s1 + $0x68] sm:$0xf]  ;;  %v6915_v55 = vld [vmem:[%s10911_s1 + $0x74] sm:$0xf0]  ;;  %v5148_v5 = vor.u32 %v7015_v47, %v5147_v46 }
 0x111   : > { %3807 = vmatpush.bf16.msra.mxu0 %v4812_v59  ;;  %3776 = vmatmul.bf16.vlgmr.msrb.gmra.mxu1 %v8398_v17  ;;  %v4875_v56 = vld [vmem:[%s10911_s1 + $0x168] sm:$0xf]  ;;  %v6947_v58 = vld [vmem:[%s10911_s1 + $0x174] sm:$0xf0]  ;;  %v4748_v63 = vor.u32 %v6915_v55, %v4747_v53 }
 0x112   : > { %3820 = vmatpush.bf16.msra.mxu1 %v4940_v60  ;;  %3789 = vmatmul.bf16.vlgmr.msrb.gmra.mxu2 %v8396_v16  ;;  %v3570_v57 = vadd.f32 %v3569_v50, %v3557_v48  ;;  %v5003_v59 = vld [vmem:[%s10911_s1 + $0x268] sm:$0xf]  ;;  %v6979_v60 = vld [vmem:[%s10911_s1 + $0x274] sm:$0xf0]  ;;  %v4876_v0 = vor.u32 %v6947_v58, %v4875_v56 }
 0x113   : > { %3833 = vmatpush.bf16.msra.mxu2 %v5068_v61  ;;  %3802 = vmatmul.bf16.vlgmr.msrb.gmra.mxu3 %v8406_v22  ;;  %v5131_v61 = vld [vmem:[%s10911_s1 + $0x368] sm:$0xf]  ;;  %v7011_v62 = vld [vmem:[%s10911_s1 + $0x374] sm:$0xf0] }
 0x114   : > { %3846 = vmatpush.bf16.msra.mxu3 %v5196_v1  ;;  %v5004_v1 = vor.u32 %v6979_v60, %v5003_v59  ;;  %v4731_v2 = vld [vmem:[%s10911_s1 + $0x48] sm:$0xf]  ;;  %v6911_v3 = vld [vmem:[%s10911_s1 + $0x54] sm:$0xf0]  ;;  %v5132_v6 = vor.u32 %v7011_v62, %v5131_v61 }
 0x115   : > { %3808 = vmatpush.bf16.msra.mxu0 %v4796_v8  ;;  %v4859_v4 = vld [vmem:[%s10911_s1 + $0x148] sm:$0xf]  ;;  %v6943_v8 = vld [vmem:[%s10911_s1 + $0x154] sm:$0xf0]  ;;  %v4732_v24 = vor.u32 %v6911_v3, %v4731_v2 }
 0x116   : > { %3821 = vmatpush.bf16.msra.mxu1 %v4924_v9  ;;  %v4987_v9 = vld [vmem:[%s10911_s1 + $0x248] sm:$0xf]  ;;  %v3595_v13 = vpop.f32.mrf.mxu3  ;;  %v3571_v25 = vpop.f32.mrf.mxu1  ;;  %v4860_v30 = vor.u32 %v6943_v8, %v4859_v4  ;;  %v6939_v41 = vld [vmem:[%s10911_s1 + $0x134] sm:$0xf0] }
 0x117   : > { %3834 = vmatpush.bf16.msra.mxu2 %v5052_v10  ;;  %v3582_v7 = vpop.f32.mrf.mxu2  ;;  %v6975_v10 = vld [vmem:[%s10911_s1 + $0x254] sm:$0xf0]  ;;  %v5115_v14 = vld [vmem:[%s10911_s1 + $0x348] sm:$0xf]  ;;  %v3558_v21 = vpop.f32.mrf.mxu0 }
 0x118   : > { %3847 = vmatpush.bf16.msra.mxu3 %v5180_v18  ;;  %v3583_v12 = vadd.f32 %v3582_v7, %v3570_v57  ;;  %v7007_v18 = vld [vmem:[%s10911_s1 + $0x354] sm:$0xf0]  ;;  %v4843_v36 = vld [vmem:[%s10911_s1 + $0x128] sm:$0xf] }
 0x119   : > { %3809 = vmatpush.bf16.msra.mxu0 %v4780_v31  ;;  %v4988_v31 = vor.u32 %v6975_v10, %v4987_v9  ;;  %v5116_v39 = vor.u32 %v7007_v18, %v5115_v14  ;;  %v6971_v43 = vld [vmem:[%s10911_s1 + $0x234] sm:$0xf0]  ;;  %v5099_v54 = vld [vmem:[%s10911_s1 + $0x328] sm:$0xf]  ;;  %v4844_v48 = vor.u32 %v6939_v41, %v4843_v36 }
 0x11a   : > { %3822 = vmatpush.bf16.msra.mxu1 %v4908_v33  ;;  %v9301_v26 = vadd.f32 %v3595_v13, %v3583_v12  ;;  %v4715_v33 = vld [vmem:[%s10911_s1 + $0x28] sm:$0xf]  ;;  %v7003_v44 = vld [vmem:[%s10911_s1 + $0x334] sm:$0xf0] }
 0x11b   : > { %3835 = vmatpush.bf16.msra.mxu2 %v5036_v35  ;;  %v6907_v35 = vld [vmem:[%s10911_s1 + $0x34] sm:$0xf0]  ;;  %v4699_v46 = vld [vmem:[%s10911_s1 + $0x8] sm:$0xf]  ;;  %v5100_v53 = vor.u32 %v7003_v44, %v5099_v54 }
 0x11c   : > { %3848 = vmatpush.bf16.msra.mxu3 %v5164_v42  ;;  %v4971_v42 = vld [vmem:[%s10911_s1 + $0x228] sm:$0xf]  ;;  %v4716_v45 = vor.u32 %v6907_v35, %v4715_v33  ;;  %v6903_v47 = vld [vmem:[%s10911_s1 + $0x14] sm:$0xf0] }
 0x11d   : > { %3810 = vmatpush.bf16.msra.mxu0 %v4764_v49  ;;  %v4972_v49 = vor.u32 %v6971_v43, %v4971_v42  ;;  %v4827_v50 = vld [vmem:[%s10911_s1 + $0x108] sm:$0xf]  ;;  %v6967_v55 = vld [vmem:[%s10911_s1 + $0x214] sm:$0xf0]  ;;  %v4700_v62 = vor.u32 %v6903_v47, %v4699_v46 }
 0x11e   : > { %3823 = vmatpush.bf16.msra.mxu1 %v4892_v51  ;;  %v6935_v51 = vld [vmem:[%s10911_s1 + $0x114] sm:$0xf0]  ;;  %v5083_v56 = vld [vmem:[%s10911_s1 + $0x308] sm:$0xf]  ;;  %v3597_v61 = vpop.f32.mrf.mxu3 }
 0x11f   : > { %3836 = vmatpush.bf16.msra.mxu2 %v5020_v52  ;;  %v4955_v52 = vld [vmem:[%s10911_s1 + $0x208] sm:$0xf]  ;;  %v3584_v57 = vpop.f32.mrf.mxu2  ;;  %v7059_v59 = vld [vmem:[%s10911_s1 + $0x4f4] sm:$0xf0]  ;;  %v4828_v2 = vor.u32 %v6935_v51, %v4827_v50 }
 0x120   : > { %3849 = vmatpush.bf16.msra.mxu3 %v5148_v5  ;;  %v6999_v5 = vld [vmem:[%s10911_s1 + $0x314] sm:$0xf0]  ;;  %v5323_v58 = vld [vmem:[%s10911_s1 + $0x4e8] sm:$0xf]  ;;  %v4956_v3 = vor.u32 %v6967_v55, %v4955_v52  ;;  %v7462_v55 = vld [vmem:[%s10912_s2] sm:$0xf] }
 0x121   : > { %3811 = vmatpush.bf16.msra.mxu0 %v4748_v63  ;;  %v5451_v60 = vld [vmem:[%s10911_s1 + $0x5e8] sm:$0xf]  ;;  %v7091_v63 = vld [vmem:[%s10911_s1 + $0x5f4] sm:$0xf0]  ;;  %v5084_v7 = vor.u32 %v6999_v5, %v5083_v56  ;;  %v5324_v8 = vor.u32 %v7059_v59, %v5323_v58  ;;  %v824_v56 = vperm.slane %v7462_v55, 1 }
 0x122   : > { %3824 = vmatpush.bf16.msra.mxu1 %v4876_v0  ;;  %v5579_v0 = vld [vmem:[%s10911_s1 + $0x6e8] sm:$0xf]  ;;  %v5452_v9 = vor.u32 %v7091_v63, %v5451_v60  ;;  %v7055_v13 = vld [vmem:[%s10911_s1 + $0x4d4] sm:$0xf0] }
 0x123   : > { %3837 = vmatpush.bf16.msra.mxu2 %v5004_v1  ;;  %v7123_v1 = vld [vmem:[%s10911_s1 + $0x6f4] sm:$0xf0]  ;;  %v5707_v4 = vld [vmem:[%s10911_s1 + $0x7e8] sm:$0xf] }
 0x124   : > { %3850 = vmatpush.bf16.msra.mxu3 %v5132_v6  ;;  %v7155_v6 = vld [vmem:[%s10911_s1 + $0x7f4] sm:$0xf0]  ;;  %v5580_v10 = vor.u32 %v7123_v1, %v5579_v0  ;;  %v5307_v12 = vld [vmem:[%s10911_s1 + $0x4c8] sm:$0xf] }
 0x125   : > { %3812 = vmatpush.bf16.msra.mxu0 %v4732_v24  ;;  %v5435_v14 = vld [vmem:[%s10911_s1 + $0x5c8] sm:$0xf]  ;;  %v5708_v18 = vor.u32 %v7155_v6, %v5707_v4  ;;  %v7087_v21 = vld [vmem:[%s10911_s1 + $0x5d4] sm:$0xf0]  ;;  %v5308_v33 = vor.u32 %v7055_v13, %v5307_v12 }
 0x126   : > { %3825 = vmatpush.bf16.msra.mxu1 %v4860_v30  ;;  %v5563_v24 = vld [vmem:[%s10911_s1 + $0x6c8] sm:$0xf]  ;;  %v7119_v25 = vld [vmem:[%s10911_s1 + $0x6d4] sm:$0xf0]  ;;  %v5436_v35 = vor.u32 %v7087_v21, %v5435_v14 }
 0x127   : > { %3838 = vmatpush.bf16.msra.mxu2 %v4988_v31  ;;  %v5691_v30 = vld [vmem:[%s10911_s1 + $0x7c8] sm:$0xf]  ;;  %v7151_v31 = vld [vmem:[%s10911_s1 + $0x7d4] sm:$0xf0]  ;;  %v5564_v36 = vor.u32 %v7119_v25, %v5563_v24 }
 0x128   : > { %3851 = vmatpush.bf16.msra.mxu3 %v5116_v39  ;;  %v5291_v39 = vld [vmem:[%s10911_s1 + $0x4a8] sm:$0xf]  ;;  %v7051_v41 = vld [vmem:[%s10911_s1 + $0x4b4] sm:$0xf0]  ;;  %v5692_v43 = vor.u32 %v7151_v31, %v5691_v30 }
 0x129   : > { %3813 = vmatpush.bf16.msra.mxu0 %v4716_v45  ;;  %v5419_v42 = vld [vmem:[%s10911_s1 + $0x5a8] sm:$0xf]  ;;  %v7083_v54 = vld [vmem:[%s10911_s1 + $0x5b4] sm:$0xf0] }
 0x12a   : > { %3826 = vmatpush.bf16.msra.mxu1 %v4844_v48  ;;  %v5547_v44 = vld [vmem:[%s10911_s1 + $0x6a8] sm:$0xf]  ;;  %v7115_v45 = vld [vmem:[%s10911_s1 + $0x6b4] sm:$0xf0]  ;;  %v5292_v48 = vor.u32 %v7051_v41, %v5291_v39  ;;  %v5420_v50 = vor.u32 %v7083_v54, %v5419_v42 }
 0x12b   : > { %3839 = vmatpush.bf16.msra.mxu2 %v4972_v49  ;;  %v5675_v46 = vld [vmem:[%s10911_s1 + $0x7a8] sm:$0xf]  ;;  %v7147_v47 = vld [vmem:[%s10911_s1 + $0x7b4] sm:$0xf0]  ;;  %v5548_v51 = vor.u32 %v7115_v45, %v5547_v44 }
 0x12c   : > { %3852 = vmatpush.bf16.msra.mxu3 %v5100_v53  ;;  %v5275_v49 = vld [vmem:[%s10911_s1 + $0x488] sm:$0xf]  ;;  %v7047_v52 = vld [vmem:[%s10911_s1 + $0x494] sm:$0xf0]  ;;  %v5676_v5 = vor.u32 %v7147_v47, %v5675_v46 }
 0x12d   : > { %3814 = vmatpush.bf16.msra.mxu0 %v4700_v62  ;;  %v5403_v53 = vld [vmem:[%s10911_s1 + $0x588] sm:$0xf]  ;;  %v7079_v57 = vld [vmem:[%s10911_s1 + $0x594] sm:$0xf0]  ;;  %v5276_v62 = vor.u32 %v7047_v52, %v5275_v49  ;;  %v3608_v63 = vpop.f32.mrf.mxu0 }
 0x12e   : > { %3827 = vmatpush.bf16.msra.mxu1 %v4828_v2  ;;  %v5531_v58 = vld [vmem:[%s10911_s1 + $0x688] sm:$0xf]  ;;  %v7111_v59 = vld [vmem:[%s10911_s1 + $0x694] sm:$0xf0]  ;;  %v5404_v0 = vor.u32 %v7079_v57, %v5403_v53  ;;  %v3609_v6 = vadd.f32 %v3608_v63, %v824_v56 }
 0x12f   : > { %3840 = vmatpush.bf16.msra.mxu2 %v4956_v3  ;;  %v5659_v60 = vld [vmem:[%s10911_s1 + $0x788] sm:$0xf]  ;;  %v7143_v61 = vld [vmem:[%s10911_s1 + $0x794] sm:$0xf0]  ;;  %v5532_v1 = vor.u32 %v7111_v59, %v5531_v58 }
 0x130   : > { %3853 = vmatpush.bf16.msra.mxu3 %v5084_v7  ;;  %3815 = vmatmul.bf16.vlgmr.msra.gmra.mxu0 %v7849_v28  ;;  %v5259_v2 = vld [vmem:[%s10911_s1 + $0x468] sm:$0xf]  ;;  %v7043_v3 = vld [vmem:[%s10911_s1 + $0x474] sm:$0xf0]  ;;  %v3621_v7 = vpop.f32.mrf.mxu1 }
 0x131   : > { %3859 = vmatpush.bf16.msrb.mxu0 %v5324_v8  ;;  %3828 = vmatmul.bf16.vlgmr.msra.gmra.mxu1 %v7854_v32  ;;  %v5387_v4 = vld [vmem:[%s10911_s1 + $0x568] sm:$0xf]  ;;  %v5660_v8 = vor.u32 %v7143_v61, %v5659_v60  ;;  %v7107_v12 = vld [vmem:[%s10911_s1 + $0x674] sm:$0xf0]  ;;  %v5260_v21 = vor.u32 %v7043_v3, %v5259_v2 }
 0x132   : > { %3872 = vmatpush.bf16.msrb.mxu1 %v5452_v9  ;;  %3841 = vmatmul.bf16.vlgmr.msra.gmra.mxu2 %v7847_v27  ;;  %v7075_v9 = vld [vmem:[%s10911_s1 + $0x574] sm:$0xf0]  ;;  %v5643_v13 = vld [vmem:[%s10911_s1 + $0x768] sm:$0xf] }
 0x133   : > { %3885 = vmatpush.bf16.msrb.mxu2 %v5580_v10  ;;  %3854 = vmatmul.bf16.vlgmr.msra.gmra.mxu3 %v7851_v29  ;;  %v5515_v10 = vld [vmem:[%s10911_s1 + $0x668] sm:$0xf]  ;;  %v7139_v14 = vld [vmem:[%s10911_s1 + $0x774] sm:$0xf0]  ;;  %v5388_v24 = vor.u32 %v7075_v9, %v5387_v4 }
 0x134   : > { %3898 = vmatpush.bf16.msrb.mxu3 %v5708_v18  ;;  %v3622_v18 = vadd.f32 %v3621_v7, %v3609_v6  ;;  %v5516_v25 = vor.u32 %v7107_v12, %v5515_v10  ;;  %v5243_v30 = vld [vmem:[%s10911_s1 + $0x448] sm:$0xf]  ;;  %v7039_v31 = vld [vmem:[%s10911_s1 + $0x454] sm:$0xf0] }
 0x135   : > { %3860 = vmatpush.bf16.msrb.mxu0 %v5308_v33  ;;  %v5371_v33 = vld [vmem:[%s10911_s1 + $0x548] sm:$0xf]  ;;  %v7071_v39 = vld [vmem:[%s10911_s1 + $0x554] sm:$0xf0]  ;;  %v5244_v46 = vor.u32 %v7039_v31, %v5243_v30 }
 0x136   : > { %3873 = vmatpush.bf16.msrb.mxu1 %v5436_v35  ;;  %v3634_v35 = vpop.f32.mrf.mxu2  ;;  %v5499_v41 = vld [vmem:[%s10911_s1 + $0x648] sm:$0xf]  ;;  %v7103_v42 = vld [vmem:[%s10911_s1 + $0x654] sm:$0xf0]  ;;  %v3647_v54 = vpop.f32.mrf.mxu3  ;;  %v5372_v49 = vor.u32 %v7071_v39, %v5371_v33 }
 0x137   : > { %3886 = vmatpush.bf16.msrb.mxu2 %v5564_v36  ;;  %v5644_v36 = vor.u32 %v7139_v14, %v5643_v13  ;;  %v5627_v44 = vld [vmem:[%s10911_s1 + $0x748] sm:$0xf]  ;;  %v7135_v45 = vld [vmem:[%s10911_s1 + $0x754] sm:$0xf0] }
 0x138   : > { %3899 = vmatpush.bf16.msrb.mxu3 %v5692_v43  ;;  %v3635_v43 = vadd.f32 %v3634_v35, %v3622_v18  ;;  %v7035_v52 = vld [vmem:[%s10911_s1 + $0x434] sm:$0xf0]  ;;  %v5355_v53 = vld [vmem:[%s10911_s1 + $0x528] sm:$0xf]  ;;  %v3623_v55 = vpop.f32.mrf.mxu1  ;;  %v5628_v56 = vor.u32 %v7135_v45, %v5627_v44 }
 0x139   : > { %3861 = vmatpush.bf16.msrb.mxu0 %v5292_v48  ;;  %v3610_v48 = vpop.f32.mrf.mxu0  ;;  %v5483_v57 = vld [vmem:[%s10911_s1 + $0x628] sm:$0xf]  ;;  %v7099_v58 = vld [vmem:[%s10911_s1 + $0x634] sm:$0xf0] }
 0x13a   : > { %3874 = vmatpush.bf16.msrb.mxu1 %v5420_v50  ;;  %v9502_v47 = vadd.f32 %v3647_v54, %v3635_v43  ;;  %v5500_v50 = vor.u32 %v7103_v42, %v5499_v41  ;;  %v5611_v59 = vld [vmem:[%s10911_s1 + $0x728] sm:$0xf]  ;;  %v7131_v60 = vld [vmem:[%s10911_s1 + $0x734] sm:$0xf0] }
 0x13b   : > { %3887 = vmatpush.bf16.msrb.mxu2 %v5548_v51  ;;  %v5227_v51 = vld [vmem:[%s10911_s1 + $0x428] sm:$0xf]  ;;  %v7031_v63 = vld [vmem:[%s10911_s1 + $0x414] sm:$0xf0]  ;;  %v5612_v7 = vor.u32 %v7131_v60, %v5611_v59 }
 0x13c   : > { %3900 = vmatpush.bf16.msrb.mxu3 %v5676_v5  ;;  %v7067_v5 = vld [vmem:[%s10911_s1 + $0x534] sm:$0xf0]  ;;  %v5228_v61 = vor.u32 %v7035_v52, %v5227_v51  ;;  %v5339_v2 = vld [vmem:[%s10911_s1 + $0x508] sm:$0xf] }
 0x13d   : > { %3862 = vmatpush.bf16.msrb.mxu0 %v5276_v62  ;;  %v5211_v62 = vld [vmem:[%s10911_s1 + $0x408] sm:$0xf]  ;;  %v7063_v3 = vld [vmem:[%s10911_s1 + $0x514] sm:$0xf0] }
 0x13e   : > { %3875 = vmatpush.bf16.msrb.mxu1 %v5404_v0  ;;  %v5356_v0 = vor.u32 %v7067_v5, %v5355_v53  ;;  %v5467_v4 = vld [vmem:[%s10911_s1 + $0x608] sm:$0xf]  ;;  %v3636_v6 = vpop.f32.mrf.mxu2  ;;  %v7127_v10 = vld [vmem:[%s10911_s1 + $0x714] sm:$0xf0]  ;;  %v3649_v12 = vpop.f32.mrf.mxu3  ;;  %v5340_v31 = vor.u32 %v7063_v3, %v5339_v2 }
 0x13f   : > { %3888 = vmatpush.bf16.msrb.mxu2 %v5532_v1  ;;  %v5484_v1 = vor.u32 %v7099_v58, %v5483_v57  ;;  %v5595_v9 = vld [vmem:[%s10911_s1 + $0x708] sm:$0xf]  ;;  %v7187_v14 = vld [vmem:[%s10911_s1 + $0x8f4] sm:$0xf0] }
 0x140   : > { %3901 = vmatpush.bf16.msrb.mxu3 %v5660_v8  ;;  %v7095_v8 = vld [vmem:[%s10911_s1 + $0x614] sm:$0xf0]  ;;  %v5835_v13 = vld [vmem:[%s10911_s1 + $0x8e8] sm:$0xf]  ;;  %v5596_v39 = vor.u32 %v7127_v10, %v5595_v9 }
 0x141   : > { %3863 = vmatpush.bf16.msrb.mxu0 %v5260_v21  ;;  %v5963_v18 = vld [vmem:[%s10911_s1 + $0x9e8] sm:$0xf]  ;;  %v5212_v21 = vor.u32 %v7031_v63, %v5211_v62  ;;  %v7251_v30 = vld [vmem:[%s10911_s1 + $0xaf4] sm:$0xf0]  ;;  %v5468_v33 = vor.u32 %v7095_v8, %v5467_v4  ;;  %v5836_v41 = vor.u32 %v7187_v14, %v5835_v13 }
 0x142   : > { %3876 = vmatpush.bf16.msrb.mxu1 %v5388_v24  ;;  %v7219_v24 = vld [vmem:[%s10911_s1 + $0x9f4] sm:$0xf0]  ;;  %v6219_v35 = vld [vmem:[%s10911_s1 + $0xbe8] sm:$0xf] }
 0x143   : > { %3889 = vmatpush.bf16.msrb.mxu2 %v5516_v25  ;;  %v6091_v25 = vld [vmem:[%s10911_s1 + $0xae8] sm:$0xf]  ;;  %v5964_v42 = vor.u32 %v7219_v24, %v5963_v18  ;;  %v7183_v44 = vld [vmem:[%s10911_s1 + $0x8d4] sm:$0xf0] }
 0x144   : > { %3902 = vmatpush.bf16.msrb.mxu3 %v5644_v36  ;;  %v7283_v36 = vld [vmem:[%s10911_s1 + $0xbf4] sm:$0xf0]  ;;  %v6092_v43 = vor.u32 %v7251_v30, %v6091_v25  ;;  %v5819_v54 = vld [vmem:[%s10911_s1 + $0x8c8] sm:$0xf] }
 0x145   : > { %3864 = vmatpush.bf16.msrb.mxu0 %v5244_v46  ;;  %v5947_v45 = vld [vmem:[%s10911_s1 + $0x9c8] sm:$0xf]  ;;  %v6220_v46 = vor.u32 %v7283_v36, %v6219_v35  ;;  %v7215_v48 = vld [vmem:[%s10911_s1 + $0x9d4] sm:$0xf0]  ;;  %v5820_v53 = vor.u32 %v7183_v44, %v5819_v54 }
 0x146   : > { %3877 = vmatpush.bf16.msrb.mxu1 %v5372_v49  ;;  %v6075_v49 = vld [vmem:[%s10911_s1 + $0xac8] sm:$0xf]  ;;  %v7279_v52 = vld [vmem:[%s10911_s1 + $0xbd4] sm:$0xf0]  ;;  %v5948_v55 = vor.u32 %v7215_v48, %v5947_v45 }
 0x147   : > { %3890 = vmatpush.bf16.msrb.mxu2 %v5500_v50  ;;  %v7247_v50 = vld [vmem:[%s10911_s1 + $0xad4] sm:$0xf0]  ;;  %v6203_v51 = vld [vmem:[%s10911_s1 + $0xbc8] sm:$0xf] }
 0x148   : > { %3903 = vmatpush.bf16.msrb.mxu3 %v5628_v56  ;;  %v6076_v56 = vor.u32 %v7247_v50, %v6075_v49  ;;  %v5803_v5 = vld [vmem:[%s10911_s1 + $0x8a8] sm:$0xf]  ;;  %v7179_v57 = vld [vmem:[%s10911_s1 + $0x8b4] sm:$0xf0]  ;;  %v6204_v59 = vor.u32 %v7279_v52, %v6203_v51 }
 0x149   : > { %3865 = vmatpush.bf16.msrb.mxu0 %v5228_v61  ;;  %v5931_v58 = vld [vmem:[%s10911_s1 + $0x9a8] sm:$0xf]  ;;  %v7211_v60 = vld [vmem:[%s10911_s1 + $0x9b4] sm:$0xf0] }
 0x14a   : > { %3878 = vmatpush.bf16.msrb.mxu1 %v5356_v0  ;;  %v6059_v61 = vld [vmem:[%s10911_s1 + $0xaa8] sm:$0xf]  ;;  %v7243_v62 = vld [vmem:[%s10911_s1 + $0xab4] sm:$0xf0]  ;;  %v5932_v2 = vor.u32 %v7211_v60, %v5931_v58 }
 0x14b   : > { %3891 = vmatpush.bf16.msrb.mxu2 %v5484_v1  ;;  %v6187_v63 = vld [vmem:[%s10911_s1 + $0xba8] sm:$0xf]  ;;  %v7275_v0 = vld [vmem:[%s10911_s1 + $0xbb4] sm:$0xf0]  ;;  %v5804_v1 = vor.u32 %v7179_v57, %v5803_v5  ;;  %v6060_v3 = vor.u32 %v7243_v62, %v6059_v61 }
 0x14c   : > { %3904 = vmatpush.bf16.msrb.mxu3 %v5612_v7  ;;  %v5787_v4 = vld [vmem:[%s10911_s1 + $0x888] sm:$0xf]  ;;  %v7175_v6 = vld [vmem:[%s10911_s1 + $0x894] sm:$0xf0]  ;;  %v6188_v8 = vor.u32 %v7275_v0, %v6187_v63 }
 0x14d   : > { %3866 = vmatpush.bf16.msrb.mxu0 %v5212_v21  ;;  %v5915_v7 = vld [vmem:[%s10911_s1 + $0x988] sm:$0xf]  ;;  %v7207_v9 = vld [vmem:[%s10911_s1 + $0x994] sm:$0xf0]  ;;  %v5788_v18 = vor.u32 %v7175_v6, %v5787_v4  ;;  %v3660_v21 = vpop.f32.mrf.mxu0 }
 0x14e   : > { %3879 = vmatpush.bf16.msrb.mxu1 %v5340_v31  ;;  %v6043_v10 = vld [vmem:[%s10911_s1 + $0xa88] sm:$0xf]  ;;  %v7239_v12 = vld [vmem:[%s10911_s1 + $0xa94] sm:$0xf0]  ;;  %v5916_v24 = vor.u32 %v7207_v9, %v5915_v7  ;;  %v3661_v35 = vadd.f32 %v3660_v21, %v9502_v47  ;;  %v3673_v36 = vpop.f32.mrf.mxu1 }
 0x14f   : > { %3892 = vmatpush.bf16.msrb.mxu2 %v5468_v33  ;;  %v6171_v13 = vld [vmem:[%s10911_s1 + $0xb88] sm:$0xf]  ;;  %v7271_v14 = vld [vmem:[%s10911_s1 + $0xb94] sm:$0xf0]  ;;  %v6044_v25 = vor.u32 %v7239_v12, %v6043_v10 }
 0x150   : > { %3905 = vmatpush.bf16.msrb.mxu3 %v5596_v39  ;;  %3867 = vmatmul.bf16.vlgmr.msrb.gmra.mxu0 %v7986_v37  ;;  %v5771_v30 = vld [vmem:[%s10911_s1 + $0x868] sm:$0xf]  ;;  %v7171_v31 = vld [vmem:[%s10911_s1 + $0x874] sm:$0xf0]  ;;  %v6172_v39 = vor.u32 %v7271_v14, %v6171_v13  ;;  %v3674_v44 = vadd.f32 %v3673_v36, %v3661_v35 }
 0x151   : > { %3911 = vmatpush.bf16.msra.mxu0 %v5836_v41  ;;  %3880 = vmatmul.bf16.vlgmr.msrb.gmra.mxu1 %v7990_v40  ;;  %v5899_v33 = vld [vmem:[%s10911_s1 + $0x968] sm:$0xf]  ;;  %v7203_v41 = vld [vmem:[%s10911_s1 + $0x974] sm:$0xf0]  ;;  %v5772_v45 = vor.u32 %v7171_v31, %v5771_v30 }
 0x152   : > { %3924 = vmatpush.bf16.msra.mxu1 %v5964_v42  ;;  %3893 = vmatmul.bf16.vlgmr.msrb.gmra.mxu2 %v7978_v34  ;;  %v6027_v42 = vld [vmem:[%s10911_s1 + $0xa68] sm:$0xf]  ;;  %v7267_v47 = vld [vmem:[%s10911_s1 + $0xb74] sm:$0xf0] }
 0x153   : > { %3937 = vmatpush.bf16.msra.mxu2 %v6092_v43  ;;  %3906 = vmatmul.bf16.vlgmr.msrb.gmra.mxu3 %v7988_v38  ;;  %v7235_v43 = vld [vmem:[%s10911_s1 + $0xa74] sm:$0xf0]  ;;  %v6155_v54 = vld [vmem:[%s10911_s1 + $0xb68] sm:$0xf] }
 0x154   : > { %3950 = vmatpush.bf16.msra.mxu3 %v6220_v46  ;;  %v5900_v46 = vor.u32 %v7203_v41, %v5899_v33  ;;  %v6028_v48 = vor.u32 %v7235_v43, %v6027_v42  ;;  %v5755_v49 = vld [vmem:[%s10911_s1 + $0x848] sm:$0xf]  ;;  %v7167_v50 = vld [vmem:[%s10911_s1 + $0x854] sm:$0xf0] }
 0x155   : > { %3912 = vmatpush.bf16.msra.mxu0 %v5820_v53  ;;  %v5883_v51 = vld [vmem:[%s10911_s1 + $0x948] sm:$0xf]  ;;  %v3686_v52 = vpop.f32.mrf.mxu2  ;;  %v6156_v53 = vor.u32 %v7267_v47, %v6155_v54  ;;  %v7231_v5 = vld [vmem:[%s10911_s1 + $0xa54] sm:$0xf0]  ;;  %v5756_v61 = vor.u32 %v7167_v50, %v5755_v49  ;;  %v3662_v63 = vpop.f32.mrf.mxu0 }
 0x156   : > { %3925 = vmatpush.bf16.msra.mxu1 %v5948_v55  ;;  %v7199_v55 = vld [vmem:[%s10911_s1 + $0x954] sm:$0xf0]  ;;  %v3687_v57 = vadd.f32 %v3686_v52, %v3674_v44  ;;  %v3699_v58 = vpop.f32.mrf.mxu3  ;;  %v5867_v4 = vld [vmem:[%s10911_s1 + $0x928] sm:$0xf]  ;;  %v3675_v6 = vpop.f32.mrf.mxu1 }
 0x157   : > { %3938 = vmatpush.bf16.msra.mxu2 %v6076_v56  ;;  %v6011_v56 = vld [vmem:[%s10911_s1 + $0xa48] sm:$0xf]  ;;  %v7263_v60 = vld [vmem:[%s10911_s1 + $0xb54] sm:$0xf0]  ;;  %v5884_v0 = vor.u32 %v7199_v55, %v5883_v51 }
 0x158   : > { %3951 = vmatpush.bf16.msra.mxu3 %v6204_v59  ;;  %v6139_v59 = vld [vmem:[%s10911_s1 + $0xb48] sm:$0xf]  ;;  %v9701_v62 = vadd.f32 %v3699_v58, %v3687_v57  ;;  %v7227_v10 = vld [vmem:[%s10911_s1 + $0xa34] sm:$0xf0] }
 0x159   : > { %3913 = vmatpush.bf16.msra.mxu0 %v5804_v1  ;;  %v6012_v1 = vor.u32 %v7231_v5, %v6011_v56  ;;  %v6140_v7 = vor.u32 %v7263_v60, %v6139_v59  ;;  %v5995_v9 = vld [vmem:[%s10911_s1 + $0xa28] sm:$0xf]  ;;  %v7259_v13 = vld [vmem:[%s10911_s1 + $0xb34] sm:$0xf0] }
 0x15a   : > { %3926 = vmatpush.bf16.msra.mxu1 %v5932_v2  ;;  %v5739_v2 = vld [vmem:[%s10911_s1 + $0x828] sm:$0xf]  ;;  %v7159_v21 = vld [vmem:[%s10911_s1 + $0x814] sm:$0xf0] }
 0x15b   : > { %3939 = vmatpush.bf16.msra.mxu2 %v6060_v3  ;;  %v7163_v3 = vld [vmem:[%s10911_s1 + $0x834] sm:$0xf0]  ;;  %v6123_v12 = vld [vmem:[%s10911_s1 + $0xb28] sm:$0xf] }
 0x15c   : > { %3952 = vmatpush.bf16.msra.mxu3 %v6188_v8  ;;  %v7195_v8 = vld [vmem:[%s10911_s1 + $0x934] sm:$0xf0]  ;;  %v5740_v14 = vor.u32 %v7163_v3, %v5739_v2  ;;  %v5851_v30 = vld [vmem:[%s10911_s1 + $0x908] sm:$0xf]  ;;  %v6124_v36 = vor.u32 %v7259_v13, %v6123_v12 }
 0x15d   : > { %3914 = vmatpush.bf16.msra.mxu0 %v5788_v18  ;;  %v5723_v18 = vld [vmem:[%s10911_s1 + $0x808] sm:$0xf]  ;;  %v7191_v31 = vld [vmem:[%s10911_s1 + $0x914] sm:$0xf0]  ;;  %v3688_v35 = vpop.f32.mrf.mxu2 }
 0x15e   : > { %3927 = vmatpush.bf16.msra.mxu1 %v5916_v24  ;;  %v5868_v24 = vor.u32 %v7195_v8, %v5867_v4  ;;  %v5979_v33 = vld [vmem:[%s10911_s1 + $0xa08] sm:$0xf]  ;;  %v7255_v42 = vld [vmem:[%s10911_s1 + $0xb14] sm:$0xf0]  ;;  %v3701_v43 = vpop.f32.mrf.mxu3  ;;  %v5852_v50 = vor.u32 %v7191_v31, %v5851_v30 }
 0x15f   : > { %3940 = vmatpush.bf16.msra.mxu2 %v6044_v25  ;;  %v5996_v25 = vor.u32 %v7227_v10, %v5995_v9  ;;  %v6107_v41 = vld [vmem:[%s10911_s1 + $0xb08] sm:$0xf]  ;;  %v7315_v47 = vld [vmem:[%s10911_s1 + $0xcf4] sm:$0xf0] }
 0x160   : > { %3953 = vmatpush.bf16.msra.mxu3 %v6172_v39  ;;  %v7223_v39 = vld [vmem:[%s10911_s1 + $0xa14] sm:$0xf0]  ;;  %v6347_v54 = vld [vmem:[%s10911_s1 + $0xce8] sm:$0xf]  ;;  %v6108_v55 = vor.u32 %v7255_v42, %v6107_v41 }
 0x161   : > { %3915 = vmatpush.bf16.msra.mxu0 %v5772_v45  ;;  %v6475_v44 = vld [vmem:[%s10911_s1 + $0xde8] sm:$0xf]  ;;  %v5724_v45 = vor.u32 %v7159_v21, %v5723_v18  ;;  %v7379_v49 = vld [vmem:[%s10911_s1 + $0xef4] sm:$0xf0]  ;;  %v5980_v51 = vor.u32 %v7223_v39, %v5979_v33  ;;  %v6348_v56 = vor.u32 %v7315_v47, %v6347_v54 }
 0x162   : > { %3928 = vmatpush.bf16.msra.mxu1 %v5900_v46  ;;  %v7347_v46 = vld [vmem:[%s10911_s1 + $0xdf4] sm:$0xf0]  ;;  %v6731_v52 = vld [vmem:[%s10911_s1 + $0xfe8] sm:$0xf] }
 0x163   : > { %3941 = vmatpush.bf16.msra.mxu2 %v6028_v48  ;;  %v6603_v48 = vld [vmem:[%s10911_s1 + $0xee8] sm:$0xf]  ;;  %v6476_v5 = vor.u32 %v7347_v46, %v6475_v44  ;;  %v7311_v59 = vld [vmem:[%s10911_s1 + $0xcd4] sm:$0xf0] }
 0x164   : > { %3954 = vmatpush.bf16.msra.mxu3 %v6156_v53  ;;  %v7411_v53 = vld [vmem:[%s10911_s1 + $0xff4] sm:$0xf0]  ;;  %v6604_v57 = vor.u32 %v7379_v49, %v6603_v48  ;;  %v6331_v58 = vld [vmem:[%s10911_s1 + $0xcc8] sm:$0xf] }
 0x165   : > { %3916 = vmatpush.bf16.msra.mxu0 %v5756_v61  ;;  %v6459_v60 = vld [vmem:[%s10911_s1 + $0xdc8] sm:$0xf]  ;;  %v6732_v61 = vor.u32 %v7411_v53, %v6731_v52  ;;  %v7343_v63 = vld [vmem:[%s10911_s1 + $0xdd4] sm:$0xf0]  ;;  %v6332_v4 = vor.u32 %v7311_v59, %v6331_v58 }
 0x166   : > { %3929 = vmatpush.bf16.msra.mxu1 %v5884_v0  ;;  %v6587_v0 = vld [vmem:[%s10911_s1 + $0xec8] sm:$0xf]  ;;  %v7407_v3 = vld [vmem:[%s10911_s1 + $0xfd4] sm:$0xf0]  ;;  %v6460_v6 = vor.u32 %v7343_v63, %v6459_v60 }
 0x167   : > { %3942 = vmatpush.bf16.msra.mxu2 %v6012_v1  ;;  %v7375_v1 = vld [vmem:[%s10911_s1 + $0xed4] sm:$0xf0]  ;;  %v6715_v2 = vld [vmem:[%s10911_s1 + $0xfc8] sm:$0xf] }
 0x168   : > { %3955 = vmatpush.bf16.msra.mxu3 %v6140_v7  ;;  %v6588_v7 = vor.u32 %v7375_v1, %v6587_v0  ;;  %v6315_v8 = vld [vmem:[%s10911_s1 + $0xca8] sm:$0xf]  ;;  %v7307_v9 = vld [vmem:[%s10911_s1 + $0xcb4] sm:$0xf0]  ;;  %v6716_v12 = vor.u32 %v7407_v3, %v6715_v2 }
 0x169   : > { %3917 = vmatpush.bf16.msra.mxu0 %v5740_v14  ;;  %v6443_v10 = vld [vmem:[%s10911_s1 + $0xda8] sm:$0xf]  ;;  %v7339_v13 = vld [vmem:[%s10911_s1 + $0xdb4] sm:$0xf0] }
 0x16a   : > { %3930 = vmatpush.bf16.msra.mxu1 %v5868_v24  ;;  %v6571_v14 = vld [vmem:[%s10911_s1 + $0xea8] sm:$0xf]  ;;  %v7371_v18 = vld [vmem:[%s10911_s1 + $0xeb4] sm:$0xf0]  ;;  %v6444_v30 = vor.u32 %v7339_v13, %v6443_v10 }
 0x16b   : > { %3943 = vmatpush.bf16.msra.mxu2 %v5996_v25  ;;  %v6699_v21 = vld [vmem:[%s10911_s1 + $0xfa8] sm:$0xf]  ;;  %v7403_v24 = vld [vmem:[%s10911_s1 + $0xfb4] sm:$0xf0]  ;;  %v6316_v25 = vor.u32 %v7307_v9, %v6315_v8  ;;  %v6572_v31 = vor.u32 %v7371_v18, %v6571_v14 }
 0x16c   : > { %3956 = vmatpush.bf16.msra.mxu3 %v6124_v36  ;;  %v6299_v33 = vld [vmem:[%s10911_s1 + $0xc88] sm:$0xf]  ;;  %v7303_v35 = vld [vmem:[%s10911_s1 + $0xc94] sm:$0xf0]  ;;  %v6700_v39 = vor.u32 %v7403_v24, %v6699_v21 }
 0x16d   : > { %3918 = vmatpush.bf16.msra.mxu0 %v5724_v45  ;;  %v6427_v36 = vld [vmem:[%s10911_s1 + $0xd88] sm:$0xf]  ;;  %v7335_v41 = vld [vmem:[%s10911_s1 + $0xd94] sm:$0xf0]  ;;  %v3712_v54 = vpop.f32.mrf.mxu0  ;;  %v6300_v46 = vor.u32 %v7303_v35, %v6299_v33 }
 0x16e   : > { %3931 = vmatpush.bf16.msra.mxu1 %v5852_v50  ;;  %v6555_v42 = vld [vmem:[%s10911_s1 + $0xe88] sm:$0xf]  ;;  %v7367_v43 = vld [vmem:[%s10911_s1 + $0xe94] sm:$0xf0]  ;;  %v3713_v45 = vadd.f32 %v3712_v54, %v9701_v62  ;;  %v3725_v48 = vpop.f32.mrf.mxu1  ;;  %v6428_v49 = vor.u32 %v7335_v41, %v6427_v36 }
 0x16f   : > { %3944 = vmatpush.bf16.msra.mxu2 %v5980_v51  ;;  %v6683_v47 = vld [vmem:[%s10911_s1 + $0xf88] sm:$0xf]  ;;  %v7399_v44 = vld [vmem:[%s10911_s1 + $0xf94] sm:$0xf0]  ;;  %v6556_v50 = vor.u32 %v7367_v43, %v6555_v42 }
 0x170   : > { %3957 = vmatpush.bf16.msra.mxu3 %v6108_v55  ;;  %3919 = vmatmul.bf16.vlgmr.msra.gmra.mxu0 %v8177_v15  ;;  %v6283_v51 = vld [vmem:[%s10911_s1 + $0xc68] sm:$0xf]  ;;  %v7299_v52 = vld [vmem:[%s10911_s1 + $0xc74] sm:$0xf0]  ;;  %v6684_v62 = vor.u32 %v7399_v44, %v6683_v47  ;;  %v3726_v55 = vadd.f32 %v3725_v48, %v3713_v45 }
 0x171   : > { %3963 = vmatpush.bf16.msrb.mxu0 %v6348_v56  ;;  %3932 = vmatmul.bf16.vlgmr.msra.gmra.mxu1 %v8190_v20  ;;  %v6411_v53 = vld [vmem:[%s10911_s1 + $0xd68] sm:$0xf]  ;;  %v7331_v56 = vld [vmem:[%s10911_s1 + $0xd74] sm:$0xf0]  ;;  %v6284_v60 = vor.u32 %v7299_v52, %v6283_v51 }
 0x172   : > { %3976 = vmatpush.bf16.msrb.mxu1 %v6476_v5  ;;  %3945 = vmatmul.bf16.vlgmr.msra.gmra.mxu2 %v8188_v19  ;;  %v6539_v5 = vld [vmem:[%s10911_s1 + $0xe68] sm:$0xf]  ;;  %v7395_v59 = vld [vmem:[%s10911_s1 + $0xf74] sm:$0xf0] }
 0x173   : > { %3989 = vmatpush.bf16.msrb.mxu2 %v6604_v57  ;;  %3958 = vmatmul.bf16.vlgmr.msra.gmra.mxu3 %v8198_v23  ;;  %v7363_v57 = vld [vmem:[%s10911_s1 + $0xe74] sm:$0xf0]  ;;  %v6667_v58 = vld [vmem:[%s10911_s1 + $0xf68] sm:$0xf] }
 0x174   : > { %4002 = vmatpush.bf16.msrb.mxu3 %v6732_v61  ;;  %v6412_v61 = vor.u32 %v7331_v56, %v6411_v53  ;;  %v6540_v63 = vor.u32 %v7363_v57, %v6539_v5  ;;  %v6267_v0 = vld [vmem:[%s10911_s1 + $0xc48] sm:$0xf]  ;;  %v7295_v1 = vld [vmem:[%s10911_s1 + $0xc54] sm:$0xf0]  ;;  %v6668_v3 = vor.u32 %v7395_v59, %v6667_v58  ;;  %v6929_v5 = vld [vmem:[%s10911_s1 + $0xec] sm:$0xf] }
 0x175   : > { %3964 = vmatpush.bf16.msrb.mxu0 %v6332_v4  ;;  %v6395_v2 = vld [vmem:[%s10911_s1 + $0xd48] sm:$0xf]  ;;  %v3738_v4 = vpop.f32.mrf.mxu2  ;;  %v7359_v8 = vld [vmem:[%s10911_s1 + $0xe54] sm:$0xf0]  ;;  %v3714_v14 = vpop.f32.mrf.mxu0  ;;  %v6268_v18 = vor.u32 %v7295_v1, %v6267_v0  ;;  %v4813_v57 = vld [vmem:[%s10911_s1 + $0xf8] sm:$0xf0] }
 0x176   : > { %3977 = vmatpush.bf16.msrb.mxu1 %v6460_v6  ;;  %v7327_v6 = vld [vmem:[%s10911_s1 + $0xd54] sm:$0xf0]  ;;  %v3739_v9 = vadd.f32 %v3738_v4, %v3726_v55  ;;  %v3751_v10 = vpop.f32.mrf.mxu3  ;;  %v3727_v21 = vpop.f32.mrf.mxu1  ;;  %v6379_v35 = vld [vmem:[%s10911_s1 + $0xd28] sm:$0xf]  ;;  %v6961_v58 = vld [vmem:[%s10911_s1 + $0x1ec] sm:$0xf] }
 0x177   : > { %3990 = vmatpush.bf16.msrb.mxu2 %v6588_v7  ;;  %v6523_v7 = vld [vmem:[%s10911_s1 + $0xe48] sm:$0xf]  ;;  %v7391_v13 = vld [vmem:[%s10911_s1 + $0xf54] sm:$0xf0]  ;;  %v5069_v0 = vld [vmem:[%s10911_s1 + $0x2f8] sm:$0xf0] }
 0x178   : > { %4003 = vmatpush.bf16.msrb.mxu3 %v6716_v12  ;;  %v6651_v12 = vld [vmem:[%s10911_s1 + $0xf48] sm:$0xf]  ;;  %v9900_v24 = vadd.f32 %v3751_v10, %v3739_v9  ;;  %v7291_v33 = vld [vmem:[%s10911_s1 + $0xc34] sm:$0xf0]  ;;  %v5197_v4 = vld [vmem:[%s10911_s1 + $0x3f8] sm:$0xf0] }
 0x179   : > { %3965 = vmatpush.bf16.msrb.mxu0 %v6316_v25  ;;  %v6396_v25 = vor.u32 %v7327_v6, %v6395_v2  ;;  %v6652_v36 = vor.u32 %v7391_v13, %v6651_v12  ;;  %v6507_v41 = vld [vmem:[%s10911_s1 + $0xe28] sm:$0xf]  ;;  %v7355_v42 = vld [vmem:[%s10911_s1 + $0xe34] sm:$0xf0]  ;;  %v6925_v10 = vld [vmem:[%s10911_s1 + $0xcc] sm:$0xf] }
 0x17a   : > { %3978 = vmatpush.bf16.msrb.mxu1 %v6444_v30  ;;  %v6524_v30 = vor.u32 %v7359_v8, %v6523_v7  ;;  %v6635_v43 = vld [vmem:[%s10911_s1 + $0xf28] sm:$0xf]  ;;  %v7387_v54 = vld [vmem:[%s10911_s1 + $0xf34] sm:$0xf0]  ;;  %v6508_v48 = vor.u32 %v7355_v42, %v6507_v41  ;;  %v4816_v7 = vor.u32 %v6929_v5, %v4813_v57  ;;  %v4797_v12 = vld [vmem:[%s10911_s1 + $0xd8] sm:$0xf0] }
 0x17b   : > { %3991 = vmatpush.bf16.msrb.mxu2 %v6572_v31  ;;  %v6251_v31 = vld [vmem:[%s10911_s1 + $0xc28] sm:$0xf]  ;;  %v7287_v45 = vld [vmem:[%s10911_s1 + $0xc14] sm:$0xf0]  ;;  %v6636_v52 = vor.u32 %v7387_v54, %v6635_v43  ;;  %v6957_v13 = vld [vmem:[%s10911_s1 + $0x1cc] sm:$0xf] }
 0x17c   : > { %4004 = vmatpush.bf16.msrb.mxu3 %v6700_v39  ;;  %v7323_v39 = vld [vmem:[%s10911_s1 + $0xd34] sm:$0xf0]  ;;  %v6252_v47 = vor.u32 %v7291_v33, %v6251_v31  ;;  %v6235_v44 = vld [vmem:[%s10911_s1 + $0xc08] sm:$0xf]  ;;  %v6989_v21 = vld [vmem:[%s10911_s1 + $0x2cc] sm:$0xf]  ;;  %v4800_v33 = vor.u32 %v6925_v10, %v4797_v12 }
 0x17d   : > { %3966 = vmatpush.bf16.msrb.mxu0 %v6300_v46  ;;  %v6380_v46 = vor.u32 %v7323_v39, %v6379_v35  ;;  %v6491_v51 = vld [vmem:[%s10911_s1 + $0xe08] sm:$0xf]  ;;  %v7351_v53 = vld [vmem:[%s10911_s1 + $0xe14] sm:$0xf0]  ;;  %v3740_v56 = vpop.f32.mrf.mxu2  ;;  %v5181_v31 = vld [vmem:[%s10911_s1 + $0x3d8] sm:$0xf0] }
 0x17e   : > { %3979 = vmatpush.bf16.msrb.mxu1 %v6428_v49  ;;  %v6363_v49 = vld [vmem:[%s10911_s1 + $0xd08] sm:$0xf]  ;;  %v7383_v55 = vld [vmem:[%s10911_s1 + $0xf14] sm:$0xf0]  ;;  %v3753_v59 = vpop.f32.mrf.mxu3  ;;  %v6492_v2 = vor.u32 %v7351_v53, %v6491_v51  ;;  %v6921_v39 = vld [vmem:[%s10911_s1 + $0xac] sm:$0xf] }
 0x17f   : > { %3992 = vmatpush.bf16.msrb.mxu2 %v6556_v50  ;;  %v7319_v50 = vld [vmem:[%s10911_s1 + $0xd14] sm:$0xf0]  ;;  %v4781_v41 = vld [vmem:[%s10911_s1 + $0xb8] sm:$0xf0]  ;;  %v6953_v42 = vld [vmem:[%s10911_s1 + $0x1ac] sm:$0xf] }
 0x180   : > { %4005 = vmatpush.bf16.msrb.mxu3 %v6684_v62  ;;  %v6619_v62 = vld [vmem:[%s10911_s1 + $0xf08] sm:$0xf]  ;;  %v6364_v1 = vor.u32 %v7319_v50, %v6363_v49  ;;  %v4909_v54 = vld [vmem:[%s10911_s1 + $0x1b8] sm:$0xf0]  ;;  %v6917_v51 = vld [vmem:[%s10911_s1 + $0x8c] sm:$0xf] }
 0x181   : > { %3967 = vmatpush.bf16.msrb.mxu0 %v6284_v60  ;;  %v6236_v60 = vor.u32 %v7287_v45, %v6235_v44  ;;  %v6620_v6 = vor.u32 %v7383_v55, %v6619_v62  ;;  %v5037_v44 = vld [vmem:[%s10911_s1 + $0x2b8] sm:$0xf0]  ;;  %v7017_v45 = vld [vmem:[%s10911_s1 + $0x3ac] sm:$0xf]  ;;  %v4912_v49 = vor.u32 %v6953_v42, %v4909_v54 }
 0x182   : > { %3980 = vmatpush.bf16.msrb.mxu1 %v6412_v61  ;;  %v4941_v61 = vld [vmem:[%s10911_s1 + $0x1f8] sm:$0xf0]  ;;  %v6949_v53 = vld [vmem:[%s10911_s1 + $0x18c] sm:$0xf] }
 0x183   : > { %3993 = vmatpush.bf16.msrb.mxu2 %v6540_v63  ;;  %v6993_v63 = vld [vmem:[%s10911_s1 + $0x2ec] sm:$0xf]  ;;  %v4944_v8 = vor.u32 %v6961_v58, %v4941_v61  ;;  %v4893_v55 = vld [vmem:[%s10911_s1 + $0x198] sm:$0xf0] }
 0x184   : > { %4006 = vmatpush.bf16.msrb.mxu3 %v6668_v3  ;;  %v7025_v3 = vld [vmem:[%s10911_s1 + $0x3ec] sm:$0xf]  ;;  %v5072_v9 = vor.u32 %v6993_v63, %v5069_v0  ;;  %v5021_v5 = vld [vmem:[%s10911_s1 + $0x298] sm:$0xf0]  ;;  %v4896_v0 = vor.u32 %v6949_v53, %v4893_v55 }
 0x185   : > { %3968 = vmatpush.bf16.msrb.mxu0 %v6268_v18  ;;  %v5200_v14 = vor.u32 %v7025_v3, %v5197_v4  ;;  %v4925_v18 = vld [vmem:[%s10911_s1 + $0x1d8] sm:$0xf0]  ;;  %v6981_v56 = vld [vmem:[%s10911_s1 + $0x28c] sm:$0xf] }
 0x186   : > { %3981 = vmatpush.bf16.msrb.mxu1 %v6396_v25  ;;  %v5053_v25 = vld [vmem:[%s10911_s1 + $0x2d8] sm:$0xf0]  ;;  %v4928_v35 = vor.u32 %v6957_v13, %v4925_v18  ;;  %v7013_v58 = vld [vmem:[%s10911_s1 + $0x38c] sm:$0xf] }
 0x187   : > { %3994 = vmatpush.bf16.msrb.mxu2 %v6524_v30  ;;  %v7021_v30 = vld [vmem:[%s10911_s1 + $0x3cc] sm:$0xf]  ;;  %v5149_v59 = vld [vmem:[%s10911_s1 + $0x398] sm:$0xf0] }
 0x188   : > { %4007 = vmatpush.bf16.msrb.mxu3 %v6652_v36  ;;  %v5056_v36 = vor.u32 %v6989_v21, %v5053_v25  ;;  %v5184_v43 = vor.u32 %v7021_v30, %v5181_v31  ;;  %v4749_v3 = vld [vmem:[%s10911_s1 + $0x78] sm:$0xf0]  ;;  %v6945_v4 = vld [vmem:[%s10911_s1 + $0x16c] sm:$0xf] }
 0x189   : > { %3969 = vmatpush.bf16.msrb.mxu0 %v6252_v47  ;;  %v6985_v47 = vld [vmem:[%s10911_s1 + $0x2ac] sm:$0xf]  ;;  %v5133_v12 = vld [vmem:[%s10911_s1 + $0x378] sm:$0xf0] }
 0x18a   : > { %3982 = vmatpush.bf16.msrb.mxu1 %v6380_v46  ;;  %v5165_v46 = vld [vmem:[%s10911_s1 + $0x3b8] sm:$0xf0]  ;;  %v5040_v50 = vor.u32 %v6985_v47, %v5037_v44  ;;  %v7009_v10 = vld [vmem:[%s10911_s1 + $0x36c] sm:$0xf] }
 0x18b   : > { %3995 = vmatpush.bf16.msrb.mxu2 %v6508_v48  ;;  %v4784_v48 = vor.u32 %v6921_v39, %v4781_v41  ;;  %v5168_v62 = vor.u32 %v7017_v45, %v5165_v46  ;;  %v6909_v21 = vld [vmem:[%s10911_s1 + $0x4c] sm:$0xf]  ;;  %v4733_v25 = vld [vmem:[%s10911_s1 + $0x58] sm:$0xf0]  ;;  %v5136_v31 = vor.u32 %v7009_v10, %v5133_v12 }
 0x18c   : > { %4008 = vmatpush.bf16.msrb.mxu3 %v6636_v52  ;;  %v4765_v52 = vld [vmem:[%s10911_s1 + $0x98] sm:$0xf0]  ;;  %v6941_v30 = vld [vmem:[%s10911_s1 + $0x14c] sm:$0xf]  ;;  %v4736_v44 = vor.u32 %v6909_v21, %v4733_v25 }
 0x18d   : > { %3970 = vmatpush.bf16.msrb.mxu0 %v6236_v60  ;;  %v3764_v57 = vpop.f32.mrf.mxu0  ;;  %v4768_v61 = vor.u32 %v6917_v51, %v4765_v52  ;;  %v4989_v39 = vld [vmem:[%s10911_s1 + $0x258] sm:$0xf0]  ;;  %v6937_v52 = vld [vmem:[%s10911_s1 + $0x12c] sm:$0xf] }
 0x18e   : > { %3983 = vmatpush.bf16.msrb.mxu1 %v6364_v1  ;;  %v3765_v60 = vadd.f32 %v3764_v57, %v9900_v24  ;;  %v3777_v63 = vpop.f32.mrf.mxu1  ;;  %v5024_v1 = vor.u32 %v6981_v56, %v5021_v5  ;;  %v5152_v24 = vor.u32 %v7013_v58, %v5149_v59  ;;  %v5117_v54 = vld [vmem:[%s10911_s1 + $0x358] sm:$0xf0]  ;;  %v6969_v55 = vld [vmem:[%s10911_s1 + $0x22c] sm:$0xf] }
 0x18f   : > { %3996 = vmatpush.bf16.msrb.mxu2 %v6492_v2  ;;  %v6913_v2 = vld [vmem:[%s10911_s1 + $0x6c] sm:$0xf]  ;;  %v4717_v51 = vld [vmem:[%s10911_s1 + $0x38] sm:$0xf0] }
 0x190   : > { %4009 = vmatpush.bf16.msrb.mxu3 %v6620_v6  ;;  %3971 = vmatmul.bf16.vlgmr.msrb.gmra.mxu0 %v8385_v11  ;;  %v3778_v6 = vadd.f32 %v3777_v63, %v3765_v60  ;;  %v4752_v13 = vor.u32 %v6913_v2, %v4749_v3  ;;  %v4973_v56 = vld [vmem:[%s10911_s1 + $0x238] sm:$0xf0]  ;;  %v7001_v5 = vld [vmem:[%s10911_s1 + $0x32c] sm:$0xf] }
 0x191   : > { %4015 = vmatpush.bf16.msra.mxu0 %v4816_v7  ;;  %3984 = vmatmul.bf16.vlgmr.msrb.gmra.mxu1 %v8398_v17  ;;  %v4877_v7 = vld [vmem:[%s10911_s1 + $0x178] sm:$0xf0]  ;;  %v6901_v59 = vld [vmem:[%s10911_s1 + $0xc] sm:$0xf]  ;;  %v4976_v63 = vor.u32 %v6969_v55, %v4973_v56 }
 0x192   : > { %4028 = vmatpush.bf16.msra.mxu1 %v4944_v8  ;;  %3997 = vmatmul.bf16.vlgmr.msrb.gmra.mxu2 %v8396_v16  ;;  %v6977_v8 = vld [vmem:[%s10911_s1 + $0x26c] sm:$0xf]  ;;  %v5101_v57 = vld [vmem:[%s10911_s1 + $0x338] sm:$0xf0] }
 0x193   : > { %4041 = vmatpush.bf16.msra.mxu2 %v5072_v9  ;;  %4010 = vmatmul.bf16.vlgmr.msrb.gmra.mxu3 %v8406_v22  ;;  %v5005_v9 = vld [vmem:[%s10911_s1 + $0x278] sm:$0xf0]  ;;  %v6965_v2 = vld [vmem:[%s10911_s1 + $0x20c] sm:$0xf]  ;;  %v5104_v3 = vor.u32 %v7001_v5, %v5101_v57 }
 0x194   : > { %4054 = vmatpush.bf16.msra.mxu3 %v5200_v14  ;;  %v4880_v14 = vor.u32 %v6945_v4, %v4877_v7  ;;  %v5008_v18 = vor.u32 %v6977_v8, %v5005_v9  ;;  %v4701_v60 = vld [vmem:[%s10911_s1 + $0x18] sm:$0xf0]  ;;  %v7057_v8 = vld [vmem:[%s10911_s1 + $0x4ec] sm:$0xf] }
 0x195   : > { %4016 = vmatpush.bf16.msra.mxu0 %v4800_v33  ;;  %v3790_v33 = vpop.f32.mrf.mxu2  ;;  %v3766_v47 = vpop.f32.mrf.mxu0  ;;  %v4957_v4 = vld [vmem:[%s10911_s1 + $0x218] sm:$0xf0]  ;;  %v7089_v10 = vld [vmem:[%s10911_s1 + $0x5ec] sm:$0xf] }
 0x196   : > { %4029 = vmatpush.bf16.msra.mxu1 %v4928_v35  ;;  %v4861_v35 = vld [vmem:[%s10911_s1 + $0x158] sm:$0xf0]  ;;  %v3791_v41 = vadd.f32 %v3790_v33, %v3778_v6  ;;  %v3803_v42 = vpop.f32.mrf.mxu3  ;;  %v3779_v45 = vpop.f32.mrf.mxu1  ;;  %v7081_v56 = vld [vmem:[%s10911_s1 + $0x5ac] sm:$0xf] }
 0x197   : > { %4042 = vmatpush.bf16.msra.mxu2 %v5056_v36  ;;  %v6973_v36 = vld [vmem:[%s10911_s1 + $0x24c] sm:$0xf]  ;;  %v5085_v6 = vld [vmem:[%s10911_s1 + $0x318] sm:$0xf0] }
 0x198   : > { %4055 = vmatpush.bf16.msra.mxu3 %v5184_v43  ;;  %v7005_v43 = vld [vmem:[%s10911_s1 + $0x34c] sm:$0xf]  ;;  %v10099_v46 = vadd.f32 %v3803_v42, %v3791_v41  ;;  %v5325_v9 = vld [vmem:[%s10911_s1 + $0x4f8] sm:$0xf0] }
 0x199   : > { %4017 = vmatpush.bf16.msra.mxu0 %v4784_v48  ;;  %v4864_v48 = vor.u32 %v6941_v30, %v4861_v35  ;;  %v5120_v53 = vor.u32 %v7005_v43, %v5117_v54  ;;  %v5581_v21 = vld [vmem:[%s10911_s1 + $0x6f8] sm:$0xf0]  ;;  %v4960_v30 = vor.u32 %v6965_v2, %v4957_v4  ;;  %v7053_v42 = vld [vmem:[%s10911_s1 + $0x4cc] sm:$0xf] }
 0x19a   : > { %4030 = vmatpush.bf16.msra.mxu1 %v4912_v49  ;;  %v4992_v49 = vor.u32 %v6973_v36, %v4989_v39  ;;  %v5709_v33 = vld [vmem:[%s10911_s1 + $0x7f8] sm:$0xf0]  ;;  %v5328_v36 = vor.u32 %v7057_v8, %v5325_v9  ;;  %v7085_v54 = vld [vmem:[%s10911_s1 + $0x5cc] sm:$0xf] }
 0x19b   : > { %4043 = vmatpush.bf16.msra.mxu2 %v5040_v50  ;;  %v6905_v50 = vld [vmem:[%s10911_s1 + $0x2c] sm:$0xf]  ;;  %v5309_v43 = vld [vmem:[%s10911_s1 + $0x4d8] sm:$0xf0] }
 0x19c   : > { %4056 = vmatpush.bf16.msra.mxu3 %v5168_v62  ;;  %v4845_v62 = vld [vmem:[%s10911_s1 + $0x138] sm:$0xf0]  ;;  %v4720_v58 = vor.u32 %v6905_v50, %v4717_v51  ;;  %v7117_v45 = vld [vmem:[%s10911_s1 + $0x6cc] sm:$0xf]  ;;  %v5312_v51 = vor.u32 %v7053_v42, %v5309_v43 }
 0x19d   : > { %4018 = vmatpush.bf16.msra.mxu0 %v4768_v61  ;;  %v4848_v61 = vor.u32 %v6937_v52, %v4845_v62  ;;  %v3792_v7 = vpop.f32.mrf.mxu2  ;;  %v5693_v50 = vld [vmem:[%s10911_s1 + $0x7d8] sm:$0xf0]  ;;  %v7049_v62 = vld [vmem:[%s10911_s1 + $0x4ac] sm:$0xf] }
 0x19e   : > { %4031 = vmatpush.bf16.msra.mxu1 %v4896_v0  ;;  %v6933_v0 = vld [vmem:[%s10911_s1 + $0x10c] sm:$0xf]  ;;  %v3805_v12 = vpop.f32.mrf.mxu3  ;;  %v5293_v55 = vld [vmem:[%s10911_s1 + $0x4b8] sm:$0xf0] }
 0x19f   : > { %4044 = vmatpush.bf16.msra.mxu2 %v5024_v1  ;;  %v4829_v1 = vld [vmem:[%s10911_s1 + $0x118] sm:$0xf0]  ;;  %v7141_v7 = vld [vmem:[%s10911_s1 + $0x78c] sm:$0xf] }
 0x1a0   : > { %4057 = vmatpush.bf16.msra.mxu3 %v5152_v24  ;;  %v6997_v24 = vld [vmem:[%s10911_s1 + $0x30c] sm:$0xf]  ;;  %v4832_v25 = vor.u32 %v6933_v0, %v4829_v1  ;;  %v5421_v57 = vld [vmem:[%s10911_s1 + $0x5b8] sm:$0xf0] }
 0x1a1   : > { %4019 = vmatpush.bf16.msra.mxu0 %v4752_v13  ;;  %v4704_v13 = vor.u32 %v6901_v59, %v4701_v60  ;;  %v5088_v35 = vor.u32 %v6997_v24, %v5085_v6  ;;  %v5549_v59 = vld [vmem:[%s10911_s1 + $0x6b8] sm:$0xf0]  ;;  %v7145_v60 = vld [vmem:[%s10911_s1 + $0x7ac] sm:$0xf] }
 0x1a2   : > { %4032 = vmatpush.bf16.msra.mxu1 %v4880_v14  ;;  %v5453_v14 = vld [vmem:[%s10911_s1 + $0x5f8] sm:$0xf0]  ;;  %v7045_v0 = vld [vmem:[%s10911_s1 + $0x48c] sm:$0xf] }
 0x1a3   : > { %4045 = vmatpush.bf16.msra.mxu2 %v5008_v18  ;;  %v7121_v18 = vld [vmem:[%s10911_s1 + $0x6ec] sm:$0xf]  ;;  %v5456_v39 = vor.u32 %v7089_v10, %v5453_v14  ;;  %v5277_v2 = vld [vmem:[%s10911_s1 + $0x498] sm:$0xf0] }
 0x1a4   : > { %4058 = vmatpush.bf16.msra.mxu3 %v5136_v31  ;;  %v7153_v31 = vld [vmem:[%s10911_s1 + $0x7ec] sm:$0xf]  ;;  %v5584_v41 = vor.u32 %v7121_v18, %v5581_v21  ;;  %v5405_v4 = vld [vmem:[%s10911_s1 + $0x598] sm:$0xf0]  ;;  %v5280_v9 = vor.u32 %v7045_v0, %v5277_v2 }
 0x1a5   : > { %4020 = vmatpush.bf16.msra.mxu0 %v4736_v44  ;;  %v5712_v47 = vor.u32 %v7153_v31, %v5709_v33  ;;  %v5437_v44 = vld [vmem:[%s10911_s1 + $0x5d8] sm:$0xf0]  ;;  %v7109_v24 = vld [vmem:[%s10911_s1 + $0x68c] sm:$0xf] }
 0x1a6   : > { %4033 = vmatpush.bf16.msra.mxu1 %v4864_v48  ;;  %v5565_v48 = vld [vmem:[%s10911_s1 + $0x6d8] sm:$0xf0]  ;;  %v5440_v52 = vor.u32 %v7085_v54, %v5437_v44  ;;  %v7041_v14 = vld [vmem:[%s10911_s1 + $0x46c] sm:$0xf] }
 0x1a7   : > { %4046 = vmatpush.bf16.msra.mxu2 %v4992_v49  ;;  %v7149_v49 = vld [vmem:[%s10911_s1 + $0x7cc] sm:$0xf]  ;;  %v5533_v6 = vld [vmem:[%s10911_s1 + $0x698] sm:$0xf0] }
 0x1a8   : > { %4059 = vmatpush.bf16.msra.mxu3 %v5120_v53  ;;  %v5568_v53 = vor.u32 %v7117_v45, %v5565_v48  ;;  %v5696_v5 = vor.u32 %v7149_v49, %v5693_v50  ;;  %v5661_v8 = vld [vmem:[%s10911_s1 + $0x798] sm:$0xf0]  ;;  %v7073_v21 = vld [vmem:[%s10911_s1 + $0x56c] sm:$0xf] }
 0x1a9   : > { %4021 = vmatpush.bf16.msra.mxu0 %v4720_v58  ;;  %v7113_v58 = vld [vmem:[%s10911_s1 + $0x6ac] sm:$0xf]  ;;  %v5261_v18 = vld [vmem:[%s10911_s1 + $0x478] sm:$0xf0]  ;;  %v5664_v31 = vor.u32 %v7141_v7, %v5661_v8 }
 0x1aa   : > { %4034 = vmatpush.bf16.msra.mxu1 %v4848_v61  ;;  %v5677_v61 = vld [vmem:[%s10911_s1 + $0x7b8] sm:$0xf0]  ;;  %v5552_v1 = vor.u32 %v7113_v58, %v5549_v59  ;;  %v5264_v43 = vor.u32 %v7041_v14, %v5261_v18  ;;  %v7037_v44 = vld [vmem:[%s10911_s1 + $0x44c] sm:$0xf] }
 0x1ab   : > { %4047 = vmatpush.bf16.msra.mxu2 %v4976_v63  ;;  %v5296_v63 = vor.u32 %v7049_v62, %v5293_v55  ;;  %v5389_v33 = vld [vmem:[%s10911_s1 + $0x578] sm:$0xf0]  ;;  %v7069_v48 = vld [vmem:[%s10911_s1 + $0x54c] sm:$0xf] }
 0x1ac   : > { %4060 = vmatpush.bf16.msra.mxu3 %v5104_v3  ;;  %v5392_v54 = vor.u32 %v7073_v21, %v5389_v33  ;;  %v5245_v45 = vld [vmem:[%s10911_s1 + $0x458] sm:$0xf0]  ;;  %v7029_v7 = vld [vmem:[%s10911_s1 + $0x40c] sm:$0xf] }
 0x1ad   : > { %4022 = vmatpush.bf16.msra.mxu0 %v4704_v13  ;;  %v3816_v10 = vpop.f32.mrf.mxu0  ;;  %v5536_v13 = vor.u32 %v7109_v24, %v5533_v6  ;;  %v5229_v0 = vld [vmem:[%s10911_s1 + $0x438] sm:$0xf0]  ;;  %v7093_v14 = vld [vmem:[%s10911_s1 + $0x60c] sm:$0xf] }
 0x1ae   : > { %4035 = vmatpush.bf16.msra.mxu1 %v4832_v25  ;;  %v5613_v24 = vld [vmem:[%s10911_s1 + $0x738] sm:$0xf0] }
 0x1af   : > { %4048 = vmatpush.bf16.msra.mxu2 %v4960_v30  ;;  %v3829_v30 = vpop.f32.mrf.mxu1  ;;  %v5213_v8 = vld [vmem:[%s10911_s1 + $0x418] sm:$0xf0] }
 0x1b0   : > { %4061 = vmatpush.bf16.msra.mxu3 %v5088_v35  ;;  %4023 = vmatmul.bf16.vlgmr.msra.gmra.mxu0 %v7849_v28  ;;  %v7077_v28 = vld [vmem:[%s10911_s1 + $0x58c] sm:$0xf] }
 0x1b1   : > { %4067 = vmatpush.bf16.msrb.mxu0 %v5328_v36  ;;  %4036 = vmatmul.bf16.vlgmr.msra.gmra.mxu1 %v7854_v32  ;;  %v5680_v32 = vor.u32 %v7145_v60, %v5677_v61  ;;  %v5408_v12 = vor.u32 %v7077_v28, %v5405_v4  ;;  %v7105_v35 = vld [vmem:[%s10911_s1 + $0x66c] sm:$0xf]  ;;  %v5517_v36 = vld [vmem:[%s10911_s1 + $0x678] sm:$0xf0] }
 0x1b2   : > { %4080 = vmatpush.bf16.msrb.mxu1 %v5456_v39  ;;  %4049 = vmatmul.bf16.vlgmr.msra.gmra.mxu2 %v7847_v27  ;;  %v5424_v27 = vor.u32 %v7081_v56, %v5421_v57  ;;  %v7137_v39 = vld [vmem:[%s10911_s1 + $0x76c] sm:$0xf]  ;;  %v5248_v57 = vor.u32 %v7037_v44, %v5245_v45  ;;  %v5357_v28 = vld [vmem:[%s10911_s1 + $0x538] sm:$0xf0] }
 0x1b3   : > { %4093 = vmatpush.bf16.msrb.mxu2 %v5584_v41  ;;  %4062 = vmatmul.bf16.vlgmr.msra.gmra.mxu3 %v7851_v29  ;;  %v10237_v29 = vld [vmem:[%s10912_s2] sm:$0xf]  ;;  %v5645_v41 = vld [vmem:[%s10911_s1 + $0x778] sm:$0xf0]  ;;  %v7133_v56 = vld [vmem:[%s10911_s1 + $0x74c] sm:$0xf] }
 0x1b4   : > { %4106 = vmatpush.bf16.msrb.mxu3 %v5712_v47  ;;  %v825_v3 = vperm.slane %v10237_v29, 2  ;;  %v5520_v47 = vor.u32 %v7105_v35, %v5517_v36  ;;  %v5648_v50 = vor.u32 %v7137_v39, %v5645_v41  ;;  %v7129_v4 = vld [vmem:[%s10911_s1 + $0x72c] sm:$0xf]  ;;  %v5837_v36 = vld [vmem:[%s10911_s1 + $0x8f8] sm:$0xf0]  ;;  %v5216_v41 = vor.u32 %v7029_v7, %v5213_v8 }
 0x1b5   : > { %4068 = vmatpush.bf16.msrb.mxu0 %v5312_v51  ;;  %v3842_v49 = vpop.f32.mrf.mxu2  ;;  %v5373_v51 = vld [vmem:[%s10911_s1 + $0x558] sm:$0xf0]  ;;  %v3818_v59 = vpop.f32.mrf.mxu0  ;;  %v5616_v21 = vor.u32 %v7129_v4, %v5613_v24  ;;  %v7185_v35 = vld [vmem:[%s10911_s1 + $0x8ec] sm:$0xf] }
 0x1b6   : > { %4081 = vmatpush.bf16.msrb.mxu1 %v5440_v52  ;;  %v3817_v25 = vadd.f32 %v3816_v10, %v825_v3  ;;  %v7101_v52 = vld [vmem:[%s10911_s1 + $0x64c] sm:$0xf]  ;;  %v3855_v55 = vpop.f32.mrf.mxu3  ;;  %v5376_v60 = vor.u32 %v7069_v48, %v5373_v51  ;;  %v6221_v48 = vld [vmem:[%s10911_s1 + $0xbf8] sm:$0xf0] }
 0x1b7   : > { %4094 = vmatpush.bf16.msrb.mxu2 %v5568_v53  ;;  %v5501_v53 = vld [vmem:[%s10911_s1 + $0x658] sm:$0xf0]  ;;  %v7097_v3 = vld [vmem:[%s10911_s1 + $0x62c] sm:$0xf] }
 0x1b8   : > { %4107 = vmatpush.bf16.msrb.mxu3 %v5696_v5  ;;  %v3830_v42 = vadd.f32 %v3829_v30, %v3817_v25  ;;  %v5629_v5 = vld [vmem:[%s10911_s1 + $0x758] sm:$0xf0]  ;;  %v5504_v61 = vor.u32 %v7101_v52, %v5501_v53  ;;  %v7125_v30 = vld [vmem:[%s10911_s1 + $0x70c] sm:$0xf] }
 0x1b9   : > { %4069 = vmatpush.bf16.msrb.mxu0 %v5296_v63  ;;  %v7033_v63 = vld [vmem:[%s10911_s1 + $0x42c] sm:$0xf]  ;;  %v5632_v2 = vor.u32 %v7133_v56, %v5629_v5  ;;  %v5469_v25 = vld [vmem:[%s10911_s1 + $0x618] sm:$0xf0] }
 0x1ba   : > { %4082 = vmatpush.bf16.msrb.mxu1 %v5424_v27  ;;  %v3843_v62 = vadd.f32 %v3842_v49, %v3830_v42  ;;  %v7065_v27 = vld [vmem:[%s10911_s1 + $0x52c] sm:$0xf]  ;;  %v5232_v6 = vor.u32 %v7033_v63, %v5229_v0  ;;  %v5965_v42 = vld [vmem:[%s10911_s1 + $0x9f8] sm:$0xf0]  ;;  %v5472_v44 = vor.u32 %v7093_v14, %v5469_v25 }
 0x1bb   : > { %4095 = vmatpush.bf16.msrb.mxu2 %v5552_v1  ;;  %v3831_v1 = vpop.f32.mrf.mxu1  ;;  %v7217_v39 = vld [vmem:[%s10911_s1 + $0x9ec] sm:$0xf]  ;;  %v5949_v5 = vld [vmem:[%s10911_s1 + $0x9d8] sm:$0xf0] }
 0x1bc   : > { %4108 = vmatpush.bf16.msrb.mxu3 %v5680_v32  ;;  %v10303_v58 = vadd.f32 %v3855_v55, %v3843_v62  ;;  %v5485_v32 = vld [vmem:[%s10911_s1 + $0x638] sm:$0xf0]  ;;  %v7281_v45 = vld [vmem:[%s10911_s1 + $0xbec] sm:$0xf]  ;;  %v5968_v51 = vor.u32 %v7217_v39, %v5965_v42 }
 0x1bd   : > { %4070 = vmatpush.bf16.msrb.mxu0 %v5280_v9  ;;  %v5360_v9 = vor.u32 %v7065_v27, %v5357_v28  ;;  %v5488_v10 = vor.u32 %v7097_v3, %v5485_v32  ;;  %v3844_v18 = vpop.f32.mrf.mxu2  ;;  %v7181_v53 = vld [vmem:[%s10911_s1 + $0x8cc] sm:$0xf]  ;;  %v5821_v62 = vld [vmem:[%s10911_s1 + $0x8d8] sm:$0xf0]  ;;  %v6224_v56 = vor.u32 %v7281_v45, %v6221_v48 }
 0x1be   : > { %4083 = vmatpush.bf16.msrb.mxu1 %v5408_v12  ;;  %v7061_v12 = vld [vmem:[%s10911_s1 + $0x50c] sm:$0xf]  ;;  %v3857_v33 = vpop.f32.mrf.mxu3  ;;  %v6077_v59 = vld [vmem:[%s10911_s1 + $0xad8] sm:$0xf0]  ;;  %v5824_v63 = vor.u32 %v7181_v53, %v5821_v62 }
 0x1bf   : > { %4096 = vmatpush.bf16.msrb.mxu2 %v5536_v13  ;;  %v5341_v13 = vld [vmem:[%s10911_s1 + $0x518] sm:$0xf0]  ;;  %v7213_v55 = vld [vmem:[%s10911_s1 + $0x9cc] sm:$0xf] }
 0x1c0   : > { %4109 = vmatpush.bf16.msrb.mxu3 %v5664_v31  ;;  %v5597_v31 = vld [vmem:[%s10911_s1 + $0x718] sm:$0xf0]  ;;  %v5952_v0 = vor.u32 %v7213_v55, %v5949_v5  ;;  %v7177_v1 = vld [vmem:[%s10911_s1 + $0x8ac] sm:$0xf] }
 0x1c1   : > { %4071 = vmatpush.bf16.msrb.mxu0 %v5264_v43  ;;  %v7249_v43 = vld [vmem:[%s10911_s1 + $0xaec] sm:$0xf]  ;;  %v5600_v49 = vor.u32 %v7125_v30, %v5597_v31  ;;  %v5933_v32 = vld [vmem:[%s10911_s1 + $0x9b8] sm:$0xf0] }
 0x1c2   : > { %4084 = vmatpush.bf16.msrb.mxu1 %v5392_v54  ;;  %v6093_v54 = vld [vmem:[%s10911_s1 + $0xaf8] sm:$0xf0]  ;;  %v7209_v28 = vld [vmem:[%s10911_s1 + $0x9ac] sm:$0xf] }
 0x1c3   : > { %4097 = vmatpush.bf16.msrb.mxu2 %v5520_v47  ;;  %v5344_v47 = vor.u32 %v7061_v12, %v5341_v13  ;;  %v6096_v52 = vor.u32 %v7249_v43, %v6093_v54  ;;  %v7241_v4 = vld [vmem:[%s10911_s1 + $0xaac] sm:$0xf]  ;;  %v6061_v24 = vld [vmem:[%s10911_s1 + $0xab8] sm:$0xf0]  ;;  %v5936_v8 = vor.u32 %v7209_v28, %v5933_v32 }
 0x1c4   : > { %4110 = vmatpush.bf16.msrb.mxu3 %v5648_v50  ;;  %v5840_v50 = vor.u32 %v7185_v35, %v5837_v36  ;;  %v5789_v12 = vld [vmem:[%s10911_s1 + $0x898] sm:$0xf0]  ;;  %v7237_v13 = vld [vmem:[%s10911_s1 + $0xa8c] sm:$0xf] }
 0x1c5   : > { %4072 = vmatpush.bf16.msrb.mxu0 %v5248_v57  ;;  %v7245_v57 = vld [vmem:[%s10911_s1 + $0xacc] sm:$0xf]  ;;  %v6045_v14 = vld [vmem:[%s10911_s1 + $0xa98] sm:$0xf0] }
 0x1c6   : > { %4085 = vmatpush.bf16.msrb.mxu1 %v5376_v60  ;;  %v7277_v60 = vld [vmem:[%s10911_s1 + $0xbcc] sm:$0xf]  ;;  %v6080_v27 = vor.u32 %v7245_v57, %v6077_v59  ;;  %v6048_v33 = vor.u32 %v7237_v13, %v6045_v14  ;;  %v5773_v36 = vld [vmem:[%s10911_s1 + $0x878] sm:$0xf0] }
 0x1c7   : > { %4098 = vmatpush.bf16.msrb.mxu2 %v5504_v61  ;;  %v6205_v61 = vld [vmem:[%s10911_s1 + $0xbd8] sm:$0xf0]  ;;  %v7269_v18 = vld [vmem:[%s10911_s1 + $0xb8c] sm:$0xf] }
 0x1c8   : > { %4111 = vmatpush.bf16.msrb.mxu3 %v5632_v2  ;;  %v5805_v2 = vld [vmem:[%s10911_s1 + $0x8b8] sm:$0xf0]  ;;  %v6208_v3 = vor.u32 %v7277_v60, %v6205_v61  ;;  %v7169_v35 = vld [vmem:[%s10911_s1 + $0x86c] sm:$0xf] }
 0x1c9   : > { %4073 = vmatpush.bf16.msrb.mxu0 %v5232_v6  ;;  %v7273_v6 = vld [vmem:[%s10911_s1 + $0xbac] sm:$0xf]  ;;  %v5808_v7 = vor.u32 %v7177_v1, %v5805_v2  ;;  %v5901_v43 = vld [vmem:[%s10911_s1 + $0x978] sm:$0xf0]  ;;  %v5776_v48 = vor.u32 %v7169_v35, %v5773_v36 }
 0x1ca   : > { %4086 = vmatpush.bf16.msrb.mxu1 %v5360_v9  ;;  %v6064_v9 = vor.u32 %v7241_v4, %v6061_v24  ;;  %v7201_v39 = vld [vmem:[%s10911_s1 + $0x96c] sm:$0xf]  ;;  %v6157_v45 = vld [vmem:[%s10911_s1 + $0xb78] sm:$0xf0] }
 0x1cb   : > { %4099 = vmatpush.bf16.msrb.mxu2 %v5488_v10  ;;  %v7173_v10 = vld [vmem:[%s10911_s1 + $0x88c] sm:$0xf]  ;;  %v6013_v57 = vld [vmem:[%s10911_s1 + $0xa58] sm:$0xf0] }
 0x1cc   : > { %4112 = vmatpush.bf16.msrb.mxu3 %v5616_v21  ;;  %v6173_v21 = vld [vmem:[%s10911_s1 + $0xb98] sm:$0xf0]  ;;  %v5792_v25 = vor.u32 %v7173_v10, %v5789_v12  ;;  %v7233_v54 = vld [vmem:[%s10911_s1 + $0xa6c] sm:$0xf] }
 0x1cd   : > { %4074 = vmatpush.bf16.msrb.mxu0 %v5216_v41  ;;  %v10453_v30 = vpop.f32.mrf.mxu0  ;;  %v6176_v42 = vor.u32 %v7269_v18, %v6173_v21  ;;  %v7197_v53 = vld [vmem:[%s10911_s1 + $0x94c] sm:$0xf]  ;;  %v6141_v61 = vld [vmem:[%s10911_s1 + $0xb58] sm:$0xf0] }
 0x1ce   : > { %4087 = vmatpush.bf16.msrb.mxu1 %v5344_v47  ;;  %v10464_v41 = vpop.f32.mrf.mxu1  ;;  %v6029_v47 = vld [vmem:[%s10911_s1 + $0xa78] sm:$0xf0]  ;;  %v7229_v5 = vld [vmem:[%s10911_s1 + $0xa4c] sm:$0xf] }
 0x1cf   : > { %4100 = vmatpush.bf16.msrb.mxu2 %v5472_v44  ;;  %v7265_v44 = vld [vmem:[%s10911_s1 + $0xb6c] sm:$0xf]  ;;  %v6016_v1 = vor.u32 %v7229_v5, %v6013_v57  ;;  %v5741_v28 = vld [vmem:[%s10911_s1 + $0x838] sm:$0xf0] }
 0x1d0   : > { %4113 = vmatpush.bf16.msrb.mxu3 %v5600_v49  ;;  %4075 = vmatmul.bf16.vlgmr.msrb.gmra.mxu0 %v7986_v37  ;;  %v7205_v37 = vld [vmem:[%s10911_s1 + $0x98c] sm:$0xf]  ;;  %v5904_v49 = vor.u32 %v7201_v39, %v5901_v43  ;;  %v6160_v55 = vor.u32 %v7265_v44, %v6157_v45  ;;  %v5869_v24 = vld [vmem:[%s10911_s1 + $0x938] sm:$0xf0] }
 0x1d1   : > { %4119 = vmatpush.bf16.msra.mxu0 %v5840_v50  ;;  %4088 = vmatmul.bf16.vlgmr.msrb.gmra.mxu1 %v7990_v40  ;;  %v5917_v40 = vld [vmem:[%s10911_s1 + $0x998] sm:$0xf0]  ;;  %v6032_v50 = vor.u32 %v7233_v54, %v6029_v47  ;;  %v7261_v60 = vld [vmem:[%s10911_s1 + $0xb4c] sm:$0xf] }
 0x1d2   : > { %4132 = vmatpush.bf16.msra.mxu1 %v5968_v51  ;;  %4101 = vmatmul.bf16.vlgmr.msrb.gmra.mxu2 %v7978_v34  ;;  %v6189_v34 = vld [vmem:[%s10911_s1 + $0xbb8] sm:$0xf0]  ;;  %v5920_v31 = vor.u32 %v7205_v37, %v5917_v40  ;;  %v7165_v51 = vld [vmem:[%s10911_s1 + $0x84c] sm:$0xf]  ;;  %v6144_v4 = vor.u32 %v7261_v60, %v6141_v61 }
 0x1d3   : > { %4145 = vmatpush.bf16.msra.mxu2 %v6096_v52  ;;  %4114 = vmatmul.bf16.vlgmr.msrb.gmra.mxu3 %v7988_v38  ;;  %v6192_v38 = vor.u32 %v7273_v6, %v6189_v34  ;;  %v5757_v52 = vld [vmem:[%s10911_s1 + $0x858] sm:$0xf0]  ;;  %v7161_v2 = vld [vmem:[%s10911_s1 + $0x82c] sm:$0xf] }
 0x1d4   : > { %4158 = vmatpush.bf16.msra.mxu3 %v6224_v56  ;;  %v5885_v56 = vld [vmem:[%s10911_s1 + $0x958] sm:$0xf0]  ;;  %v7225_v6 = vld [vmem:[%s10911_s1 + $0xa2c] sm:$0xf] }
 0x1d5   : > { %4120 = vmatpush.bf16.msra.mxu0 %v5824_v63  ;;  %v10490_v62 = vpop.f32.mrf.mxu2  ;;  %v5760_v63 = vor.u32 %v7165_v51, %v5757_v52  ;;  %v5997_v34 = vld [vmem:[%s10911_s1 + $0xa38] sm:$0xf0]  ;;  %v7157_v10 = vld [vmem:[%s10911_s1 + $0x80c] sm:$0xf] }
 0x1d6   : > { %4133 = vmatpush.bf16.msra.mxu1 %v5952_v0  ;;  %v10501_v59 = vpop.f32.mrf.mxu3  ;;  %v3870_v0 = vpop.f32.mrf.mxu0  ;;  %v5725_v12 = vld [vmem:[%s10911_s1 + $0x818] sm:$0xf0]  ;;  %v7189_v40 = vld [vmem:[%s10911_s1 + $0x90c] sm:$0xf] }
 0x1d7   : > { %4146 = vmatpush.bf16.msra.mxu2 %v6080_v27  ;;  %v5888_v27 = vor.u32 %v7197_v53, %v5885_v56  ;;  %v3883_v32 = vpop.f32.mrf.mxu1  ;;  %v5853_v13 = vld [vmem:[%s10911_s1 + $0x918] sm:$0xf0]  ;;  %v7221_v14 = vld [vmem:[%s10911_s1 + $0xa0c] sm:$0xf]  ;;  %v5728_v43 = vor.u32 %v7157_v10, %v5725_v12 }
 0x1d8   : > { %4159 = vmatpush.bf16.msra.mxu3 %v6208_v3  ;;  %v7193_v3 = vld [vmem:[%s10911_s1 + $0x92c] sm:$0xf]  ;;  %v6349_v39 = vld [vmem:[%s10911_s1 + $0xcf8] sm:$0xf0]  ;;  %v5856_v45 = vor.u32 %v7189_v40, %v5853_v13 }
 0x1d9   : > { %4121 = vmatpush.bf16.msra.mxu0 %v5808_v7  ;;  %v7257_v7 = vld [vmem:[%s10911_s1 + $0xb2c] sm:$0xf]  ;;  %v5872_v37 = vor.u32 %v7193_v3, %v5869_v24  ;;  %v6477_v54 = vld [vmem:[%s10911_s1 + $0xdf8] sm:$0xf0] }
 0x1da   : > { %4134 = vmatpush.bf16.msra.mxu1 %v5936_v8  ;;  %v6125_v8 = vld [vmem:[%s10911_s1 + $0xb38] sm:$0xf0]  ;;  %v7313_v36 = vld [vmem:[%s10911_s1 + $0xcec] sm:$0xf] }
 0x1db   : > { %4147 = vmatpush.bf16.msra.mxu2 %v6064_v9  ;;  %v5744_v9 = vor.u32 %v7161_v2, %v5741_v28  ;;  %v6128_v21 = vor.u32 %v7257_v7, %v6125_v8  ;;  %v7377_v47 = vld [vmem:[%s10911_s1 + $0xeec] sm:$0xf]  ;;  %v6605_v44 = vld [vmem:[%s10911_s1 + $0xef8] sm:$0xf0]  ;;  %v6352_v52 = vor.u32 %v7313_v36, %v6349_v39 }
 0x1dc   : > { %4160 = vmatpush.bf16.msra.mxu3 %v6192_v38  ;;  %v6000_v38 = vor.u32 %v7225_v6, %v5997_v34  ;;  %v7309_v56 = vld [vmem:[%s10911_s1 + $0xccc] sm:$0xf]  ;;  %v6333_v5 = vld [vmem:[%s10911_s1 + $0xcd8] sm:$0xf0] }
 0x1dd   : > { %4122 = vmatpush.bf16.msra.mxu0 %v5792_v25  ;;  %v3896_v18 = vpop.f32.mrf.mxu2  ;;  %v5981_v25 = vld [vmem:[%s10911_s1 + $0xa18] sm:$0xf0]  ;;  %v7341_v57 = vld [vmem:[%s10911_s1 + $0xdcc] sm:$0xf]  ;;  %v6336_v2 = vor.u32 %v7309_v56, %v6333_v5 }
 0x1de   : > { %4135 = vmatpush.bf16.msra.mxu1 %v5920_v31  ;;  %v7253_v31 = vld [vmem:[%s10911_s1 + $0xb0c] sm:$0xf]  ;;  %v3909_v35 = vpop.f32.mrf.mxu3  ;;  %v6461_v61 = vld [vmem:[%s10911_s1 + $0xdd8] sm:$0xf0] }
 0x1df   : > { %4148 = vmatpush.bf16.msra.mxu2 %v6048_v33  ;;  %v6109_v33 = vld [vmem:[%s10911_s1 + $0xb18] sm:$0xf0]  ;;  %v6464_v28 = vor.u32 %v7341_v57, %v6461_v61  ;;  %v7305_v32 = vld [vmem:[%s10911_s1 + $0xcac] sm:$0xf] }
 0x1e0   : > { %4161 = vmatpush.bf16.msra.mxu3 %v6176_v42  ;;  %v7345_v42 = vld [vmem:[%s10911_s1 + $0xdec] sm:$0xf]  ;;  %v6112_v51 = vor.u32 %v7253_v31, %v6109_v33  ;;  %v6589_v0 = vld [vmem:[%s10911_s1 + $0xed8] sm:$0xf0] }
 0x1e1   : > { %4123 = vmatpush.bf16.msra.mxu0 %v5776_v48  ;;  %v5984_v48 = vor.u32 %v7221_v14, %v5981_v25  ;;  %v6480_v53 = vor.u32 %v7345_v42, %v6477_v54  ;;  %v7337_v24 = vld [vmem:[%s10911_s1 + $0xdac] sm:$0xf]  ;;  %v6445_v34 = vld [vmem:[%s10911_s1 + $0xdb8] sm:$0xf0] }
 0x1e2   : > { %4136 = vmatpush.bf16.msra.mxu1 %v5904_v49  ;;  %v7409_v49 = vld [vmem:[%s10911_s1 + $0xfec] sm:$0xf]  ;;  %v6573_v8 = vld [vmem:[%s10911_s1 + $0xeb8] sm:$0xf0]  ;;  %v6448_v12 = vor.u32 %v7337_v24, %v6445_v34 }
 0x1e3   : > { %4149 = vmatpush.bf16.msra.mxu2 %v6032_v50  ;;  %v6733_v50 = vld [vmem:[%s10911_s1 + $0xff8] sm:$0xf0]  ;;  %v7369_v7 = vld [vmem:[%s10911_s1 + $0xeac] sm:$0xf] }
 0x1e4   : > { %4162 = vmatpush.bf16.msra.mxu3 %v6160_v55  ;;  %v6608_v55 = vor.u32 %v7377_v47, %v6605_v44  ;;  %v6736_v60 = vor.u32 %v7409_v49, %v6733_v50  ;;  %v6429_v40 = vld [vmem:[%s10911_s1 + $0xd98] sm:$0xf0]  ;;  %v7365_v13 = vld [vmem:[%s10911_s1 + $0xe8c] sm:$0xf] }
 0x1e5   : > { %4124 = vmatpush.bf16.msra.mxu0 %v5760_v63  ;;  %v7373_v63 = vld [vmem:[%s10911_s1 + $0xecc] sm:$0xf]  ;;  %v6557_v14 = vld [vmem:[%s10911_s1 + $0xe98] sm:$0xf0] }
 0x1e6   : > { %4137 = vmatpush.bf16.msra.mxu1 %v5888_v27  ;;  %v7405_v27 = vld [vmem:[%s10911_s1 + $0xfcc] sm:$0xf]  ;;  %v6592_v3 = vor.u32 %v7373_v63, %v6589_v0  ;;  %v6685_v25 = vld [vmem:[%s10911_s1 + $0xf98] sm:$0xf0]  ;;  %v6560_v36 = vor.u32 %v7365_v13, %v6557_v14 }
 0x1e7   : > { %4150 = vmatpush.bf16.msra.mxu2 %v6016_v1  ;;  %v6717_v1 = vld [vmem:[%s10911_s1 + $0xfd8] sm:$0xf0]  ;;  %v7297_v39 = vld [vmem:[%s10911_s1 + $0xc6c] sm:$0xf] }
 0x1e8   : > { %4163 = vmatpush.bf16.msra.mxu3 %v6144_v4  ;;  %v6317_v4 = vld [vmem:[%s10911_s1 + $0xcb8] sm:$0xf0]  ;;  %v6720_v6 = vor.u32 %v7405_v27, %v6717_v1  ;;  %v7361_v44 = vld [vmem:[%s10911_s1 + $0xe6c] sm:$0xf] }
 0x1e9   : > { %4125 = vmatpush.bf16.msra.mxu0 %v5744_v9  ;;  %v6701_v9 = vld [vmem:[%s10911_s1 + $0xfb8] sm:$0xf0]  ;;  %v6320_v10 = vor.u32 %v7305_v32, %v6317_v4  ;;  %v7325_v56 = vld [vmem:[%s10911_s1 + $0xd4c] sm:$0xf] }
 0x1ea   : > { %4138 = vmatpush.bf16.msra.mxu1 %v5872_v37  ;;  %v6576_v37 = vor.u32 %v7369_v7, %v6573_v8  ;;  %v6285_v42 = vld [vmem:[%s10911_s1 + $0xc78] sm:$0xf0]  ;;  %v7357_v61 = vld [vmem:[%s10911_s1 + $0xe4c] sm:$0xf] }
 0x1eb   : > { %4151 = vmatpush.bf16.msra.mxu2 %v6000_v38  ;;  %v7333_v38 = vld [vmem:[%s10911_s1 + $0xd8c] sm:$0xf]  ;;  %v6413_v47 = vld [vmem:[%s10911_s1 + $0xd78] sm:$0xf0]  ;;  %v6288_v50 = vor.u32 %v7297_v39, %v6285_v42 }
 0x1ec   : > { %4164 = vmatpush.bf16.msra.mxu3 %v6128_v21  ;;  %v7397_v21 = vld [vmem:[%s10911_s1 + $0xf8c] sm:$0xf]  ;;  %v6432_v35 = vor.u32 %v7333_v38, %v6429_v40  ;;  %v6669_v49 = vld [vmem:[%s10911_s1 + $0xf78] sm:$0xf0] }
 0x1ed   : > { %4126 = vmatpush.bf16.msra.mxu0 %v5728_v43  ;;  %v10651_v18 = vpop.f32.mrf.mxu0  ;;  %v7329_v43 = vld [vmem:[%s10911_s1 + $0xd6c] sm:$0xf]  ;;  %v6688_v54 = vor.u32 %v7397_v21, %v6685_v25  ;;  %v6525_v63 = vld [vmem:[%s10911_s1 + $0xe58] sm:$0xf0] }
 0x1ee   : > { %4139 = vmatpush.bf16.msra.mxu1 %v5856_v45  ;;  %v10659_v33 = vpop.f32.mrf.mxu1  ;;  %v6541_v45 = vld [vmem:[%s10911_s1 + $0xe78] sm:$0xf0]  ;;  %v7389_v27 = vld [vmem:[%s10911_s1 + $0xf4c] sm:$0xf]  ;;  %v6528_v24 = vor.u32 %v7357_v61, %v6525_v63 }
 0x1ef   : > { %4152 = vmatpush.bf16.msra.mxu2 %v5984_v48  ;;  %v7393_v48 = vld [vmem:[%s10911_s1 + $0xf6c] sm:$0xf]  ;;  %v6653_v1 = vld [vmem:[%s10911_s1 + $0xf58] sm:$0xf0] }
 0x1f0   : > { %4165 = vmatpush.bf16.msra.mxu3 %v6112_v51  ;;  %4127 = vmatmul.bf16.vlgmr.msra.gmra.mxu0 %v8177_v15  ;;  %v7401_v15 = vld [vmem:[%s10911_s1 + $0xfac] sm:$0xf]  ;;  %v6416_v51 = vor.u32 %v7329_v43, %v6413_v47  ;;  %v6672_v5 = vor.u32 %v7393_v48, %v6669_v49  ;;  %v6253_v34 = vld [vmem:[%s10911_s1 + $0xc38] sm:$0xf0] }
 0x1f1   : > { %4171 = vmatpush.bf16.msrb.mxu0 %v6352_v52  ;;  %4140 = vmatmul.bf16.vlgmr.msra.gmra.mxu1 %v8190_v20  ;;  %v6301_v20 = vld [vmem:[%s10911_s1 + $0xc98] sm:$0xf0]  ;;  %v6544_v52 = vor.u32 %v7361_v44, %v6541_v45  ;;  %v7321_v7 = vld [vmem:[%s10911_s1 + $0xd2c] sm:$0xf] }
 0x1f2   : > { %4184 = vmatpush.bf16.msrb.mxu1 %v6480_v53  ;;  %4153 = vmatmul.bf16.vlgmr.msra.gmra.mxu2 %v8188_v19  ;;  %v7301_v19 = vld [vmem:[%s10911_s1 + $0xc8c] sm:$0xf]  ;;  %v6365_v13 = vld [vmem:[%s10911_s1 + $0xd18] sm:$0xf0] }
 0x1f3   : > { %4197 = vmatpush.bf16.msrb.mxu2 %v6608_v55  ;;  %4166 = vmatmul.bf16.vlgmr.msra.gmra.mxu3 %v8198_v23  ;;  %v6704_v23 = vor.u32 %v7401_v15, %v6701_v9  ;;  %v6304_v31 = vor.u32 %v7301_v19, %v6301_v20  ;;  %v7293_v53 = vld [vmem:[%s10911_s1 + $0xc4c] sm:$0xf]  ;;  %v6269_v55 = vld [vmem:[%s10911_s1 + $0xc58] sm:$0xf0] }
 0x1f4   : > { %4210 = vmatpush.bf16.msrb.mxu3 %v6736_v60  ;;  %v6397_v60 = vld [vmem:[%s10911_s1 + $0xd58] sm:$0xf0]  ;;  %v7353_v8 = vld [vmem:[%s10911_s1 + $0xe2c] sm:$0xf] }
 0x1f5   : > { %4172 = vmatpush.bf16.msrb.mxu0 %v6336_v2  ;;  %v10694_v57 = vpop.f32.mrf.mxu2  ;;  %v3922_v2 = vpop.f32.mrf.mxu0  ;;  %v6400_v4 = vor.u32 %v7325_v56, %v6397_v60  ;;  %v6509_v15 = vld [vmem:[%s10911_s1 + $0xe38] sm:$0xf0]  ;;  %v7385_v9 = vld [vmem:[%s10911_s1 + $0xf2c] sm:$0xf]  ;;  %v7432_v56 = vld [vmem:[%s10913_s3 + $0xa0] sm:$0xff] }
 0x1f6   : > { %4185 = vmatpush.bf16.msrb.mxu1 %v6464_v28  ;;  %v10705_v0 = vpop.f32.mrf.mxu3  ;;  %v3869_v28 = vadd.f32 %v10453_v30, %v10303_v58  ;;  %v3935_v32 = vpop.f32.mrf.mxu1  ;;  %v6656_v58 = vor.u32 %v7389_v27, %v6653_v1  ;;  %v6381_v30 = vld [vmem:[%s10911_s1 + $0xd38] sm:$0xf0]  ;;  %v6512_v20 = vor.u32 %v7353_v8, %v6509_v15  ;;  %v7285_v38 = vld [vmem:[%s10911_s1 + $0xc0c] sm:$0xf]  ;;  %v7412_v15 = vld [vmem:[%s10913_s3] sm:$0xff] }
 0x1f7   : > { %4198 = vmatpush.bf16.msrb.mxu2 %v6592_v3  ;;  %v6272_v3 = vor.u32 %v7293_v53, %v6269_v55  ;;  %v6384_v19 = vor.u32 %v7321_v7, %v6381_v30  ;;  %v7317_v40 = vld [vmem:[%s10911_s1 + $0xd0c] sm:$0xf]  ;;  %v6493_v21 = vld [vmem:[%s10911_s1 + $0xe18] sm:$0xf0]  ;;  %v7424_v55 = vld [vmem:[%s10913_s3 + $0x60] sm:$0xff] }
 0x1f8   : > { %4211 = vmatpush.bf16.msrb.mxu3 %v6720_v6  ;;  %v7289_v6 = vld [vmem:[%s10911_s1 + $0xc2c] sm:$0xf]  ;;  %v6368_v43 = vor.u32 %v7317_v40, %v6365_v13  ;;  %v7419_v44 = vld [vmem:[%s10913_s3 + $0x38] sm:$0xff]  ;;  %v7422_v32 = vld [vmem:[%s10913_s3 + $0x50] sm:$0xff] }
 0x1f9   : > { %4173 = vmatpush.bf16.msrb.mxu0 %v6320_v10  ;;  %v6637_v10 = vld [vmem:[%s10911_s1 + $0xf38] sm:$0xf0]  ;;  %v7349_v14 = vld [vmem:[%s10911_s1 + $0xe0c] sm:$0xf] }
 0x1fa   : > { %4186 = vmatpush.bf16.msrb.mxu1 %v6448_v12  ;;  %v3882_v12 = vadd.f32 %v10464_v41, %v3869_v28  ;;  %v6640_v41 = vor.u32 %v7385_v9, %v6637_v10  ;;  %v7427_v45 = vld [vmem:[%s10913_s3 + $0x78] sm:$0xff]  ;;  %v7425_v53 = vld [vmem:[%s10913_s3 + $0x68] sm:$0xff]  ;;  %v7414_v28 = vld [vmem:[%s10913_s3 + $0x10] sm:$0xff]  ;;  %v4223_v9 = vmax.f32 %v9301_v26, 0.0  ;;  %v826_v26 = vperm.slane %v10237_v29, 3 }
 0x1fb   : > { %4199 = vmatpush.bf16.msrb.mxu2 %v6576_v37  ;;  %v6256_v37 = vor.u32 %v7289_v6, %v6253_v34  ;;  %v7415_v60 = vld [vmem:[%s10913_s3 + $0x18] sm:$0xff]  ;;  %v7413_v6 = vld [vmem:[%s10913_s3 + $0x8] sm:$0xff]  ;;  %v7420_v10 = vld [vmem:[%s10913_s3 + $0x40] sm:$0xff] }
 0x1fc   : > { %4212 = vmatpush.bf16.msrb.mxu3 %v6704_v23  ;;  %v6237_v23 = vld [vmem:[%s10911_s1 + $0xc18] sm:$0xf0]  ;;  %v3895_v39 = vadd.f32 %v10490_v62, %v3882_v12  ;;  %v7421_v34 = vld [vmem:[%s10913_s3 + $0x48] sm:$0xff]  ;;  %v7428_v12 = vld [vmem:[%s10913_s3 + $0x80] sm:$0xff] }
 0x1fd   : > { %4174 = vmatpush.bf16.msrb.mxu0 %v6304_v31  ;;  %v3948_v25 = vpop.f32.mrf.mxu2  ;;  %v7381_v31 = vld [vmem:[%s10911_s1 + $0xf0c] sm:$0xf]  ;;  %v6240_v42 = vor.u32 %v7285_v38, %v6237_v23  ;;  %v7435_v62 = vld [vmem:[%s10913_s3 + $0xb8] sm:$0xff] }
 0x1fe   : > { %4187 = vmatpush.bf16.msrb.mxu1 %v6432_v35  ;;  %v6621_v35 = vld [vmem:[%s10911_s1 + $0xf18] sm:$0xf0]  ;;  %v3908_v48 = vadd.f32 %v10501_v59, %v3895_v39  ;;  %v7434_v59 = vld [vmem:[%s10913_s3 + $0xb0] sm:$0xff]  ;;  %v7429_v7 = vld [vmem:[%s10913_s3 + $0x88] sm:$0xff] }
 0x1ff   : > { %4200 = vmatpush.bf16.msrb.mxu2 %v6560_v36  ;;  %v3961_v36 = vpop.f32.mrf.mxu3  ;;  %v6624_v47 = vor.u32 %v7381_v31, %v6621_v35  ;;  %v7423_v61 = vld [vmem:[%s10913_s3 + $0x58] sm:$0xff] }
 0x200   : > { %4213 = vmatpush.bf16.msrb.mxu3 %v6688_v54  ;;  %v6496_v54 = vor.u32 %v7349_v14, %v6493_v21  ;;  %v3921_v49 = vadd.f32 %v10651_v18, %v3908_v48  ;;  %v7431_v63 = vld [vmem:[%s10913_s3 + $0x98] sm:$0xff]  ;;  %v7442_v48 = vld [vmem:[%s10913_s3 + $0xf0] sm:$0xff] }
 0x201   : > { %4175 = vmatpush.bf16.msrb.mxu0 %v6288_v50  ;;  %v7418_v50 = vld [vmem:[%s10913_s3 + $0x30] sm:$0xff]  ;;  %v7443_v29 = vld [vmem:[%s10913_s3 + $0xf8] sm:$0xff] }
 0x202   : > { %4188 = vmatpush.bf16.msrb.mxu1 %v6416_v51  ;;  %v7426_v51 = vld [vmem:[%s10913_s3 + $0x70] sm:$0xff]  ;;  %v3934_v18 = vadd.f32 %v10659_v33, %v3921_v49 }
 0x203   : > { %4201 = vmatpush.bf16.msrb.mxu2 %v6544_v52  ;;  %v7417_v52 = vld [vmem:[%s10913_s3 + $0x28] sm:$0xff] }
 0x204   : > { %4214 = vmatpush.bf16.msrb.mxu3 %v6672_v5 }
 0x205   : > { %4176 = vmatpush.bf16.msrb.mxu0 %v6272_v3 }
 0x206   : > { %4189 = vmatpush.bf16.msrb.mxu1 %v6400_v4  ;;  %v7430_v4 = vld [vmem:[%s10913_s3 + $0x90] sm:$0xff] }
 0x207   : > { %4202 = vmatpush.bf16.msrb.mxu2 %v6528_v24 }
 0x208   : > { %4215 = vmatpush.bf16.msrb.mxu3 %v6656_v58 }
 0x209   : > { %4177 = vmatpush.bf16.msrb.mxu0 %v6256_v37  ;;  %v4224_v37 = vmax.f32 %v10099_v46, 0.0 }
 0x20a   : > { %4190 = vmatpush.bf16.msrb.mxu1 %v6384_v19 }
 0x20b   : > { %4203 = vmatpush.bf16.msrb.mxu2 %v6512_v20  ;;  %v4227_v20 = vpack.c.bf16 %v4223_v9, %v4223_v9  ;;  %v4228_v38 = vpack.c.bf16 %v4224_v37, %v4224_v37  ;;  %v7451_v9 = vld [vmem:[%s10915_s5 + $0x38] sm:$0xff] }
 0x20c   : > { %4216 = vmatpush.bf16.msrb.mxu3 %v6640_v41 }
 0x20d   : > { %4178 = vmatpush.bf16.msrb.mxu0 %v6240_v42 }
 0x20e   : > { %4191 = vmatpush.bf16.msrb.mxu1 %v6368_v43  ;;  %v3985_v33 = vpop.f32.mrf.mxu1 }
 0x20f   : > { %4204 = vmatpush.bf16.msrb.mxu2 %v6496_v54 }
 0x210   : > { %4217 = vmatpush.bf16.msrb.mxu3 %v6624_v47  ;;  %4179 = vmatmul.bf16.vlgmr.msrb.gmra.mxu0 %v8385_v11  ;;  %v7433_v11 = vld [vmem:[%s10913_s3 + $0xa8] sm:$0xff] }
 0x211   : > { %4491 = vmatpush.bf16.msra.mxu0 %v7419_v44  ;;  %4192 = vmatmul.bf16.vlgmr.msrb.gmra.mxu1 %v8398_v17  ;;  %v3972_v17 = vpop.f32.mrf.mxu0 }
 0x212   : > { %4504 = vmatpush.bf16.msra.mxu1 %v7427_v45  ;;  %4205 = vmatmul.bf16.vlgmr.msrb.gmra.mxu2 %v8396_v16  ;;  %v3947_v16 = vadd.f32 %v10694_v57, %v3934_v18  ;;  %v7439_v18 = vld [vmem:[%s10913_s3 + $0xd8] sm:$0xff] }
 0x213   : > { %4517 = vmatpush.bf16.msra.mxu2 %v7435_v62  ;;  %4218 = vmatmul.bf16.vlgmr.msrb.gmra.mxu3 %v8406_v22  ;;  %v7416_v22 = vld [vmem:[%s10913_s3 + $0x20] sm:$0xff] }
 0x214   : > { %v3960_v5 = vadd.f32 %v10705_v0, %v3947_v16  ;;  %4530 = vmatpush.bf16.msra.mxu3 %v7443_v29  ;;  %v7437_v16 = vld [vmem:[%s10913_s3 + $0xc8] sm:$0xff] }
 0x215   : > { %4492 = vmatpush.bf16.msra.mxu0 %v7418_v50  ;;  %v3998_v27 = vpop.f32.mrf.mxu2  ;;  %v7441_v50 = vld [vmem:[%s10913_s3 + $0xe8] sm:$0xff] }
 0x216   : > { %4505 = vmatpush.bf16.msra.mxu1 %v7426_v51  ;;  %v3973_v57 = vadd.f32 %v3972_v17, %v3960_v5  ;;  %v4011_v1 = vpop.f32.mrf.mxu3  ;;  %v3987_v3 = vpop.f32.mrf.mxu1  ;;  %v7436_v5 = vld [vmem:[%s10913_s3 + $0xc0] sm:$0xff] }
 0x217   : > { %4518 = vmatpush.bf16.msra.mxu2 %v7434_v59  ;;  %v7440_v59 = vld [vmem:[%s10913_s3 + $0xe0] sm:$0xff] }
 0x218   : > { %v3986_v0 = vadd.f32 %v3985_v33, %v3973_v57  ;;  %4531 = vmatpush.bf16.msra.mxu3 %v7442_v48 }
 0x219   : > { %4493 = vmatpush.bf16.msra.mxu0 %v7417_v52  ;;  %v3974_v2 = vpop.f32.mrf.mxu0 }
 0x21a   : > { %4506 = vmatpush.bf16.msra.mxu1 %v7425_v53  ;;  %v3999_v24 = vadd.f32 %v3998_v27, %v3986_v0 }
 0x21b   : > { %4519 = vmatpush.bf16.msra.mxu2 %v7433_v11  ;;  %v7438_v11 = vld [vmem:[%s10913_s3 + $0xd0] sm:$0xff] }
 0x21c   : > { %v4012_v58 = vadd.f32 %v4011_v1, %v3999_v24  ;;  %4532 = vmatpush.bf16.msra.mxu3 %v7441_v50 }
 0x21d   : > { %4494 = vmatpush.bf16.msra.mxu0 %v7416_v22  ;;  %v4000_v30 = vpop.f32.mrf.mxu2 }
 0x21e   : > { %4507 = vmatpush.bf16.msra.mxu1 %v7424_v55  ;;  %v4013_v8 = vpop.f32.mrf.mxu3  ;;  %v4225_v19 = vmax.f32 %v4012_v58, 0.0 }
 0x21f   : > { %4520 = vmatpush.bf16.msra.mxu2 %v7432_v56 }
 0x220   : > { %v4229_v23 = vpack.c.bf16 %v4225_v19, %v4225_v19  ;;  %4533 = vmatpush.bf16.msra.mxu3 %v7440_v59 }
 0x221   : > { %4495 = vmatpush.bf16.msra.mxu0 %v7415_v60 }
 0x222   : > { %4508 = vmatpush.bf16.msra.mxu1 %v7423_v61 }
 0x223   : > { %4521 = vmatpush.bf16.msra.mxu2 %v7431_v63 }
 0x224   : > { %4534 = vmatpush.bf16.msra.mxu3 %v7439_v18 }
 0x225   : > { %4496 = vmatpush.bf16.msra.mxu0 %v7414_v28 }
 0x226   : > { %4509 = vmatpush.bf16.msra.mxu1 %v7422_v32 }
 0x227   : > { %4522 = vmatpush.bf16.msra.mxu2 %v7430_v4 }
 0x228   : > { %4535 = vmatpush.bf16.msra.mxu3 %v7438_v11 }
 0x229   : > { %4497 = vmatpush.bf16.msra.mxu0 %v7413_v6 }
 0x22a   : > { %4510 = vmatpush.bf16.msra.mxu1 %v7421_v34 }
 0x22b   : > { %4523 = vmatpush.bf16.msra.mxu2 %v7429_v7 }
 0x22c   : > { %4536 = vmatpush.bf16.msra.mxu3 %v7437_v16 }
 0x22d   : > { %4498 = vmatpush.bf16.msra.mxu0 %v7412_v15  ;;  %v4024_v40 = vpop.f32.mrf.mxu0 }
 0x22e   : > { %4511 = vmatpush.bf16.msra.mxu1 %v7420_v10  ;;  %v4025_v41 = vadd.f32 %v4024_v40, %v826_v26  ;;  %v4037_v13 = vpop.f32.mrf.mxu1  ;;  %v7447_v26 = vld [vmem:[%s10915_s5 + $0x18] sm:$0xff] }
 0x22f   : > { %4524 = vmatpush.bf16.msra.mxu2 %v7428_v12  ;;  %v7450_v12 = vld [vmem:[%s10915_s5 + $0x30] sm:$0xff] }
 0x230   : > { %4499 = vmatmul.bf16.vlgmr.msra.gmra.mxu0 %v4227_v20  ;;  %v4038_v14 = vadd.f32 %v4037_v13, %v4025_v41  ;;  %4537 = vmatpush.bf16.msra.mxu3 %v7436_v5  ;;  %v7449_v20 = vld [vmem:[%s10915_s5 + $0x28] sm:$0xff] }
 0x231   : > { %4512 = vmatmul.bf16.vlgmr.msra.gmra.mxu1 %v4228_v38  ;;  %4613 = vmatpush.bf16.msrb.mxu0 %v7451_v9  ;;  %v7448_v38 = vld [vmem:[%s10915_s5 + $0x20] sm:$0xff] }
 0x232   : > { %4525 = vmatmul.bf16.vlgmr.msra.gmra.mxu2 %v4229_v23  ;;  %v7460_v23 = vld [vmem:[%s10914_s4] ss:$0 sm:$0xff] }
 0x235   : > { %v4050_v21 = vpop.f32.mrf.mxu2  ;;  %v4026_v35 = vpop.f32.mrf.mxu0  ;;  %4614 = vmatpush.bf16.msrb.mxu0 %v7450_v12 }
 0x236   : > { %v4051_v25 = vadd.f32 %v4050_v21, %v4038_v14  ;;  %v4063_v31 = vpop.f32.mrf.mxu3  ;;  %v4039_v36 = vpop.f32.mrf.mxu1  ;;  %v7446_v14 = vld [vmem:[%s10915_s5 + $0x10] sm:$0xff] }
 0x238   : > { %v4064_v46 = vadd.f32 %v4063_v31, %v4051_v25 }
 0x239   : > { %4615 = vmatpush.bf16.msrb.mxu0 %v7449_v20 }
 0x23d   : > { %v4052_v39 = vpop.f32.mrf.mxu2  ;;  %4616 = vmatpush.bf16.msrb.mxu0 %v7448_v38 }
 0x23e   : > { %v4065_v42 = vpop.f32.mrf.mxu3  ;;  %v7445_v39 = vld [vmem:[%s10915_s5 + $0x8] sm:$0xff] }
 0x23f   : > { %v7444_v42 = vld [vmem:[%s10915_s5] sm:$0xff] }
 0x241   : > { %4617 = vmatpush.bf16.msrb.mxu0 %v7447_v26 }
 0x245   : > { %4618 = vmatpush.bf16.msrb.mxu0 %v7446_v14 }
 0x249   : > { %4619 = vmatpush.bf16.msrb.mxu0 %v7445_v39 }
 0x24d   : > { %v4076_v43 = vpop.f32.mrf.mxu0  ;;  %4620 = vmatpush.bf16.msrb.mxu0 %v7444_v42 }
 0x24e   : > { %v4089_v54 = vpop.f32.mrf.mxu1  ;;  %v4077_v17 = vadd.f32 %v4076_v43, %v4064_v46 }
 0x250   : > { %v4090_v57 = vadd.f32 %v4089_v54, %v4077_v17 }
 0x255   : > { %v4102_v47 = vpop.f32.mrf.mxu2  ;;  %v4078_v45 = vpop.f32.mrf.mxu0 }
 0x256   : > { %v4115_v44 = vpop.f32.mrf.mxu3  ;;  %v4091_v62 = vpop.f32.mrf.mxu1  ;;  %v4103_v60 = vadd.f32 %v4102_v47, %v4090_v57  ;;  %v7461_v45 = vld [vmem:[%s10916_s6] ss:$0 sm:$0xff] }
 0x258   : > { %v4116_v27 = vadd.f32 %v4115_v44, %v4103_v60 }
 0x25d   : > { %v4104_v49 = vpop.f32.mrf.mxu2 }
 0x25e   : > { %v4117_v51 = vpop.f32.mrf.mxu3 }
 0x26d   : > { %v4128_v52 = vpop.f32.mrf.mxu0 }
 0x26e   : > { %v4141_v53 = vpop.f32.mrf.mxu1  ;;  %v4129_v1 = vadd.f32 %v4128_v52, %v4116_v27 }
 0x270   : > { %v4142_v2 = vadd.f32 %v4141_v53, %v4129_v1 }
 0x275   : > { %v4154_v22 = vpop.f32.mrf.mxu2  ;;  %v4130_v55 = vpop.f32.mrf.mxu0 }
 0x276   : > { %v4167_v33 = vpop.f32.mrf.mxu3  ;;  %v4143_v56 = vpop.f32.mrf.mxu1  ;;  %v4155_v0 = vadd.f32 %v4154_v22, %v4142_v2 }
 0x278   : > { %v4168_v28 = vadd.f32 %v4167_v33, %v4155_v0 }
 0x27d   : > { %v4156_v61 = vpop.f32.mrf.mxu2 }
 0x27e   : > { %v4169_v63 = vpop.f32.mrf.mxu3 }
 0x28d   : > { %v4180_v3 = vpop.f32.mrf.mxu0 }
 0x28e   : > { %v4193_v32 = vpop.f32.mrf.mxu1  ;;  %v4181_v4 = vadd.f32 %v4180_v3, %v4168_v28 }
 0x290   : > { %v4194_v24 = vadd.f32 %v4193_v32, %v4181_v4 }
 0x295   : > { %v4206_v6 = vpop.f32.mrf.mxu2  ;;  %v4182_v58 = vpop.f32.mrf.mxu0 }
 0x296   : > { %v4219_v34 = vpop.f32.mrf.mxu3  ;;  %v4207_v7 = vadd.f32 %v4206_v6, %v4194_v24  ;;  %v4195_v30 = vpop.f32.mrf.mxu1 }
 0x298   : > { %v4220_v8 = vadd.f32 %v4219_v34, %v4207_v7 }
 0x29a   : > { %v4226_v15 = vmax.f32 %v4220_v8, 0.0 }
 0x29c   : > { %v4230_v10 = vpack.c.bf16 %v4226_v15, %v4226_v15 }
 0x29d   : > { %v4208_v37 = vpop.f32.mrf.mxu2 }
 0x29e   : > { %v4221_v19 = vpop.f32.mrf.mxu3  ;;  %4538 = vmatmul.bf16.vlgmr.msra.gmra.mxu3 %v4230_v10 }
 0x2ad   : > { %v4500_v40 = vpop.f32.mrf.mxu0 }
 0x2ae   : > { %v4501_v41 = vadd.f32 %v7460_v23, %v4500_v40  ;;  %v4513_v13 = vpop.f32.mrf.mxu1 }
 0x2b0   : > { %v4514_v21 = vadd.f32 %v4513_v13, %v4501_v41 }
 0x2b5   : > { %v4526_v25 = vpop.f32.mrf.mxu2  ;;  %v4502_v46 = vpop.f32.mrf.mxu0 }
 0x2b6   : > { %v4527_v31 = vadd.f32 %v4526_v25, %v4514_v21  ;;  %v4515_v35 = vpop.f32.mrf.mxu1 }
 0x2bd   : > { %v4528_v36 = vpop.f32.mrf.mxu2 }
 0x321   : > { %v4539_v43 = vpop.f32.mrf.mxu3 }
 0x322   : > { %v4540_v54 = vadd.f32 %v4539_v43, %v4527_v31 }
 0x324   : > { %v4543_v47 = vmax.f32 %v4540_v54, 0.0 }
 0x326   : > { %v4544_v44 = vpack.c.bf16 %v4543_v47, %v4543_v47 }
 0x328   : > { %4621 = vmatmul.bf16.vlgmr.msrb.gmra.mxu0 %v4544_v44 }
 0x329   : > { %v4541_v29 = vpop.f32.mrf.mxu3 }
 0x3a5   : > { %v4622_v62 = vpop.f32.mrf.mxu0 }
 0x3a6   : > { %v4623_v48 = vadd.f32 %v7461_v45, %v4622_v62 }
 0x3a8   : > { %4627 = vst.msk [vmem:[%s276_s22] sm:$0xff] %vm4626_vm0, %v4623_v48 }
 0x3ad   : > { %v4624_v49 = vpop.f32.mrf.mxu0 }
 0x3ae PF: > { %s17_s24 = sadd.s32 1, %s7470_s24  }
 0x3af   : > { %p14_p4 = scmp.ge.s32.totalorder %s17_s24, 4  }
 0x3b1   :  { %16 = sbr.rel (!%p14_p4) target bundleno = 1 (0x1), region = 78 }

</bundles_post_ra>
